<compile_context>
chip_gen: v7x
topology: tpu7x:2x2x1
jax: 0.10.0
libtpu: 0.0.40
codegen_flags: <defaults>
</compile_context>

<pallas_src>
import jax
import jax.numpy as jnp
from jax import lax
from jax.experimental import pallas as pl
from jax.experimental.pallas import tpu as pltpu

C_OUT = 3
KH = 5
KW = 5
SUB_CONST = 0.09766342

H_IN, W_IN = 112, 112
H_OUT = H_IN - KH + 1          # 108
W_OUT = W_IN - KW + 1          # 108
ROW_CHUNK = 54                 # 108 = 2 * 54
N_ROW_CHUNKS = H_OUT // ROW_CHUNK


def conv_sub_kernel(w_ref, x_ref, o_ref, xs_ref):
    # w_ref : SMEM (C_OUT*KH*KW,) f32        flattened conv weights (scalar operands)
    # x_ref : VMEM (1, 1, H_IN, W_IN) f32     raw input plane, no padding
    # o_ref : VMEM (1, C_OUT, H_OUT, W_OUT)   final output
    # xs_ref: VMEM (KW, H_IN, W_OUT) f32      kw-shifted copies of the input plane

    # ---- Prologue: hoist the lane (kw) shift out of the MAC loop ------------------
    # One lane-rotate pass (XLU) per kw; afterwards every inner-loop window load is a
    # lane-aligned, sublane-offset vld, keeping the VALU slot free of selects.
    for kw in range(KW):
        xs_ref[kw, :, :] = x_ref[0, 0, :, kw:kw + W_OUT]

    # ---- Main loop: 2 row chunks via fori_loop (bounds vreg live ranges) ----------
    def row_chunk(r, carry):
        r0 = r * ROW_CHUNK
        # Fold the constant subtraction into the accumulator initial value.
        accs = [jnp.full((ROW_CHUNK, W_OUT), -SUB_CONST, dtype=jnp.float32)
                for _ in range(C_OUT)]
        for kh in range(KH):
            for kw in range(KW):
                # Lane-aligned load; row offset handled by sublane addressing.
                window = xs_ref[kw, pl.ds(r0 + kh, ROW_CHUNK), :]
                for c in range(C_OUT):
                    w_scalar = w_ref[c * (KH * KW) + kh * KW + kw]
                    accs[c] = accs[c] + w_scalar * window
        for c in range(C_OUT):
            o_ref[0, c, pl.ds(r0, ROW_CHUNK), :] = accs[c]
        return carry

    lax.fori_loop(0, N_ROW_CHUNKS, row_chunk, 0)


@jax.jit
def conv_sub(x_nchw, w_flat):
    """x_nchw: (1, 1, 112, 112) f32.  w_flat: (C_OUT*KH*KW,) f32 (flattened once).
    Returns (1, C_OUT, 108, 108) f32, matching the PyTorch forward."""
    assert x_nchw.shape == (1, 1, H_IN, W_IN)
    assert w_flat.shape == (C_OUT * KH * KW,)

    return pl.pallas_call(
        conv_sub_kernel,
        out_shape=jax.ShapeDtypeStruct((1, C_OUT, H_OUT, W_OUT), jnp.float32),
        in_specs=[
            pl.BlockSpec(memory_space=pltpu.MemorySpace.SMEM),   # weights
            pl.BlockSpec(memory_space=pltpu.MemorySpace.VMEM),   # input plane
        ],
        out_specs=pl.BlockSpec(memory_space=pltpu.MemorySpace.VMEM),
        scratch_shapes=[pltpu.VMEM((KW, H_IN, W_OUT), jnp.float32)],
        cost_estimate=pl.CostEstimate(
            flops=2 * C_OUT * H_OUT * W_OUT * KH * KW,
            transcendentals=0,
            bytes_accessed=4 * (H_IN * W_IN + C_OUT * H_OUT * W_OUT + C_OUT * KH * KW),
        ),
    )(w_flat, x_nchw)


def conv_sub_reference(x_nchw, weight):
    out = lax.conv_general_dilated(
        x_nchw, weight,
        window_strides=(1, 1), padding="VALID",
        dimension_numbers=("NCHW", "OIHW", "NCHW"),
    )
    return out - SUB_CONST


if __name__ == "__main__":
    key = jax.random.PRNGKey(0)
    kx, kw_key = jax.random.split(key)

    # Input consistent with the module's forward: (1, 1, 112, 112) NCHW
    x = jax.random.normal(kx, (1, 1, H_IN, W_IN), dtype=jnp.float32)

    # Deterministic weight init (shape from Conv2d(1, 3, 5, bias=False)): (3, 1, 5, 5)
    fan_in = 1 * KH * KW
    bound = 1.0 / (fan_in ** 0.5)
    weight = jax.random.uniform(
        kw_key, (C_OUT, 1, KH, KW), dtype=jnp.float32, minval=-bound, maxval=bound
    )
    # Fixed parameter: flatten once, outside the per-call hot path.
    w_flat = weight.reshape(-1)

    y = conv_sub(x, w_flat)
    y = jax.block_until_ready(y)

    y_ref = conv_sub_reference(x, weight)
    assert y.shape == (1, C_OUT, H_OUT, W_OUT), y.shape
    assert jnp.allclose(y, y_ref, atol=1e-4, rtol=1e-4), "mismatch vs reference conv"

    print("KERNEL_OK")
</pallas_src>

<mosaic_0001>
module attributes {stable_mosaic.version = 11 : i64} {
  func.func @conv_sub_kernel(%arg0: memref<75xf32, #tpu.memory_space<smem>>, %arg1: memref<1x1x112x112xf32, #tpu.memory_space<vmem>>, %arg2: memref<1x3x108x108xf32, #tpu.memory_space<vmem>>, %arg3: memref<5x112x108xf32, #tpu.memory_space<vmem>>) attributes {dimension_semantics = [], scalar_prefetch = 0 : i64, scratch_operands = 1 : i64, tpu.core_type = #tpu.core_type<tc>} {
    %c0 = arith.constant 0 : index
    %c0_0 = arith.constant 0 : index
    %c0_1 = arith.constant 0 : index
    %c0_2 = arith.constant 0 : index
    %0 = vector.load %arg1[%c0, %c0_0, %c0_1, %c0_2] : memref<1x1x112x112xf32, #tpu.memory_space<vmem>>, vector<1x1x112x108xf32>
    %1 = vector.shape_cast %0 : vector<1x1x112x108xf32> to vector<112x108xf32>
    %c0_3 = arith.constant 0 : index
    %c0_4 = arith.constant 0 : index
    %c0_5 = arith.constant 0 : index
    %2 = vector.load %arg3[%c0_3, %c0_4, %c0_5] : memref<5x112x108xf32, #tpu.memory_space<vmem>>, vector<1x112x108xf32>
    %3 = vector.shape_cast %2 : vector<1x112x108xf32> to vector<112x108xf32>
    %4 = vector.shape_cast %1 : vector<112x108xf32> to vector<1x112x108xf32>
    tpu.vector_store %arg3[%c0_3, %c0_4, %c0_5], %4 {strides = array<i32>} : memref<5x112x108xf32, #tpu.memory_space<vmem>>, vector<1x112x108xf32>,
    %c0_6 = arith.constant 0 : index
    %c0_7 = arith.constant 0 : index
    %c0_8 = arith.constant 0 : index
    %c1 = arith.constant 1 : index
    %5 = vector.load %arg1[%c0_6, %c0_7, %c0_8, %c1] : memref<1x1x112x112xf32, #tpu.memory_space<vmem>>, vector<1x1x112x108xf32>
    %6 = vector.shape_cast %5 : vector<1x1x112x108xf32> to vector<112x108xf32>
    %c1_9 = arith.constant 1 : index
    %c0_10 = arith.constant 0 : index
    %c0_11 = arith.constant 0 : index
    %7 = vector.load %arg3[%c1_9, %c0_10, %c0_11] : memref<5x112x108xf32, #tpu.memory_space<vmem>>, vector<1x112x108xf32>
    %8 = vector.shape_cast %7 : vector<1x112x108xf32> to vector<112x108xf32>
    %9 = vector.shape_cast %6 : vector<112x108xf32> to vector<1x112x108xf32>
    tpu.vector_store %arg3[%c1_9, %c0_10, %c0_11], %9 {strides = array<i32>} : memref<5x112x108xf32, #tpu.memory_space<vmem>>, vector<1x112x108xf32>,
    %c0_12 = arith.constant 0 : index
    %c0_13 = arith.constant 0 : index
    %c0_14 = arith.constant 0 : index
    %c2 = arith.constant 2 : index
    %10 = vector.load %arg1[%c0_12, %c0_13, %c0_14, %c2] : memref<1x1x112x112xf32, #tpu.memory_space<vmem>>, vector<1x1x112x108xf32>
    %11 = vector.shape_cast %10 : vector<1x1x112x108xf32> to vector<112x108xf32>
    %c2_15 = arith.constant 2 : index
    %c0_16 = arith.constant 0 : index
    %c0_17 = arith.constant 0 : index
    %12 = vector.load %arg3[%c2_15, %c0_16, %c0_17] : memref<5x112x108xf32, #tpu.memory_space<vmem>>, vector<1x112x108xf32>
    %13 = vector.shape_cast %12 : vector<1x112x108xf32> to vector<112x108xf32>
    %14 = vector.shape_cast %11 : vector<112x108xf32> to vector<1x112x108xf32>
    tpu.vector_store %arg3[%c2_15, %c0_16, %c0_17], %14 {strides = array<i32>} : memref<5x112x108xf32, #tpu.memory_space<vmem>>, vector<1x112x108xf32>,
    %c0_18 = arith.constant 0 : index
    %c0_19 = arith.constant 0 : index
    %c0_20 = arith.constant 0 : index
    %c3 = arith.constant 3 : index
    %15 = vector.load %arg1[%c0_18, %c0_19, %c0_20, %c3] : memref<1x1x112x112xf32, #tpu.memory_space<vmem>>, vector<1x1x112x108xf32>
    %16 = vector.shape_cast %15 : vector<1x1x112x108xf32> to vector<112x108xf32>
    %c3_21 = arith.constant 3 : index
    %c0_22 = arith.constant 0 : index
    %c0_23 = arith.constant 0 : index
    %17 = vector.load %arg3[%c3_21, %c0_22, %c0_23] : memref<5x112x108xf32, #tpu.memory_space<vmem>>, vector<1x112x108xf32>
    %18 = vector.shape_cast %17 : vector<1x112x108xf32> to vector<112x108xf32>
    %19 = vector.shape_cast %16 : vector<112x108xf32> to vector<1x112x108xf32>
    tpu.vector_store %arg3[%c3_21, %c0_22, %c0_23], %19 {strides = array<i32>} : memref<5x112x108xf32, #tpu.memory_space<vmem>>, vector<1x112x108xf32>,
    %c0_24 = arith.constant 0 : index
    %c0_25 = arith.constant 0 : index
    %c0_26 = arith.constant 0 : index
    %c4 = arith.constant 4 : index
    %20 = vector.load %arg1[%c0_24, %c0_25, %c0_26, %c4] : memref<1x1x112x112xf32, #tpu.memory_space<vmem>>, vector<1x1x112x108xf32>
    %21 = vector.shape_cast %20 : vector<1x1x112x108xf32> to vector<112x108xf32>
    %c4_27 = arith.constant 4 : index
    %c0_28 = arith.constant 0 : index
    %c0_29 = arith.constant 0 : index
    %22 = vector.load %arg3[%c4_27, %c0_28, %c0_29] : memref<5x112x108xf32, #tpu.memory_space<vmem>>, vector<1x112x108xf32>
    %23 = vector.shape_cast %22 : vector<1x112x108xf32> to vector<112x108xf32>
    %24 = vector.shape_cast %21 : vector<112x108xf32> to vector<1x112x108xf32>
    tpu.vector_store %arg3[%c4_27, %c0_28, %c0_29], %24 {strides = array<i32>} : memref<5x112x108xf32, #tpu.memory_space<vmem>>, vector<1x112x108xf32>,
    %c0_i32 = arith.constant 0 : i32
    %c2_i32 = arith.constant 2 : i32
    %25 = arith.addi %c0_i32, %c2_i32 : i32
    %c1_i32 = arith.constant 1 : i32
    scf.for %arg4 = %c0_i32 to %25 step %c1_i32  : i32 {
      %c54_i32 = arith.constant 54 : i32
      %26 = arith.muli %arg4, %c54_i32 : i32
      %cst = arith.constant -0.0976634174 : f32
      %27 = vector.broadcast %cst : f32 to vector<54x108xf32>
      %cst_31 = arith.constant -0.0976634174 : f32
      %28 = vector.broadcast %cst_31 : f32 to vector<54x108xf32>
      %cst_32 = arith.constant -0.0976634174 : f32
      %29 = vector.broadcast %cst_32 : f32 to vector<54x108xf32>
      %c0_i32_33 = arith.constant 0 : i32
      %30 = arith.addi %26, %c0_i32_33 : i32
      %c0_34 = arith.constant 0 : index
      %31 = arith.index_cast %30 : i32 to index
      %c0_35 = arith.constant 0 : index
      %32 = vector.load %arg3[%c0_34, %31, %c0_35] : memref<5x112x108xf32, #tpu.memory_space<vmem>>, vector<1x54x108xf32>
      %33 = vector.shape_cast %32 : vector<1x54x108xf32> to vector<54x108xf32>
      %c0_36 = arith.constant 0 : index
      %34 = memref.load %arg0[%c0_36] : memref<75xf32, #tpu.memory_space<smem>>
      %35 = vector.broadcast %34 : f32 to vector<54x108xf32>
      %36 = arith.mulf %35, %33 : vector<54x108xf32>
      %37 = arith.addf %27, %36 : vector<54x108xf32>
      %c25 = arith.constant 25 : index
      %38 = memref.load %arg0[%c25] : memref<75xf32, #tpu.memory_space<smem>>
      %39 = vector.broadcast %38 : f32 to vector<54x108xf32>
      %40 = arith.mulf %39, %33 : vector<54x108xf32>
      %41 = arith.addf %28, %40 : vector<54x108xf32>
      %c50 = arith.constant 50 : index
      %42 = memref.load %arg0[%c50] : memref<75xf32, #tpu.memory_space<smem>>
      %43 = vector.broadcast %42 : f32 to vector<54x108xf32>
      %44 = arith.mulf %43, %33 : vector<54x108xf32>
      %45 = arith.addf %29, %44 : vector<54x108xf32>
      %c0_i32_37 = arith.constant 0 : i32
      %46 = arith.addi %26, %c0_i32_37 : i32
      %c1_38 = arith.constant 1 : index
      %47 = arith.index_cast %46 : i32 to index
      %c0_39 = arith.constant 0 : index
      %48 = vector.load %arg3[%c1_38, %47, %c0_39] : memref<5x112x108xf32, #tpu.memory_space<vmem>>, vector<1x54x108xf32>
      %49 = vector.shape_cast %48 : vector<1x54x108xf32> to vector<54x108xf32>
      %c1_40 = arith.constant 1 : index
      %50 = memref.load %arg0[%c1_40] : memref<75xf32, #tpu.memory_space<smem>>
      %51 = vector.broadcast %50 : f32 to vector<54x108xf32>
      %52 = arith.mulf %51, %49 : vector<54x108xf32>
      %53 = arith.addf %37, %52 : vector<54x108xf32>
      %c26 = arith.constant 26 : index
      %54 = memref.load %arg0[%c26] : memref<75xf32, #tpu.memory_space<smem>>
      %55 = vector.broadcast %54 : f32 to vector<54x108xf32>
      %56 = arith.mulf %55, %49 : vector<54x108xf32>
      %57 = arith.addf %41, %56 : vector<54x108xf32>
      %c51 = arith.constant 51 : index
      %58 = memref.load %arg0[%c51] : memref<75xf32, #tpu.memory_space<smem>>
      %59 = vector.broadcast %58 : f32 to vector<54x108xf32>
      %60 = arith.mulf %59, %49 : vector<54x108xf32>
      %61 = arith.addf %45, %60 : vector<54x108xf32>
      %c0_i32_41 = arith.constant 0 : i32
      %62 = arith.addi %26, %c0_i32_41 : i32
      %c2_42 = arith.constant 2 : index
      %63 = arith.index_cast %62 : i32 to index
      %c0_43 = arith.constant 0 : index
      %64 = vector.load %arg3[%c2_42, %63, %c0_43] : memref<5x112x108xf32, #tpu.memory_space<vmem>>, vector<1x54x108xf32>
      %65 = vector.shape_cast %64 : vector<1x54x108xf32> to vector<54x108xf32>
      %c2_44 = arith.constant 2 : index
      %66 = memref.load %arg0[%c2_44] : memref<75xf32, #tpu.memory_space<smem>>
      %67 = vector.broadcast %66 : f32 to vector<54x108xf32>
      %68 = arith.mulf %67, %65 : vector<54x108xf32>
      %69 = arith.addf %53, %68 : vector<54x108xf32>
      %c27 = arith.constant 27 : index
      %70 = memref.load %arg0[%c27] : memref<75xf32, #tpu.memory_space<smem>>
      %71 = vector.broadcast %70 : f32 to vector<54x108xf32>
      %72 = arith.mulf %71, %65 : vector<54x108xf32>
      %73 = arith.addf %57, %72 : vector<54x108xf32>
      %c52 = arith.constant 52 : index
      %74 = memref.load %arg0[%c52] : memref<75xf32, #tpu.memory_space<smem>>
      %75 = vector.broadcast %74 : f32 to vector<54x108xf32>
      %76 = arith.mulf %75, %65 : vector<54x108xf32>
      %77 = arith.addf %61, %76 : vector<54x108xf32>
      %c0_i32_45 = arith.constant 0 : i32
      %78 = arith.addi %26, %c0_i32_45 : i32
      %c3_46 = arith.constant 3 : index
      %79 = arith.index_cast %78 : i32 to index
      %c0_47 = arith.constant 0 : index
      %80 = vector.load %arg3[%c3_46, %79, %c0_47] : memref<5x112x108xf32, #tpu.memory_space<vmem>>, vector<1x54x108xf32>
      %81 = vector.shape_cast %80 : vector<1x54x108xf32> to vector<54x108xf32>
      %c3_48 = arith.constant 3 : index
      %82 = memref.load %arg0[%c3_48] : memref<75xf32, #tpu.memory_space<smem>>
      %83 = vector.broadcast %82 : f32 to vector<54x108xf32>
      %84 = arith.mulf %83, %81 : vector<54x108xf32>
      %85 = arith.addf %69, %84 : vector<54x108xf32>
      %c28 = arith.constant 28 : index
      %86 = memref.load %arg0[%c28] : memref<75xf32, #tpu.memory_space<smem>>
      %87 = vector.broadcast %86 : f32 to vector<54x108xf32>
      %88 = arith.mulf %87, %81 : vector<54x108xf32>
      %89 = arith.addf %73, %88 : vector<54x108xf32>
      %c53 = arith.constant 53 : index
      %90 = memref.load %arg0[%c53] : memref<75xf32, #tpu.memory_space<smem>>
      %91 = vector.broadcast %90 : f32 to vector<54x108xf32>
      %92 = arith.mulf %91, %81 : vector<54x108xf32>
      %93 = arith.addf %77, %92 : vector<54x108xf32>
      %c0_i32_49 = arith.constant 0 : i32
      %94 = arith.addi %26, %c0_i32_49 : i32
      %c4_50 = arith.constant 4 : index
      %95 = arith.index_cast %94 : i32 to index
      %c0_51 = arith.constant 0 : index
      %96 = vector.load %arg3[%c4_50, %95, %c0_51] : memref<5x112x108xf32, #tpu.memory_space<vmem>>, vector<1x54x108xf32>
      %97 = vector.shape_cast %96 : vector<1x54x108xf32> to vector<54x108xf32>
      %c4_52 = arith.constant 4 : index
      %98 = memref.load %arg0[%c4_52] : memref<75xf32, #tpu.memory_space<smem>>
      %99 = vector.broadcast %98 : f32 to vector<54x108xf32>
      %100 = arith.mulf %99, %97 : vector<54x108xf32>
      %101 = arith.addf %85, %100 : vector<54x108xf32>
      %c29 = arith.constant 29 : index
      %102 = memref.load %arg0[%c29] : memref<75xf32, #tpu.memory_space<smem>>
      %103 = vector.broadcast %102 : f32 to vector<54x108xf32>
      %104 = arith.mulf %103, %97 : vector<54x108xf32>
      %105 = arith.addf %89, %104 : vector<54x108xf32>
      %c54 = arith.constant 54 : index
      %106 = memref.load %arg0[%c54] : memref<75xf32, #tpu.memory_space<smem>>
      %107 = vector.broadcast %106 : f32 to vector<54x108xf32>
      %108 = arith.mulf %107, %97 : vector<54x108xf32>
      %109 = arith.addf %93, %108 : vector<54x108xf32>
      %c1_i32_53 = arith.constant 1 : i32
      %110 = arith.addi %26, %c1_i32_53 : i32
      %c0_54 = arith.constant 0 : index
      %111 = arith.index_cast %110 : i32 to index
      %c0_55 = arith.constant 0 : index
      %112 = vector.load %arg3[%c0_54, %111, %c0_55] : memref<5x112x108xf32, #tpu.memory_space<vmem>>, vector<1x54x108xf32>
      %113 = vector.shape_cast %112 : vector<1x54x108xf32> to vector<54x108xf32>
      %c5 = arith.constant 5 : index
      %114 = memref.load %arg0[%c5] : memref<75xf32, #tpu.memory_space<smem>>
      %115 = vector.broadcast %114 : f32 to vector<54x108xf32>
      %116 = arith.mulf %115, %113 : vector<54x108xf32>
      %117 = arith.addf %101, %116 : vector<54x108xf32>
      %c30 = arith.constant 30 : index
      %118 = memref.load %arg0[%c30] : memref<75xf32, #tpu.memory_space<smem>>
      %119 = vector.broadcast %118 : f32 to vector<54x108xf32>
      %120 = arith.mulf %119, %113 : vector<54x108xf32>
      %121 = arith.addf %105, %120 : vector<54x108xf32>
      %c55 = arith.constant 55 : index
      %122 = memref.load %arg0[%c55] : memref<75xf32, #tpu.memory_space<smem>>
      %123 = vector.broadcast %122 : f32 to vector<54x108xf32>
      %124 = arith.mulf %123, %113 : vector<54x108xf32>
      %125 = arith.addf %109, %124 : vector<54x108xf32>
      %c1_i32_56 = arith.constant 1 : i32
      %126 = arith.addi %26, %c1_i32_56 : i32
      %c1_57 = arith.constant 1 : index
      %127 = arith.index_cast %126 : i32 to index
      %c0_58 = arith.constant 0 : index
      %128 = vector.load %arg3[%c1_57, %127, %c0_58] : memref<5x112x108xf32, #tpu.memory_space<vmem>>, vector<1x54x108xf32>
      %129 = vector.shape_cast %128 : vector<1x54x108xf32> to vector<54x108xf32>
      %c6 = arith.constant 6 : index
      %130 = memref.load %arg0[%c6] : memref<75xf32, #tpu.memory_space<smem>>
      %131 = vector.broadcast %130 : f32 to vector<54x108xf32>
      %132 = arith.mulf %131, %129 : vector<54x108xf32>
      %133 = arith.addf %117, %132 : vector<54x108xf32>
      %c31 = arith.constant 31 : index
      %134 = memref.load %arg0[%c31] : memref<75xf32, #tpu.memory_space<smem>>
      %135 = vector.broadcast %134 : f32 to vector<54x108xf32>
      %136 = arith.mulf %135, %129 : vector<54x108xf32>
      %137 = arith.addf %121, %136 : vector<54x108xf32>
      %c56 = arith.constant 56 : index
      %138 = memref.load %arg0[%c56] : memref<75xf32, #tpu.memory_space<smem>>
      %139 = vector.broadcast %138 : f32 to vector<54x108xf32>
      %140 = arith.mulf %139, %129 : vector<54x108xf32>
      %141 = arith.addf %125, %140 : vector<54x108xf32>
      %c1_i32_59 = arith.constant 1 : i32
      %142 = arith.addi %26, %c1_i32_59 : i32
      %c2_60 = arith.constant 2 : index
      %143 = arith.index_cast %142 : i32 to index
      %c0_61 = arith.constant 0 : index
      %144 = vector.load %arg3[%c2_60, %143, %c0_61] : memref<5x112x108xf32, #tpu.memory_space<vmem>>, vector<1x54x108xf32>
      %145 = vector.shape_cast %144 : vector<1x54x108xf32> to vector<54x108xf32>
      %c7 = arith.constant 7 : index
      %146 = memref.load %arg0[%c7] : memref<75xf32, #tpu.memory_space<smem>>
      %147 = vector.broadcast %146 : f32 to vector<54x108xf32>
      %148 = arith.mulf %147, %145 : vector<54x108xf32>
      %149 = arith.addf %133, %148 : vector<54x108xf32>
      %c32 = arith.constant 32 : index
      %150 = memref.load %arg0[%c32] : memref<75xf32, #tpu.memory_space<smem>>
      %151 = vector.broadcast %150 : f32 to vector<54x108xf32>
      %152 = arith.mulf %151, %145 : vector<54x108xf32>
      %153 = arith.addf %137, %152 : vector<54x108xf32>
      %c57 = arith.constant 57 : index
      %154 = memref.load %arg0[%c57] : memref<75xf32, #tpu.memory_space<smem>>
      %155 = vector.broadcast %154 : f32 to vector<54x108xf32>
      %156 = arith.mulf %155, %145 : vector<54x108xf32>
      %157 = arith.addf %141, %156 : vector<54x108xf32>
      %c1_i32_62 = arith.constant 1 : i32
      %158 = arith.addi %26, %c1_i32_62 : i32
      %c3_63 = arith.constant 3 : index
      %159 = arith.index_cast %158 : i32 to index
      %c0_64 = arith.constant 0 : index
      %160 = vector.load %arg3[%c3_63, %159, %c0_64] : memref<5x112x108xf32, #tpu.memory_space<vmem>>, vector<1x54x108xf32>
      %161 = vector.shape_cast %160 : vector<1x54x108xf32> to vector<54x108xf32>
      %c8 = arith.constant 8 : index
      %162 = memref.load %arg0[%c8] : memref<75xf32, #tpu.memory_space<smem>>
      %163 = vector.broadcast %162 : f32 to vector<54x108xf32>
      %164 = arith.mulf %163, %161 : vector<54x108xf32>
      %165 = arith.addf %149, %164 : vector<54x108xf32>
      %c33 = arith.constant 33 : index
      %166 = memref.load %arg0[%c33] : memref<75xf32, #tpu.memory_space<smem>>
      %167 = vector.broadcast %166 : f32 to vector<54x108xf32>
      %168 = arith.mulf %167, %161 : vector<54x108xf32>
      %169 = arith.addf %153, %168 : vector<54x108xf32>
      %c58 = arith.constant 58 : index
      %170 = memref.load %arg0[%c58] : memref<75xf32, #tpu.memory_space<smem>>
      %171 = vector.broadcast %170 : f32 to vector<54x108xf32>
      %172 = arith.mulf %171, %161 : vector<54x108xf32>
      %173 = arith.addf %157, %172 : vector<54x108xf32>
      %c1_i32_65 = arith.constant 1 : i32
      %174 = arith.addi %26, %c1_i32_65 : i32
      %c4_66 = arith.constant 4 : index
      %175 = arith.index_cast %174 : i32 to index
      %c0_67 = arith.constant 0 : index
      %176 = vector.load %arg3[%c4_66, %175, %c0_67] : memref<5x112x108xf32, #tpu.memory_space<vmem>>, vector<1x54x108xf32>
      %177 = vector.shape_cast %176 : vector<1x54x108xf32> to vector<54x108xf32>
      %c9 = arith.constant 9 : index
      %178 = memref.load %arg0[%c9] : memref<75xf32, #tpu.memory_space<smem>>
      %179 = vector.broadcast %178 : f32 to vector<54x108xf32>
      %180 = arith.mulf %179, %177 : vector<54x108xf32>
      %181 = arith.addf %165, %180 : vector<54x108xf32>
      %c34 = arith.constant 34 : index
      %182 = memref.load %arg0[%c34] : memref<75xf32, #tpu.memory_space<smem>>
      %183 = vector.broadcast %182 : f32 to vector<54x108xf32>
      %184 = arith.mulf %183, %177 : vector<54x108xf32>
      %185 = arith.addf %169, %184 : vector<54x108xf32>
      %c59 = arith.constant 59 : index
      %186 = memref.load %arg0[%c59] : memref<75xf32, #tpu.memory_space<smem>>
      %187 = vector.broadcast %186 : f32 to vector<54x108xf32>
      %188 = arith.mulf %187, %177 : vector<54x108xf32>
      %189 = arith.addf %173, %188 : vector<54x108xf32>
      %c2_i32_68 = arith.constant 2 : i32
      %190 = arith.addi %26, %c2_i32_68 : i32
      %c0_69 = arith.constant 0 : index
      %191 = arith.index_cast %190 : i32 to index
      %c0_70 = arith.constant 0 : index
      %192 = vector.load %arg3[%c0_69, %191, %c0_70] : memref<5x112x108xf32, #tpu.memory_space<vmem>>, vector<1x54x108xf32>
      %193 = vector.shape_cast %192 : vector<1x54x108xf32> to vector<54x108xf32>
      %c10 = arith.constant 10 : index
      %194 = memref.load %arg0[%c10] : memref<75xf32, #tpu.memory_space<smem>>
      %195 = vector.broadcast %194 : f32 to vector<54x108xf32>
      %196 = arith.mulf %195, %193 : vector<54x108xf32>
      %197 = arith.addf %181, %196 : vector<54x108xf32>
      %c35 = arith.constant 35 : index
      %198 = memref.load %arg0[%c35] : memref<75xf32, #tpu.memory_space<smem>>
      %199 = vector.broadcast %198 : f32 to vector<54x108xf32>
      %200 = arith.mulf %199, %193 : vector<54x108xf32>
      %201 = arith.addf %185, %200 : vector<54x108xf32>
      %c60 = arith.constant 60 : index
      %202 = memref.load %arg0[%c60] : memref<75xf32, #tpu.memory_space<smem>>
      %203 = vector.broadcast %202 : f32 to vector<54x108xf32>
      %204 = arith.mulf %203, %193 : vector<54x108xf32>
      %205 = arith.addf %189, %204 : vector<54x108xf32>
      %c2_i32_71 = arith.constant 2 : i32
      %206 = arith.addi %26, %c2_i32_71 : i32
      %c1_72 = arith.constant 1 : index
      %207 = arith.index_cast %206 : i32 to index
      %c0_73 = arith.constant 0 : index
      %208 = vector.load %arg3[%c1_72, %207, %c0_73] : memref<5x112x108xf32, #tpu.memory_space<vmem>>, vector<1x54x108xf32>
      %209 = vector.shape_cast %208 : vector<1x54x108xf32> to vector<54x108xf32>
      %c11 = arith.constant 11 : index
      %210 = memref.load %arg0[%c11] : memref<75xf32, #tpu.memory_space<smem>>
      %211 = vector.broadcast %210 : f32 to vector<54x108xf32>
      %212 = arith.mulf %211, %209 : vector<54x108xf32>
      %213 = arith.addf %197, %212 : vector<54x108xf32>
      %c36 = arith.constant 36 : index
      %214 = memref.load %arg0[%c36] : memref<75xf32, #tpu.memory_space<smem>>
      %215 = vector.broadcast %214 : f32 to vector<54x108xf32>
      %216 = arith.mulf %215, %209 : vector<54x108xf32>
      %217 = arith.addf %201, %216 : vector<54x108xf32>
      %c61 = arith.constant 61 : index
      %218 = memref.load %arg0[%c61] : memref<75xf32, #tpu.memory_space<smem>>
      %219 = vector.broadcast %218 : f32 to vector<54x108xf32>
      %220 = arith.mulf %219, %209 : vector<54x108xf32>
      %221 = arith.addf %205, %220 : vector<54x108xf32>
      %c2_i32_74 = arith.constant 2 : i32
      %222 = arith.addi %26, %c2_i32_74 : i32
      %c2_75 = arith.constant 2 : index
      %223 = arith.index_cast %222 : i32 to index
      %c0_76 = arith.constant 0 : index
      %224 = vector.load %arg3[%c2_75, %223, %c0_76] : memref<5x112x108xf32, #tpu.memory_space<vmem>>, vector<1x54x108xf32>
      %225 = vector.shape_cast %224 : vector<1x54x108xf32> to vector<54x108xf32>
      %c12 = arith.constant 12 : index
      %226 = memref.load %arg0[%c12] : memref<75xf32, #tpu.memory_space<smem>>
      %227 = vector.broadcast %226 : f32 to vector<54x108xf32>
      %228 = arith.mulf %227, %225 : vector<54x108xf32>
      %229 = arith.addf %213, %228 : vector<54x108xf32>
      %c37 = arith.constant 37 : index
      %230 = memref.load %arg0[%c37] : memref<75xf32, #tpu.memory_space<smem>>
      %231 = vector.broadcast %230 : f32 to vector<54x108xf32>
      %232 = arith.mulf %231, %225 : vector<54x108xf32>
      %233 = arith.addf %217, %232 : vector<54x108xf32>
      %c62 = arith.constant 62 : index
      %234 = memref.load %arg0[%c62] : memref<75xf32, #tpu.memory_space<smem>>
      %235 = vector.broadcast %234 : f32 to vector<54x108xf32>
      %236 = arith.mulf %235, %225 : vector<54x108xf32>
      %237 = arith.addf %221, %236 : vector<54x108xf32>
      %c2_i32_77 = arith.constant 2 : i32
      %238 = arith.addi %26, %c2_i32_77 : i32
      %c3_78 = arith.constant 3 : index
      %239 = arith.index_cast %238 : i32 to index
      %c0_79 = arith.constant 0 : index
      %240 = vector.load %arg3[%c3_78, %239, %c0_79] : memref<5x112x108xf32, #tpu.memory_space<vmem>>, vector<1x54x108xf32>
      %241 = vector.shape_cast %240 : vector<1x54x108xf32> to vector<54x108xf32>
      %c13 = arith.constant 13 : index
      %242 = memref.load %arg0[%c13] : memref<75xf32, #tpu.memory_space<smem>>
      %243 = vector.broadcast %242 : f32 to vector<54x108xf32>
      %244 = arith.mulf %243, %241 : vector<54x108xf32>
      %245 = arith.addf %229, %244 : vector<54x108xf32>
      %c38 = arith.constant 38 : index
      %246 = memref.load %arg0[%c38] : memref<75xf32, #tpu.memory_space<smem>>
      %247 = vector.broadcast %246 : f32 to vector<54x108xf32>
      %248 = arith.mulf %247, %241 : vector<54x108xf32>
      %249 = arith.addf %233, %248 : vector<54x108xf32>
      %c63 = arith.constant 63 : index
      %250 = memref.load %arg0[%c63] : memref<75xf32, #tpu.memory_space<smem>>
      %251 = vector.broadcast %250 : f32 to vector<54x108xf32>
      %252 = arith.mulf %251, %241 : vector<54x108xf32>
      %253 = arith.addf %237, %252 : vector<54x108xf32>
      %c2_i32_80 = arith.constant 2 : i32
      %254 = arith.addi %26, %c2_i32_80 : i32
      %c4_81 = arith.constant 4 : index
      %255 = arith.index_cast %254 : i32 to index
      %c0_82 = arith.constant 0 : index
      %256 = vector.load %arg3[%c4_81, %255, %c0_82] : memref<5x112x108xf32, #tpu.memory_space<vmem>>, vector<1x54x108xf32>
      %257 = vector.shape_cast %256 : vector<1x54x108xf32> to vector<54x108xf32>
      %c14 = arith.constant 14 : index
      %258 = memref.load %arg0[%c14] : memref<75xf32, #tpu.memory_space<smem>>
      %259 = vector.broadcast %258 : f32 to vector<54x108xf32>
      %260 = arith.mulf %259, %257 : vector<54x108xf32>
      %261 = arith.addf %245, %260 : vector<54x108xf32>
      %c39 = arith.constant 39 : index
      %262 = memref.load %arg0[%c39] : memref<75xf32, #tpu.memory_space<smem>>
      %263 = vector.broadcast %262 : f32 to vector<54x108xf32>
      %264 = arith.mulf %263, %257 : vector<54x108xf32>
      %265 = arith.addf %249, %264 : vector<54x108xf32>
      %c64 = arith.constant 64 : index
      %266 = memref.load %arg0[%c64] : memref<75xf32, #tpu.memory_space<smem>>
      %267 = vector.broadcast %266 : f32 to vector<54x108xf32>
      %268 = arith.mulf %267, %257 : vector<54x108xf32>
      %269 = arith.addf %253, %268 : vector<54x108xf32>
      %c3_i32 = arith.constant 3 : i32
      %270 = arith.addi %26, %c3_i32 : i32
      %c0_83 = arith.constant 0 : index
      %271 = arith.index_cast %270 : i32 to index
      %c0_84 = arith.constant 0 : index
      %272 = vector.load %arg3[%c0_83, %271, %c0_84] : memref<5x112x108xf32, #tpu.memory_space<vmem>>, vector<1x54x108xf32>
      %273 = vector.shape_cast %272 : vector<1x54x108xf32> to vector<54x108xf32>
      %c15 = arith.constant 15 : index
      %274 = memref.load %arg0[%c15] : memref<75xf32, #tpu.memory_space<smem>>
      %275 = vector.broadcast %274 : f32 to vector<54x108xf32>
      %276 = arith.mulf %275, %273 : vector<54x108xf32>
      %277 = arith.addf %261, %276 : vector<54x108xf32>
      %c40 = arith.constant 40 : index
      %278 = memref.load %arg0[%c40] : memref<75xf32, #tpu.memory_space<smem>>
      %279 = vector.broadcast %278 : f32 to vector<54x108xf32>
      %280 = arith.mulf %279, %273 : vector<54x108xf32>
      %281 = arith.addf %265, %280 : vector<54x108xf32>
      %c65 = arith.constant 65 : index
      %282 = memref.load %arg0[%c65] : memref<75xf32, #tpu.memory_space<smem>>
      %283 = vector.broadcast %282 : f32 to vector<54x108xf32>
      %284 = arith.mulf %283, %273 : vector<54x108xf32>
      %285 = arith.addf %269, %284 : vector<54x108xf32>
      %c3_i32_85 = arith.constant 3 : i32
      %286 = arith.addi %26, %c3_i32_85 : i32
      %c1_86 = arith.constant 1 : index
      %287 = arith.index_cast %286 : i32 to index
      %c0_87 = arith.constant 0 : index
      %288 = vector.load %arg3[%c1_86, %287, %c0_87] : memref<5x112x108xf32, #tpu.memory_space<vmem>>, vector<1x54x108xf32>
      %289 = vector.shape_cast %288 : vector<1x54x108xf32> to vector<54x108xf32>
      %c16 = arith.constant 16 : index
      %290 = memref.load %arg0[%c16] : memref<75xf32, #tpu.memory_space<smem>>
      %291 = vector.broadcast %290 : f32 to vector<54x108xf32>
      %292 = arith.mulf %291, %289 : vector<54x108xf32>
      %293 = arith.addf %277, %292 : vector<54x108xf32>
      %c41 = arith.constant 41 : index
      %294 = memref.load %arg0[%c41] : memref<75xf32, #tpu.memory_space<smem>>
      %295 = vector.broadcast %294 : f32 to vector<54x108xf32>
      %296 = arith.mulf %295, %289 : vector<54x108xf32>
      %297 = arith.addf %281, %296 : vector<54x108xf32>
      %c66 = arith.constant 66 : index
      %298 = memref.load %arg0[%c66] : memref<75xf32, #tpu.memory_space<smem>>
      %299 = vector.broadcast %298 : f32 to vector<54x108xf32>
      %300 = arith.mulf %299, %289 : vector<54x108xf32>
      %301 = arith.addf %285, %300 : vector<54x108xf32>
      %c3_i32_88 = arith.constant 3 : i32
      %302 = arith.addi %26, %c3_i32_88 : i32
      %c2_89 = arith.constant 2 : index
      %303 = arith.index_cast %302 : i32 to index
      %c0_90 = arith.constant 0 : index
      %304 = vector.load %arg3[%c2_89, %303, %c0_90] : memref<5x112x108xf32, #tpu.memory_space<vmem>>, vector<1x54x108xf32>
      %305 = vector.shape_cast %304 : vector<1x54x108xf32> to vector<54x108xf32>
      %c17 = arith.constant 17 : index
      %306 = memref.load %arg0[%c17] : memref<75xf32, #tpu.memory_space<smem>>
      %307 = vector.broadcast %306 : f32 to vector<54x108xf32>
      %308 = arith.mulf %307, %305 : vector<54x108xf32>
      %309 = arith.addf %293, %308 : vector<54x108xf32>
      %c42 = arith.constant 42 : index
      %310 = memref.load %arg0[%c42] : memref<75xf32, #tpu.memory_space<smem>>
      %311 = vector.broadcast %310 : f32 to vector<54x108xf32>
      %312 = arith.mulf %311, %305 : vector<54x108xf32>
      %313 = arith.addf %297, %312 : vector<54x108xf32>
      %c67 = arith.constant 67 : index
      %314 = memref.load %arg0[%c67] : memref<75xf32, #tpu.memory_space<smem>>
      %315 = vector.broadcast %314 : f32 to vector<54x108xf32>
      %316 = arith.mulf %315, %305 : vector<54x108xf32>
      %317 = arith.addf %301, %316 : vector<54x108xf32>
      %c3_i32_91 = arith.constant 3 : i32
      %318 = arith.addi %26, %c3_i32_91 : i32
      %c3_92 = arith.constant 3 : index
      %319 = arith.index_cast %318 : i32 to index
      %c0_93 = arith.constant 0 : index
      %320 = vector.load %arg3[%c3_92, %319, %c0_93] : memref<5x112x108xf32, #tpu.memory_space<vmem>>, vector<1x54x108xf32>
      %321 = vector.shape_cast %320 : vector<1x54x108xf32> to vector<54x108xf32>
      %c18 = arith.constant 18 : index
      %322 = memref.load %arg0[%c18] : memref<75xf32, #tpu.memory_space<smem>>
      %323 = vector.broadcast %322 : f32 to vector<54x108xf32>
      %324 = arith.mulf %323, %321 : vector<54x108xf32>
      %325 = arith.addf %309, %324 : vector<54x108xf32>
      %c43 = arith.constant 43 : index
      %326 = memref.load %arg0[%c43] : memref<75xf32, #tpu.memory_space<smem>>
      %327 = vector.broadcast %326 : f32 to vector<54x108xf32>
      %328 = arith.mulf %327, %321 : vector<54x108xf32>
      %329 = arith.addf %313, %328 : vector<54x108xf32>
      %c68 = arith.constant 68 : index
      %330 = memref.load %arg0[%c68] : memref<75xf32, #tpu.memory_space<smem>>
      %331 = vector.broadcast %330 : f32 to vector<54x108xf32>
      %332 = arith.mulf %331, %321 : vector<54x108xf32>
      %333 = arith.addf %317, %332 : vector<54x108xf32>
      %c3_i32_94 = arith.constant 3 : i32
      %334 = arith.addi %26, %c3_i32_94 : i32
      %c4_95 = arith.constant 4 : index
      %335 = arith.index_cast %334 : i32 to index
      %c0_96 = arith.constant 0 : index
      %336 = vector.load %arg3[%c4_95, %335, %c0_96] : memref<5x112x108xf32, #tpu.memory_space<vmem>>, vector<1x54x108xf32>
      %337 = vector.shape_cast %336 : vector<1x54x108xf32> to vector<54x108xf32>
      %c19 = arith.constant 19 : index
      %338 = memref.load %arg0[%c19] : memref<75xf32, #tpu.memory_space<smem>>
      %339 = vector.broadcast %338 : f32 to vector<54x108xf32>
      %340 = arith.mulf %339, %337 : vector<54x108xf32>
      %341 = arith.addf %325, %340 : vector<54x108xf32>
      %c44 = arith.constant 44 : index
      %342 = memref.load %arg0[%c44] : memref<75xf32, #tpu.memory_space<smem>>
      %343 = vector.broadcast %342 : f32 to vector<54x108xf32>
      %344 = arith.mulf %343, %337 : vector<54x108xf32>
      %345 = arith.addf %329, %344 : vector<54x108xf32>
      %c69 = arith.constant 69 : index
      %346 = memref.load %arg0[%c69] : memref<75xf32, #tpu.memory_space<smem>>
      %347 = vector.broadcast %346 : f32 to vector<54x108xf32>
      %348 = arith.mulf %347, %337 : vector<54x108xf32>
      %349 = arith.addf %333, %348 : vector<54x108xf32>
      %c4_i32 = arith.constant 4 : i32
      %350 = arith.addi %26, %c4_i32 : i32
      %c0_97 = arith.constant 0 : index
      %351 = arith.index_cast %350 : i32 to index
      %c0_98 = arith.constant 0 : index
      %352 = vector.load %arg3[%c0_97, %351, %c0_98] : memref<5x112x108xf32, #tpu.memory_space<vmem>>, vector<1x54x108xf32>
      %353 = vector.shape_cast %352 : vector<1x54x108xf32> to vector<54x108xf32>
      %c20 = arith.constant 20 : index
      %354 = memref.load %arg0[%c20] : memref<75xf32, #tpu.memory_space<smem>>
      %355 = vector.broadcast %354 : f32 to vector<54x108xf32>
      %356 = arith.mulf %355, %353 : vector<54x108xf32>
      %357 = arith.addf %341, %356 : vector<54x108xf32>
      %c45 = arith.constant 45 : index
      %358 = memref.load %arg0[%c45] : memref<75xf32, #tpu.memory_space<smem>>
      %359 = vector.broadcast %358 : f32 to vector<54x108xf32>
      %360 = arith.mulf %359, %353 : vector<54x108xf32>
      %361 = arith.addf %345, %360 : vector<54x108xf32>
      %c70 = arith.constant 70 : index
      %362 = memref.load %arg0[%c70] : memref<75xf32, #tpu.memory_space<smem>>
      %363 = vector.broadcast %362 : f32 to vector<54x108xf32>
      %364 = arith.mulf %363, %353 : vector<54x108xf32>
      %365 = arith.addf %349, %364 : vector<54x108xf32>
      %c4_i32_99 = arith.constant 4 : i32
      %366 = arith.addi %26, %c4_i32_99 : i32
      %c1_100 = arith.constant 1 : index
      %367 = arith.index_cast %366 : i32 to index
      %c0_101 = arith.constant 0 : index
      %368 = vector.load %arg3[%c1_100, %367, %c0_101] : memref<5x112x108xf32, #tpu.memory_space<vmem>>, vector<1x54x108xf32>
      %369 = vector.shape_cast %368 : vector<1x54x108xf32> to vector<54x108xf32>
      %c21 = arith.constant 21 : index
      %370 = memref.load %arg0[%c21] : memref<75xf32, #tpu.memory_space<smem>>
      %371 = vector.broadcast %370 : f32 to vector<54x108xf32>
      %372 = arith.mulf %371, %369 : vector<54x108xf32>
      %373 = arith.addf %357, %372 : vector<54x108xf32>
      %c46 = arith.constant 46 : index
      %374 = memref.load %arg0[%c46] : memref<75xf32, #tpu.memory_space<smem>>
      %375 = vector.broadcast %374 : f32 to vector<54x108xf32>
      %376 = arith.mulf %375, %369 : vector<54x108xf32>
      %377 = arith.addf %361, %376 : vector<54x108xf32>
      %c71 = arith.constant 71 : index
      %378 = memref.load %arg0[%c71] : memref<75xf32, #tpu.memory_space<smem>>
      %379 = vector.broadcast %378 : f32 to vector<54x108xf32>
      %380 = arith.mulf %379, %369 : vector<54x108xf32>
      %381 = arith.addf %365, %380 : vector<54x108xf32>
      %c4_i32_102 = arith.constant 4 : i32
      %382 = arith.addi %26, %c4_i32_102 : i32
      %c2_103 = arith.constant 2 : index
      %383 = arith.index_cast %382 : i32 to index
      %c0_104 = arith.constant 0 : index
      %384 = vector.load %arg3[%c2_103, %383, %c0_104] : memref<5x112x108xf32, #tpu.memory_space<vmem>>, vector<1x54x108xf32>
      %385 = vector.shape_cast %384 : vector<1x54x108xf32> to vector<54x108xf32>
      %c22 = arith.constant 22 : index
      %386 = memref.load %arg0[%c22] : memref<75xf32, #tpu.memory_space<smem>>
      %387 = vector.broadcast %386 : f32 to vector<54x108xf32>
      %388 = arith.mulf %387, %385 : vector<54x108xf32>
      %389 = arith.addf %373, %388 : vector<54x108xf32>
      %c47 = arith.constant 47 : index
      %390 = memref.load %arg0[%c47] : memref<75xf32, #tpu.memory_space<smem>>
      %391 = vector.broadcast %390 : f32 to vector<54x108xf32>
      %392 = arith.mulf %391, %385 : vector<54x108xf32>
      %393 = arith.addf %377, %392 : vector<54x108xf32>
      %c72 = arith.constant 72 : index
      %394 = memref.load %arg0[%c72] : memref<75xf32, #tpu.memory_space<smem>>
      %395 = vector.broadcast %394 : f32 to vector<54x108xf32>
      %396 = arith.mulf %395, %385 : vector<54x108xf32>
      %397 = arith.addf %381, %396 : vector<54x108xf32>
      %c4_i32_105 = arith.constant 4 : i32
      %398 = arith.addi %26, %c4_i32_105 : i32
      %c3_106 = arith.constant 3 : index
      %399 = arith.index_cast %398 : i32 to index
      %c0_107 = arith.constant 0 : index
      %400 = vector.load %arg3[%c3_106, %399, %c0_107] : memref<5x112x108xf32, #tpu.memory_space<vmem>>, vector<1x54x108xf32>
      %401 = vector.shape_cast %400 : vector<1x54x108xf32> to vector<54x108xf32>
      %c23 = arith.constant 23 : index
      %402 = memref.load %arg0[%c23] : memref<75xf32, #tpu.memory_space<smem>>
      %403 = vector.broadcast %402 : f32 to vector<54x108xf32>
      %404 = arith.mulf %403, %401 : vector<54x108xf32>
      %405 = arith.addf %389, %404 : vector<54x108xf32>
      %c48 = arith.constant 48 : index
      %406 = memref.load %arg0[%c48] : memref<75xf32, #tpu.memory_space<smem>>
      %407 = vector.broadcast %406 : f32 to vector<54x108xf32>
      %408 = arith.mulf %407, %401 : vector<54x108xf32>
      %409 = arith.addf %393, %408 : vector<54x108xf32>
      %c73 = arith.constant 73 : index
      %410 = memref.load %arg0[%c73] : memref<75xf32, #tpu.memory_space<smem>>
      %411 = vector.broadcast %410 : f32 to vector<54x108xf32>
      %412 = arith.mulf %411, %401 : vector<54x108xf32>
      %413 = arith.addf %397, %412 : vector<54x108xf32>
      %c4_i32_108 = arith.constant 4 : i32
      %414 = arith.addi %26, %c4_i32_108 : i32
      %c4_109 = arith.constant 4 : index
      %415 = arith.index_cast %414 : i32 to index
      %c0_110 = arith.constant 0 : index
      %416 = vector.load %arg3[%c4_109, %415, %c0_110] : memref<5x112x108xf32, #tpu.memory_space<vmem>>, vector<1x54x108xf32>
      %417 = vector.shape_cast %416 : vector<1x54x108xf32> to vector<54x108xf32>
      %c24 = arith.constant 24 : index
      %418 = memref.load %arg0[%c24] : memref<75xf32, #tpu.memory_space<smem>>
      %419 = vector.broadcast %418 : f32 to vector<54x108xf32>
      %420 = arith.mulf %419, %417 : vector<54x108xf32>
      %421 = arith.addf %405, %420 : vector<54x108xf32>
      %c49 = arith.constant 49 : index
      %422 = memref.load %arg0[%c49] : memref<75xf32, #tpu.memory_space<smem>>
      %423 = vector.broadcast %422 : f32 to vector<54x108xf32>
      %424 = arith.mulf %423, %417 : vector<54x108xf32>
      %425 = arith.addf %409, %424 : vector<54x108xf32>
      %c74 = arith.constant 74 : index
      %426 = memref.load %arg0[%c74] : memref<75xf32, #tpu.memory_space<smem>>
      %427 = vector.broadcast %426 : f32 to vector<54x108xf32>
      %428 = arith.mulf %427, %417 : vector<54x108xf32>
      %429 = arith.addf %413, %428 : vector<54x108xf32>
      %c0_111 = arith.constant 0 : index
      %c0_112 = arith.constant 0 : index
      %430 = arith.index_cast %26 : i32 to index
      %c0_113 = arith.constant 0 : index
      %431 = vector.load %arg2[%c0_111, %c0_112, %430, %c0_113] : memref<1x3x108x108xf32, #tpu.memory_space<vmem>>, vector<1x1x54x108xf32>
      %432 = vector.shape_cast %431 : vector<1x1x54x108xf32> to vector<54x108xf32>
      %433 = vector.shape_cast %421 : vector<54x108xf32> to vector<1x1x54x108xf32>
      tpu.vector_store %arg2[%c0_111, %c0_112, %430, %c0_113], %433 {strides = array<i32>} : memref<1x3x108x108xf32, #tpu.memory_space<vmem>>, vector<1x1x54x108xf32>,
      %c0_114 = arith.constant 0 : index
      %c1_115 = arith.constant 1 : index
      %434 = arith.index_cast %26 : i32 to index
      %c0_116 = arith.constant 0 : index
      %435 = vector.load %arg2[%c0_114, %c1_115, %434, %c0_116] : memref<1x3x108x108xf32, #tpu.memory_space<vmem>>, vector<1x1x54x108xf32>
      %436 = vector.shape_cast %435 : vector<1x1x54x108xf32> to vector<54x108xf32>
      %437 = vector.shape_cast %425 : vector<54x108xf32> to vector<1x1x54x108xf32>
      tpu.vector_store %arg2[%c0_114, %c1_115, %434, %c0_116], %437 {strides = array<i32>} : memref<1x3x108x108xf32, #tpu.memory_space<vmem>>, vector<1x1x54x108xf32>,
      %c0_117 = arith.constant 0 : index
      %c2_118 = arith.constant 2 : index
      %438 = arith.index_cast %26 : i32 to index
      %c0_119 = arith.constant 0 : index
      %439 = vector.load %arg2[%c0_117, %c2_118, %438, %c0_119] : memref<1x3x108x108xf32, #tpu.memory_space<vmem>>, vector<1x1x54x108xf32>
      %440 = vector.shape_cast %439 : vector<1x1x54x108xf32> to vector<54x108xf32>
      %441 = vector.shape_cast %429 : vector<54x108xf32> to vector<1x1x54x108xf32>
      tpu.vector_store %arg2[%c0_117, %c2_118, %438, %c0_119], %441 {strides = array<i32>} : memref<1x3x108x108xf32, #tpu.memory_space<vmem>>, vector<1x1x54x108xf32>,
    }
    %c2_i32_30 = arith.constant 2 : i32
    return
  }
}

</mosaic_0001>

<bundles_post_ra>
// kernel: conv_sub.1
= control target key start
LH: loop header
LB: loop body
LE: loop exit
PB: predicated region body
PF: predicated region fallthrough
CT: control target
= control target key end

     0   :  { %7 = vsyncpa [#allocation5], 0  ;;  %s2933_s0 = inlined_call_operand.vmem [shape: f32[75], index: 0, kind: input, shape index: {}]   ;;  %s2934_s1 = inlined_call_operand.hbm [shape: f32[1,1,112,112], index: 1, kind: input, shape index: {}]   ;;  %s2935_s2 = inlined_call_operand.vmem [shape: f32[1,3,108,108], index: 2, kind: output, shape index: {}]  }
   0x1   :  { %s15_s11 = sshll.u32 %s2933_s0, 4  ;;  %s16_s11 = int_to_ptr.vmem [resolvable:$true] %s15_s11 }
   0x2   :  { %8 = vsyncpa [#allocation4], 0  ;;  %s2228_s12 = scalar_lea.vmem %s16_s11, 16  ;;  %p2233_p1 = scmp.lt.s32.totalorder %s16_s11, %s16_s11 }
   0x3   :  { %p2229_p0 = scmp.ne.s32.totalorder %s16_s11, %s2228_s12  ;;  %p2234_p2 = scmp.lt.s32.totalorder %s2228_s12, %s2228_s12 }
   0x5   :  { %p2235_p3 = por %p2234_p2, %p2233_p1 }
   0x7   :  { %p2236_p4 = pnand %p2235_p3, %p2229_p0 }
   0x9   :  { %2239 = shalt.err (!%p2236_p4)
}
   0xa   :  { %s2274_s13 = smov [#allocation3]   ;;  %s2275_s14 = smov [#allocation6]  }
   0xb   :  { %18 = dma.vmem_to_smem %s16_s11, 16, %s2274_s13, [#allocation5]  }
   0xc   :  { %s24_s15 = sshll.u32 %s2275_s14, 4  ;;  %s2240_s18 = scalar_lea.hbm %s2934_s1, 1792  ;;  %s25_s15 = int_to_ptr.vmem [resolvable:$true] %s24_s15 }
   0xd   :  { %p2241_p5 = scmp.ne.s32.totalorder %s2934_s1, %s2240_s18  ;;  %p2244_p6 = scmp.lt.u32.totalorder %s2240_s18, %s2934_s1 }
   0xf   :  { %p2246_p7 = pnand %p2244_p6, %p2241_p5 }
  0x11   :  { %2249 = shalt.err (!%p2246_p7)
}
  0x12   :  { %s2250_s22 = scalar_lea.vmem %s25_s15, 1792  ;;  %p2255_p9 = scmp.lt.s32.totalorder %s25_s15, %s25_s15 }
  0x13   :  { %p2251_p8 = scmp.ne.s32.totalorder %s25_s15, %s2250_s22  ;;  %p2256_p10 = scmp.lt.s32.totalorder %s2250_s22, %s2250_s22 }
  0x15   :  { %p2257_p11 = por %p2256_p10, %p2255_p9 }
  0x17   :  { %p2258_p12 = pnand %p2257_p11, %p2251_p8 }
  0x19   :  { %2261 = shalt.err (!%p2258_p12)
}
  0x1a   :  { %s2276_s23 = smov 128   ;;  %s2277_s24 = smov 8  }
  0x1b   :  { %30 = dma.hbm_to_vmem [thread:$0]  %s2934_s1, 1792, %s25_s15, [#allocation4], %s2276_s23, %s2276_s23, %s2277_s24  }
  0x1c   :  { %2266 = dma.done.wait [#allocation5], 16  }
  0x1d   :  { %2267 = vsyncadd [#allocation5], 4294967280 }
  0x1e   :  { %2268 = dma.done.wait [#allocation4], 1792  }
  0x1f   :  { %2269 = vsyncadd [#allocation4], 4294965504 }
  0x20   :  { %37 = sfence }
  0x21   :  { %v2312_v0 = vld [vmem:[#allocation6 + $0x10] sm:$0xff]  ;;  %v2314_v1 = vld [vmem:[#allocation6] sm:$0xff]  ;;  %v2316_v2 = vld [vmem:[#allocation6 + $0x18] sm:$0xff]  ;;  %vm52_vm0 = vcmask 883712   ;;  %s2278_s27 = smov 127   ;;  %s2279_s1 = smov 126  }
  0x22   :  { %99 = vrot.lane.b32.xlu1 %v2312_v0, %s2278_s27  ;;  %95 = vrot.lane.b32.xlu0 %v2314_v1, %s2278_s27  ;;  %v2322_v3 = vld [vmem:[#allocation6 + $0x8] sm:$0xff]  ;;  %v2326_v5 = vld [vmem:[#allocation6 + $0x20] sm:$0xff]  ;;  %53 = vst.msk [vmem:[#allocation2] sm:$0xff] %vm52_vm0, %v2314_v1  ;;  %55 = vst.msk [vmem:[#allocation2 + $0x10] sm:$0xff] %vm52_vm0, %v2312_v0  ;;  %s2280_s28 = smov 125   ;;  %s2281_s29 = smov 124  }
  0x23   :  { %v2324_v4 = vld [vmem:[#allocation6 + $0x28] sm:$0xff]  ;;  %56 = vst.msk [vmem:[#allocation2 + $0x18] sm:$0xff] %vm52_vm0, %v2316_v2  ;;  %v2334_v6 = vld [vmem:[#allocation6 + $0x38] sm:$0xff]  ;;  %v2336_v7 = vld [vmem:[#allocation6 + $0x30] sm:$0xff]  ;;  %s2480_s30 = smov 0  }
  0x24   :  { %v2338_v8 = vld [vmem:[#allocation6 + $0x48] sm:$0xff]  ;;  %54 = vst.msk [vmem:[#allocation2 + $0x8] sm:$0xff] %vm52_vm0, %v2322_v3  ;;  %57 = vst.msk [vmem:[#allocation2 + $0x20] sm:$0xff] %vm52_vm0, %v2326_v5  ;;  %v2346_v9 = vld [vmem:[#allocation6 + $0x40] sm:$0xff] }
  0x25   :  { %58 = vst.msk [vmem:[#allocation2 + $0x28] sm:$0xff] %vm52_vm0, %v2324_v4  ;;  %v2348_v10 = vld [vmem:[#allocation6 + $0x58] sm:$0xff]  ;;  %v2350_v11 = vld [vmem:[#allocation6 + $0x50] sm:$0xff]  ;;  %59 = vst.msk [vmem:[#allocation2 + $0x30] sm:$0xff] %vm52_vm0, %v2336_v7 }
  0x26   :  { %60 = vst.msk [vmem:[#allocation2 + $0x38] sm:$0xff] %vm52_vm0, %v2334_v6  ;;  %62 = vst.msk [vmem:[#allocation2 + $0x48] sm:$0xff] %vm52_vm0, %v2338_v8  ;;  %v80_v12 = vld [vmem:[#allocation6 + $0x68] sm:$0xff]  ;;  %v79_v13 = vld [vmem:[#allocation6 + $0x60] sm:$0xff]  ;;  %101 = vrot.lane.b32.xlu1 %v2316_v2, %s2278_s27  ;;  %97 = vrot.lane.b32.xlu0 %v2322_v3, %s2278_s27 }
  0x27   :  { %61 = vst.msk [vmem:[#allocation2 + $0x40] sm:$0xff] %vm52_vm0, %v2346_v9  ;;  %63 = vst.msk [vmem:[#allocation2 + $0x50] sm:$0xff] %vm52_vm0, %v2350_v11 }
  0x28   :  { %64 = vst.msk [vmem:[#allocation2 + $0x58] sm:$0xff] %vm52_vm0, %v2348_v10  ;;  %65 = vst.msk [vmem:[#allocation2 + $0x60] sm:$0xff] %vm52_vm0, %v79_v13 }
  0x29   :  { %66 = vst.msk [vmem:[#allocation2 + $0x68] sm:$0xff] %vm52_vm0, %v80_v12 }
  0x2a   :  { %105 = vrot.lane.b32.xlu1 %v2324_v4, %s2278_s27  ;;  %103 = vrot.lane.b32.xlu0 %v2326_v5, %s2278_s27 }
  0x2e   :  { %109 = vrot.lane.b32.xlu1 %v2334_v6, %s2278_s27  ;;  %107 = vrot.lane.b32.xlu0 %v2336_v7, %s2278_s27 }
  0x32   :  { %113 = vrot.lane.b32.xlu1 %v2338_v8, %s2278_s27  ;;  %111 = vrot.lane.b32.xlu0 %v2346_v9, %s2278_s27 }
  0x36   :  { %117 = vrot.lane.b32.xlu1 %v2348_v10, %s2278_s27  ;;  %115 = vrot.lane.b32.xlu0 %v2350_v11, %s2278_s27 }
  0x3a   :  { %121 = vrot.lane.b32.xlu1 %v80_v12, %s2278_s27  ;;  %119 = vrot.lane.b32.xlu0 %v79_v13, %s2278_s27 }
  0x3e   :  { %182 = vrot.lane.b32.xlu1 %v2322_v3, %s2279_s1  ;;  %180 = vrot.lane.b32.xlu0 %v2314_v1, %s2279_s1 }
  0x42   :  { %186 = vrot.lane.b32.xlu1 %v2316_v2, %s2279_s1  ;;  %184 = vrot.lane.b32.xlu0 %v2312_v0, %s2279_s1 }
  0x46   :  { %190 = vrot.lane.b32.xlu1 %v2324_v4, %s2279_s1  ;;  %188 = vrot.lane.b32.xlu0 %v2326_v5, %s2279_s1 }
  0x4a   :  { %194 = vrot.lane.b32.xlu1 %v2334_v6, %s2279_s1  ;;  %192 = vrot.lane.b32.xlu0 %v2336_v7, %s2279_s1 }
  0x4e   :  { %198 = vrot.lane.b32.xlu1 %v2338_v8, %s2279_s1  ;;  %196 = vrot.lane.b32.xlu0 %v2346_v9, %s2279_s1 }
  0x52   :  { %202 = vrot.lane.b32.xlu1 %v2348_v10, %s2279_s1  ;;  %200 = vrot.lane.b32.xlu0 %v2350_v11, %s2279_s1 }
  0x56   :  { %206 = vrot.lane.b32.xlu1 %v80_v12, %s2279_s1  ;;  %204 = vrot.lane.b32.xlu0 %v79_v13, %s2279_s1 }
  0x5a   :  { %267 = vrot.lane.b32.xlu1 %v2322_v3, %s2280_s28  ;;  %265 = vrot.lane.b32.xlu0 %v2314_v1, %s2280_s28 }
  0x5e   :  { %271 = vrot.lane.b32.xlu1 %v2316_v2, %s2280_s28  ;;  %269 = vrot.lane.b32.xlu0 %v2312_v0, %s2280_s28 }
  0x62   :  { %275 = vrot.lane.b32.xlu1 %v2324_v4, %s2280_s28  ;;  %273 = vrot.lane.b32.xlu0 %v2326_v5, %s2280_s28 }
  0x66   :  { %279 = vrot.lane.b32.xlu1 %v2334_v6, %s2280_s28  ;;  %277 = vrot.lane.b32.xlu0 %v2336_v7, %s2280_s28 }
  0x6a   :  { %283 = vrot.lane.b32.xlu1 %v2338_v8, %s2280_s28  ;;  %281 = vrot.lane.b32.xlu0 %v2346_v9, %s2280_s28 }
  0x6e   :  { %287 = vrot.lane.b32.xlu1 %v2348_v10, %s2280_s28  ;;  %285 = vrot.lane.b32.xlu0 %v2350_v11, %s2280_s28 }
  0x72   :  { %291 = vrot.lane.b32.xlu1 %v80_v12, %s2280_s28  ;;  %289 = vrot.lane.b32.xlu0 %v79_v13, %s2280_s28 }
  0x76   :  { %352 = vrot.lane.b32.xlu1 %v2322_v3, %s2281_s29  ;;  %350 = vrot.lane.b32.xlu0 %v2314_v1, %s2281_s29 }
  0x7a   :  { %356 = vrot.lane.b32.xlu1 %v2316_v2, %s2281_s29  ;;  %354 = vrot.lane.b32.xlu0 %v2312_v0, %s2281_s29 }
  0x7e   :  { %360 = vrot.lane.b32.xlu1 %v2324_v4, %s2281_s29  ;;  %358 = vrot.lane.b32.xlu0 %v2326_v5, %s2281_s29 }
  0x82   :  { %364 = vrot.lane.b32.xlu1 %v2334_v6, %s2281_s29  ;;  %362 = vrot.lane.b32.xlu0 %v2336_v7, %s2281_s29 }
  0x86   :  { %368 = vrot.lane.b32.xlu1 %v2338_v8, %s2281_s29  ;;  %366 = vrot.lane.b32.xlu0 %v2346_v9, %s2281_s29 }
  0x8a   :  { %372 = vrot.lane.b32.xlu1 %v2348_v10, %s2281_s29  ;;  %370 = vrot.lane.b32.xlu0 %v2350_v11, %s2281_s29 }
  0x8e   :  { %376 = vrot.lane.b32.xlu1 %v80_v12, %s2281_s29  ;;  %374 = vrot.lane.b32.xlu0 %v79_v13, %s2281_s29 }
  0x94   :  { %v100_v14 = vpop.permute.xlu1 %99  ;;  %v96_v15 = vpop.permute.xlu0 %95 }
  0x95   :  { %140 = vst.msk [vmem:[#allocation2 + $0x80] sm:$0xff] %vm52_vm0, %v100_v14  ;;  %138 = vst.msk [vmem:[#allocation2 + $0x70] sm:$0xff] %vm52_vm0, %v96_v15 }
  0x98   :  { %v102_v16 = vpop.permute.xlu1 %101  ;;  %v98_v17 = vpop.permute.xlu0 %97 }
  0x99   :  { %141 = vst.msk [vmem:[#allocation2 + $0x88] sm:$0xff] %vm52_vm0, %v102_v16  ;;  %139 = vst.msk [vmem:[#allocation2 + $0x78] sm:$0xff] %vm52_vm0, %v98_v17 }
  0x9c   :  { %v106_v18 = vpop.permute.xlu1 %105  ;;  %v104_v19 = vpop.permute.xlu0 %103 }
  0x9d   :  { %143 = vst.msk [vmem:[#allocation2 + $0x98] sm:$0xff] %vm52_vm0, %v106_v18  ;;  %142 = vst.msk [vmem:[#allocation2 + $0x90] sm:$0xff] %vm52_vm0, %v104_v19 }
  0xa0   :  { %v110_v20 = vpop.permute.xlu1 %109  ;;  %v108_v21 = vpop.permute.xlu0 %107 }
  0xa1   :  { %145 = vst.msk [vmem:[#allocation2 + $0xa8] sm:$0xff] %vm52_vm0, %v110_v20  ;;  %144 = vst.msk [vmem:[#allocation2 + $0xa0] sm:$0xff] %vm52_vm0, %v108_v21 }
  0xa4   :  { %v114_v22 = vpop.permute.xlu1 %113  ;;  %v112_v23 = vpop.permute.xlu0 %111 }
  0xa5   :  { %147 = vst.msk [vmem:[#allocation2 + $0xb8] sm:$0xff] %vm52_vm0, %v114_v22  ;;  %146 = vst.msk [vmem:[#allocation2 + $0xb0] sm:$0xff] %vm52_vm0, %v112_v23 }
  0xa8   :  { %v118_v24 = vpop.permute.xlu1 %117  ;;  %v116_v25 = vpop.permute.xlu0 %115 }
  0xa9   :  { %149 = vst.msk [vmem:[#allocation2 + $0xc8] sm:$0xff] %vm52_vm0, %v118_v24  ;;  %148 = vst.msk [vmem:[#allocation2 + $0xc0] sm:$0xff] %vm52_vm0, %v116_v25 }
  0xac   :  { %v122_v26 = vpop.permute.xlu1 %121  ;;  %v120_v27 = vpop.permute.xlu0 %119 }
  0xad   :  { %151 = vst.msk [vmem:[#allocation2 + $0xd8] sm:$0xff] %vm52_vm0, %v122_v26  ;;  %150 = vst.msk [vmem:[#allocation2 + $0xd0] sm:$0xff] %vm52_vm0, %v120_v27 }
  0xb0   :  { %v183_v28 = vpop.permute.xlu1 %182  ;;  %v181_v29 = vpop.permute.xlu0 %180 }
  0xb1   :  { %224 = vst.msk [vmem:[#allocation2 + $0xe8] sm:$0xff] %vm52_vm0, %v183_v28  ;;  %223 = vst.msk [vmem:[#allocation2 + $0xe0] sm:$0xff] %vm52_vm0, %v181_v29 }
  0xb4   :  { %v187_v30 = vpop.permute.xlu1 %186  ;;  %v185_v31 = vpop.permute.xlu0 %184 }
  0xb5   :  { %226 = vst.msk [vmem:[#allocation2 + $0xf8] sm:$0xff] %vm52_vm0, %v187_v30  ;;  %225 = vst.msk [vmem:[#allocation2 + $0xf0] sm:$0xff] %vm52_vm0, %v185_v31 }
  0xb8   :  { %v191_v32 = vpop.permute.xlu1 %190  ;;  %v189_v33 = vpop.permute.xlu0 %188 }
  0xb9   :  { %228 = vst.msk [vmem:[#allocation2 + $0x108] sm:$0xff] %vm52_vm0, %v191_v32  ;;  %227 = vst.msk [vmem:[#allocation2 + $0x100] sm:$0xff] %vm52_vm0, %v189_v33 }
  0xbc   :  { %v195_v34 = vpop.permute.xlu1 %194  ;;  %v193_v35 = vpop.permute.xlu0 %192 }
  0xbd   :  { %230 = vst.msk [vmem:[#allocation2 + $0x118] sm:$0xff] %vm52_vm0, %v195_v34  ;;  %229 = vst.msk [vmem:[#allocation2 + $0x110] sm:$0xff] %vm52_vm0, %v193_v35 }
  0xc0   :  { %v199_v36 = vpop.permute.xlu1 %198  ;;  %v197_v37 = vpop.permute.xlu0 %196 }
  0xc1   :  { %232 = vst.msk [vmem:[#allocation2 + $0x128] sm:$0xff] %vm52_vm0, %v199_v36  ;;  %231 = vst.msk [vmem:[#allocation2 + $0x120] sm:$0xff] %vm52_vm0, %v197_v37 }
  0xc4   :  { %v203_v38 = vpop.permute.xlu1 %202  ;;  %v201_v39 = vpop.permute.xlu0 %200 }
  0xc5   :  { %234 = vst.msk [vmem:[#allocation2 + $0x138] sm:$0xff] %vm52_vm0, %v203_v38  ;;  %233 = vst.msk [vmem:[#allocation2 + $0x130] sm:$0xff] %vm52_vm0, %v201_v39 }
  0xc8   :  { %v207_v40 = vpop.permute.xlu1 %206  ;;  %v205_v41 = vpop.permute.xlu0 %204 }
  0xc9   :  { %236 = vst.msk [vmem:[#allocation2 + $0x148] sm:$0xff] %vm52_vm0, %v207_v40  ;;  %235 = vst.msk [vmem:[#allocation2 + $0x140] sm:$0xff] %vm52_vm0, %v205_v41 }
  0xcc   :  { %v268_v42 = vpop.permute.xlu1 %267  ;;  %v266_v43 = vpop.permute.xlu0 %265 }
  0xcd   :  { %309 = vst.msk [vmem:[#allocation2 + $0x158] sm:$0xff] %vm52_vm0, %v268_v42  ;;  %308 = vst.msk [vmem:[#allocation2 + $0x150] sm:$0xff] %vm52_vm0, %v266_v43 }
  0xd0   :  { %v272_v44 = vpop.permute.xlu1 %271  ;;  %v270_v45 = vpop.permute.xlu0 %269 }
  0xd1   :  { %311 = vst.msk [vmem:[#allocation2 + $0x168] sm:$0xff] %vm52_vm0, %v272_v44  ;;  %310 = vst.msk [vmem:[#allocation2 + $0x160] sm:$0xff] %vm52_vm0, %v270_v45 }
  0xd4   :  { %v276_v46 = vpop.permute.xlu1 %275  ;;  %v274_v47 = vpop.permute.xlu0 %273 }
  0xd5   :  { %313 = vst.msk [vmem:[#allocation2 + $0x178] sm:$0xff] %vm52_vm0, %v276_v46  ;;  %312 = vst.msk [vmem:[#allocation2 + $0x170] sm:$0xff] %vm52_vm0, %v274_v47 }
  0xd8   :  { %v280_v48 = vpop.permute.xlu1 %279  ;;  %v278_v49 = vpop.permute.xlu0 %277 }
  0xd9   :  { %315 = vst.msk [vmem:[#allocation2 + $0x188] sm:$0xff] %vm52_vm0, %v280_v48  ;;  %314 = vst.msk [vmem:[#allocation2 + $0x180] sm:$0xff] %vm52_vm0, %v278_v49 }
  0xdc   :  { %v284_v50 = vpop.permute.xlu1 %283  ;;  %v282_v51 = vpop.permute.xlu0 %281 }
  0xdd   :  { %317 = vst.msk [vmem:[#allocation2 + $0x198] sm:$0xff] %vm52_vm0, %v284_v50  ;;  %316 = vst.msk [vmem:[#allocation2 + $0x190] sm:$0xff] %vm52_vm0, %v282_v51 }
  0xe0   :  { %v288_v52 = vpop.permute.xlu1 %287  ;;  %v286_v53 = vpop.permute.xlu0 %285 }
  0xe1   :  { %319 = vst.msk [vmem:[#allocation2 + $0x1a8] sm:$0xff] %vm52_vm0, %v288_v52  ;;  %318 = vst.msk [vmem:[#allocation2 + $0x1a0] sm:$0xff] %vm52_vm0, %v286_v53 }
  0xe4   :  { %v292_v54 = vpop.permute.xlu1 %291  ;;  %v290_v55 = vpop.permute.xlu0 %289 }
  0xe5   :  { %321 = vst.msk [vmem:[#allocation2 + $0x1b8] sm:$0xff] %vm52_vm0, %v292_v54  ;;  %320 = vst.msk [vmem:[#allocation2 + $0x1b0] sm:$0xff] %vm52_vm0, %v290_v55 }
  0xe8   :  { %v353_v56 = vpop.permute.xlu1 %352  ;;  %v351_v57 = vpop.permute.xlu0 %350 }
  0xe9   :  { %394 = vst.msk [vmem:[#allocation2 + $0x1c8] sm:$0xff] %vm52_vm0, %v353_v56  ;;  %393 = vst.msk [vmem:[#allocation2 + $0x1c0] sm:$0xff] %vm52_vm0, %v351_v57 }
  0xec   :  { %v357_v58 = vpop.permute.xlu1 %356  ;;  %v355_v59 = vpop.permute.xlu0 %354 }
  0xed   :  { %396 = vst.msk [vmem:[#allocation2 + $0x1d8] sm:$0xff] %vm52_vm0, %v357_v58  ;;  %395 = vst.msk [vmem:[#allocation2 + $0x1d0] sm:$0xff] %vm52_vm0, %v355_v59 }
  0xf0   :  { %v361_v60 = vpop.permute.xlu1 %360  ;;  %v359_v61 = vpop.permute.xlu0 %358 }
  0xf1   :  { %398 = vst.msk [vmem:[#allocation2 + $0x1e8] sm:$0xff] %vm52_vm0, %v361_v60  ;;  %397 = vst.msk [vmem:[#allocation2 + $0x1e0] sm:$0xff] %vm52_vm0, %v359_v61 }
  0xf4   :  { %v365_v62 = vpop.permute.xlu1 %364  ;;  %v363_v63 = vpop.permute.xlu0 %362 }
  0xf5   :  { %400 = vst.msk [vmem:[#allocation2 + $0x1f8] sm:$0xff] %vm52_vm0, %v365_v62  ;;  %399 = vst.msk [vmem:[#allocation2 + $0x1f0] sm:$0xff] %vm52_vm0, %v363_v63 }
  0xf8   :  { %v369_v0 = vpop.permute.xlu1 %368  ;;  %v367_v1 = vpop.permute.xlu0 %366 }
  0xf9   :  { %402 = vst.msk [vmem:[#allocation2 + $0x208] sm:$0xff] %vm52_vm0, %v369_v0  ;;  %401 = vst.msk [vmem:[#allocation2 + $0x200] sm:$0xff] %vm52_vm0, %v367_v1 }
  0xfc   :  { %v373_v2 = vpop.permute.xlu1 %372  ;;  %v371_v3 = vpop.permute.xlu0 %370 }
  0xfd   :  { %404 = vst.msk [vmem:[#allocation2 + $0x218] sm:$0xff] %vm52_vm0, %v373_v2  ;;  %403 = vst.msk [vmem:[#allocation2 + $0x210] sm:$0xff] %vm52_vm0, %v371_v3 }
 0x100   :  { %v377_v4 = vpop.permute.xlu1 %376  ;;  %v375_v5 = vpop.permute.xlu0 %374 }
 0x101   :  { %406 = vst.msk [vmem:[#allocation2 + $0x228] sm:$0xff] %vm52_vm0, %v377_v4  ;;  %405 = vst.msk [vmem:[#allocation2 + $0x220] sm:$0xff] %vm52_vm0, %v375_v5 }
 0x102 LB: > { %s422_s3 = sld [smem:[#allocation3]]  ;;  %s1956_s4 = sld [smem:[#allocation3 + $0x19]]  ;;  %vm1845_vm1 = vcmask 881664   ;;  %s2272_s30 = sphi %s2480_s30, %s412_s30  }
 0x103   : > { %s413_s5 = smul.u32 54, %s2272_s30  ;;  %s2493_s7 = sld [smem:[#allocation3 + $0x32]] }
 0x104   : > { %s2499_s8 = sld [smem:[#allocation3 + $0x1]]  ;;  %s2501_s9 = sld [smem:[#allocation3 + $0x1a]] }
 0x105   : > { %s2488_s6 = scalar_lea.vmem [#allocation2], %s413_s5  ;;  %s2510_s10 = sld [smem:[#allocation3 + $0x33]] }
 0x106   : > { %s2514_s11 = sld [smem:[#allocation3 + $0x2]]  ;;  %s2518_s12 = sld [smem:[#allocation3 + $0x1b]] }
 0x107   : > { %s2527_s13 = sld [smem:[#allocation3 + $0x34]]  ;;  %s2530_s14 = sld [smem:[#allocation3 + $0x3]] }
 0x108   : > { %v415_v6 = vld [vmem:[%s2488_s6] sm:$0xff]  ;;  %v416_v7 = vld [vmem:[%s2488_s6 + $0x8] sm:$0xff]  ;;  %v417_v8 = vld [vmem:[%s2488_s6 + $0x10] sm:$0xff]  ;;  %v423_v12 = vstv %s422_s3  ;;  %s2533_s15 = sld [smem:[#allocation3 + $0x1c]]  ;;  %s2542_s16 = sld [smem:[#allocation3 + $0x35]] }
 0x109   : > { %v418_v9 = vld [vmem:[%s2488_s6 + $0x18] sm:$0xff]  ;;  %v419_v10 = vld [vmem:[%s2488_s6 + $0x20] sm:$0xff]  ;;  %v420_v11 = vld [vmem:[%s2488_s6 + $0x28] sm:$0xff]  ;;  %v424_v14 = vmul.f32 %v423_v12, %v415_v6  ;;  %v425_v15 = vmul.f32 %v423_v12, %v416_v7  ;;  %v426_v16 = vmul.f32 %v423_v12, %v417_v8  ;;  %v439_v21 = vstv %s1956_s4  ;;  %s2547_s17 = sld [smem:[#allocation3 + $0x4]]  ;;  %s2549_s18 = sld [smem:[#allocation3 + $0x1d]] }
 0x10a   : > { %v421_v13 = vld [vmem:[%s2488_s6 + $0x30] sm:$0x3f]  ;;  %v427_v17 = vmul.f32 %v423_v12, %v418_v9  ;;  %v428_v18 = vmul.f32 %v423_v12, %v419_v10  ;;  %v429_v19 = vmul.f32 %v423_v12, %v420_v11  ;;  %v440_v25 = vmul.f32 %v439_v21, %v415_v6  ;;  %v1959_v47 = vld [vmem:[%s2488_s6 + $0x78] sm:$0xff]  ;;  %v1960_v48 = vld [vmem:[%s2488_s6 + $0x80] sm:$0xff]  ;;  %s2556_s19 = sld [smem:[#allocation3 + $0x36]]  ;;  %s2563_s0 = sld [smem:[#allocation3 + $0x5]] }
 0x10b   : > { %v430_v20 = vmul.f32 %v423_v12, %v421_v13  ;;  %v431_v22 = vadd.f32 -0.09766342, %v424_v14  ;;  %v432_v23 = vadd.f32 -0.09766342, %v425_v15  ;;  %v433_v24 = vadd.f32 -0.09766342, %v426_v16 }
 0x10c   : > { %v434_v26 = vadd.f32 -0.09766342, %v427_v17  ;;  %v435_v27 = vadd.f32 -0.09766342, %v428_v18  ;;  %v436_v28 = vadd.f32 -0.09766342, %v429_v19  ;;  %v441_v29 = vmul.f32 %v439_v21, %v416_v7 }
 0x10d   : > { %v437_v30 = vadd.f32 -0.09766342, %v430_v20  ;;  %v442_v31 = vmul.f32 %v439_v21, %v417_v8  ;;  %v443_v32 = vmul.f32 %v439_v21, %v418_v9  ;;  %v444_v33 = vmul.f32 %v439_v21, %v419_v10  ;;  %v1958_v38 = vld [vmem:[%s2488_s6 + $0x70] sm:$0xff]  ;;  %v1961_v53 = vld [vmem:[%s2488_s6 + $0x88] sm:$0xff]  ;;  %v1963_v55 = vld [vmem:[%s2488_s6 + $0x98] sm:$0xff]  ;;  %s2566_s20 = sld [smem:[#allocation3 + $0x1e]] }
 0x10e   : > { %v445_v34 = vmul.f32 %v439_v21, %v420_v11  ;;  %v446_v35 = vmul.f32 %v439_v21, %v421_v13  ;;  %v447_v36 = vadd.f32 -0.09766342, %v440_v25  ;;  %v448_v37 = vadd.f32 -0.09766342, %v441_v29  ;;  %v1962_v54 = vld [vmem:[%s2488_s6 + $0x90] sm:$0xff]  ;;  %s2572_s21 = sld [smem:[#allocation3 + $0x37]] }
 0x10f   : > { %v449_v39 = vadd.f32 -0.09766342, %v442_v31  ;;  %v450_v40 = vadd.f32 -0.09766342, %v443_v32  ;;  %v451_v41 = vadd.f32 -0.09766342, %v444_v33  ;;  %v455_v42 = vstv %s2493_s7 }
 0x110   : > { %v452_v43 = vadd.f32 -0.09766342, %v445_v34  ;;  %v453_v44 = vadd.f32 -0.09766342, %v446_v35  ;;  %v456_v45 = vmul.f32 %v455_v42, %v415_v6  ;;  %v457_v46 = vmul.f32 %v455_v42, %v416_v7  ;;  %v1964_v59 = vld [vmem:[%s2488_s6 + $0xa0] sm:$0x3f] }
 0x111   : > { %v458_v49 = vmul.f32 %v455_v42, %v417_v8  ;;  %v459_v50 = vmul.f32 %v455_v42, %v418_v9  ;;  %v460_v51 = vmul.f32 %v455_v42, %v419_v10  ;;  %v461_v52 = vmul.f32 %v455_v42, %v420_v11  ;;  %s2578_s22 = sld [smem:[#allocation3 + $0x6]]  ;;  %s2582_s23 = sld [smem:[#allocation3 + $0x1f]] }
 0x112   : > { %v462_v56 = vmul.f32 %v455_v42, %v421_v13  ;;  %v463_v57 = vadd.f32 -0.09766342, %v456_v45  ;;  %v464_v58 = vadd.f32 -0.09766342, %v457_v46  ;;  %v480_v60 = vstv %s2499_s8  ;;  %v1968_v45 = vld [vmem:[%s2488_s6 + $0xe0] sm:$0xff]  ;;  %v1969_v46 = vld [vmem:[%s2488_s6 + $0xe8] sm:$0xff] }
 0x113   : > { %v465_v61 = vadd.f32 -0.09766342, %v458_v49  ;;  %v466_v62 = vadd.f32 -0.09766342, %v459_v50  ;;  %v467_v63 = vadd.f32 -0.09766342, %v460_v51  ;;  %v481_v0 = vmul.f32 %v1958_v38, %v480_v60 }
 0x114   : > { %v468_v1 = vadd.f32 -0.09766342, %v461_v52  ;;  %v469_v2 = vadd.f32 -0.09766342, %v462_v56  ;;  %v482_v3 = vmul.f32 %v1959_v47, %v480_v60  ;;  %v483_v4 = vmul.f32 %v1960_v48, %v480_v60  ;;  %v1970_v49 = vld [vmem:[%s2488_s6 + $0xf0] sm:$0xff]  ;;  %v1971_v50 = vld [vmem:[%s2488_s6 + $0xf8] sm:$0xff] }
 0x115   : > { %v484_v5 = vmul.f32 %v1961_v53, %v480_v60  ;;  %v485_v6 = vmul.f32 %v1962_v54, %v480_v60  ;;  %v486_v7 = vmul.f32 %v1963_v55, %v480_v60  ;;  %v487_v8 = vmul.f32 %v1964_v59, %v480_v60  ;;  %v1973_v51 = vld [vmem:[%s2488_s6 + $0x108] sm:$0xff]  ;;  %s2591_s24 = sld [smem:[#allocation3 + $0x38]]  ;;  %s2594_s25 = sld [smem:[#allocation3 + $0x7]] }
 0x116   : > { %v488_v9 = vadd.f32 %v481_v0, %v431_v22  ;;  %v489_v10 = vadd.f32 %v482_v3, %v432_v23  ;;  %v490_v11 = vadd.f32 %v483_v4, %v433_v24  ;;  %v496_v12 = vstv %s2501_s9  ;;  %s2597_s26 = sld [smem:[#allocation3 + $0x20]]  ;;  %s2606_s27 = sld [smem:[#allocation3 + $0x39]] }
 0x117   : > { %v491_v13 = vadd.f32 %v484_v5, %v434_v26  ;;  %v492_v14 = vadd.f32 %v485_v6, %v435_v27  ;;  %v493_v15 = vadd.f32 %v486_v7, %v436_v28  ;;  %v494_v16 = vadd.f32 %v487_v8, %v437_v30  ;;  %s2611_s1 = sld [smem:[#allocation3 + $0x8]]  ;;  %s2613_s28 = sld [smem:[#allocation3 + $0x21]] }
 0x118   : > { %v497_v17 = vmul.f32 %v1958_v38, %v496_v12  ;;  %v498_v18 = vmul.f32 %v1959_v47, %v496_v12  ;;  %v499_v19 = vmul.f32 %v1960_v48, %v496_v12  ;;  %v500_v20 = vmul.f32 %v1961_v53, %v496_v12  ;;  %s2620_s29 = sld [smem:[#allocation3 + $0x3a]]  ;;  %s2627_s3 = sld [smem:[#allocation3 + $0x9]] }
 0x119   : > { %v501_v21 = vmul.f32 %v1962_v54, %v496_v12  ;;  %v502_v25 = vmul.f32 %v1963_v55, %v496_v12  ;;  %v503_v29 = vmul.f32 %v1964_v59, %v496_v12  ;;  %v512_v31 = vstv %s2510_s10  ;;  %s2630_s4 = sld [smem:[#allocation3 + $0x22]]  ;;  %s2636_s7 = sld [smem:[#allocation3 + $0x3b]] }
 0x11a   : > { %v504_v22 = vadd.f32 %v497_v17, %v447_v36  ;;  %v505_v23 = vadd.f32 %v498_v18, %v448_v37  ;;  %v506_v24 = vadd.f32 %v499_v19, %v449_v39  ;;  %v507_v26 = vadd.f32 %v500_v20, %v450_v40  ;;  %v1972_v40 = vld [vmem:[%s2488_s6 + $0x100] sm:$0xff]  ;;  %s2642_s8 = sld [smem:[#allocation3 + $0xa]]  ;;  %s2646_s9 = sld [smem:[#allocation3 + $0x23]] }
 0x11b   : > { %v508_v27 = vadd.f32 %v501_v21, %v451_v41  ;;  %v509_v28 = vadd.f32 %v502_v25, %v452_v43  ;;  %v510_v30 = vadd.f32 %v503_v29, %v453_v44  ;;  %v513_v32 = vmul.f32 %v1958_v38, %v512_v31  ;;  %s2655_s10 = sld [smem:[#allocation3 + $0x3c]]  ;;  %s412_s30 = sadd.s32 1, %s2272_s30  }
 0x11c   : > { %v514_v33 = vmul.f32 %v1959_v47, %v512_v31  ;;  %v515_v34 = vmul.f32 %v1960_v48, %v512_v31  ;;  %v516_v35 = vmul.f32 %v1961_v53, %v512_v31  ;;  %v517_v42 = vmul.f32 %v1962_v54, %v512_v31  ;;  %v1974_v48 = vld [vmem:[%s2488_s6 + $0x110] sm:$0x3f]  ;;  %p409_p13 = scmp.ge.s32.totalorder %s412_s30, 2  }
 0x11d   : > { %v518_v36 = vmul.f32 %v1963_v55, %v512_v31  ;;  %v519_v37 = vmul.f32 %v1964_v59, %v512_v31  ;;  %v520_v39 = vadd.f32 %v513_v32, %v463_v57  ;;  %v537_v41 = vstv %s2514_s11  ;;  %v1978_v31 = vld [vmem:[%s2488_s6 + $0x150] sm:$0xff]  ;;  %v1979_v32 = vld [vmem:[%s2488_s6 + $0x158] sm:$0xff]  ;;  %s2658_s11 = sld [smem:[#allocation3 + $0xb]] }
 0x11e   : > { %v521_v43 = vadd.f32 %v514_v33, %v464_v58  ;;  %v522_v44 = vadd.f32 %v515_v34, %v465_v61  ;;  %v523_v38 = vadd.f32 %v516_v35, %v466_v62  ;;  %v524_v47 = vadd.f32 %v517_v42, %v467_v63  ;;  %v1981_v34 = vld [vmem:[%s2488_s6 + $0x168] sm:$0xff]  ;;  %v1982_v35 = vld [vmem:[%s2488_s6 + $0x170] sm:$0xff] }
 0x11f   : > { %v525_v52 = vadd.f32 %v518_v36, %v468_v1  ;;  %v526_v53 = vadd.f32 %v519_v37, %v469_v2  ;;  %v538_v54 = vmul.f32 %v1968_v45, %v537_v41  ;;  %v539_v56 = vmul.f32 %v1969_v46, %v537_v41 }
 0x120   : > { %v540_v60 = vmul.f32 %v1970_v49, %v537_v41  ;;  %v541_v55 = vmul.f32 %v1971_v50, %v537_v41  ;;  %v542_v59 = vmul.f32 %v1972_v40, %v537_v41  ;;  %v543_v57 = vmul.f32 %v1973_v51, %v537_v41 }
 0x121   : > { %v544_v0 = vmul.f32 %v1974_v48, %v537_v41  ;;  %v545_v3 = vadd.f32 %v538_v54, %v488_v9  ;;  %v546_v4 = vadd.f32 %v539_v56, %v489_v10  ;;  %v553_v5 = vstv %s2518_s12  ;;  %s2661_s12 = sld [smem:[#allocation3 + $0x24]] }
 0x122   : > { %v547_v58 = vadd.f32 %v540_v60, %v490_v11  ;;  %v548_v61 = vadd.f32 %v541_v55, %v491_v13  ;;  %v549_v62 = vadd.f32 %v542_v59, %v492_v14  ;;  %v550_v63 = vadd.f32 %v543_v57, %v493_v15 }
 0x123   : > { %v551_v6 = vadd.f32 %v544_v0, %v494_v16  ;;  %v554_v1 = vmul.f32 %v1968_v45, %v553_v5  ;;  %v555_v2 = vmul.f32 %v1969_v46, %v553_v5  ;;  %v556_v7 = vmul.f32 %v1970_v49, %v553_v5 }
 0x124   : > { %v557_v8 = vmul.f32 %v1971_v50, %v553_v5  ;;  %v558_v12 = vmul.f32 %v1972_v40, %v553_v5  ;;  %v559_v17 = vmul.f32 %v1973_v51, %v553_v5  ;;  %v560_v18 = vmul.f32 %v1974_v48, %v553_v5 }
 0x125   : > { %v561_v9 = vadd.f32 %v554_v1, %v504_v22  ;;  %v562_v10 = vadd.f32 %v555_v2, %v505_v23  ;;  %v563_v11 = vadd.f32 %v556_v7, %v506_v24  ;;  %v569_v13 = vstv %s2527_s13  ;;  %v1980_v24 = vld [vmem:[%s2488_s6 + $0x160] sm:$0xff]  ;;  %s2670_s13 = sld [smem:[#allocation3 + $0x3d]] }
 0x126   : > { %v564_v14 = vadd.f32 %v557_v8, %v507_v26  ;;  %v565_v15 = vadd.f32 %v558_v12, %v508_v27  ;;  %v566_v16 = vadd.f32 %v559_v17, %v509_v28  ;;  %v567_v19 = vadd.f32 %v560_v18, %v510_v30  ;;  %v1988_v18 = vld [vmem:[%s2488_s6 + $0x1c0] sm:$0xff] }
 0x127   : > { %v570_v20 = vmul.f32 %v1968_v45, %v569_v13  ;;  %v571_v21 = vmul.f32 %v1969_v46, %v569_v13  ;;  %v572_v25 = vmul.f32 %v1970_v49, %v569_v13  ;;  %v573_v29 = vmul.f32 %v1971_v50, %v569_v13  ;;  %v1983_v45 = vld [vmem:[%s2488_s6 + $0x178] sm:$0xff]  ;;  %v1984_v46 = vld [vmem:[%s2488_s6 + $0x180] sm:$0x3f] }
 0x128   : > { %v574_v22 = vmul.f32 %v1972_v40, %v569_v13  ;;  %v575_v23 = vmul.f32 %v1973_v51, %v569_v13  ;;  %v576_v33 = vmul.f32 %v1974_v48, %v569_v13  ;;  %v594_v42 = vstv %s2530_s14  ;;  %s2675_s14 = sld [smem:[#allocation3 + $0xc]] }
 0x129   : > { %v577_v26 = vadd.f32 %v570_v20, %v520_v39  ;;  %v578_v27 = vadd.f32 %v571_v21, %v521_v43  ;;  %v579_v28 = vadd.f32 %v572_v25, %v522_v44  ;;  %v580_v30 = vadd.f32 %v573_v29, %v523_v38  ;;  %v1989_v21 = vld [vmem:[%s2488_s6 + $0x1c8] sm:$0xff]  ;;  %v1990_v25 = vld [vmem:[%s2488_s6 + $0x1d0] sm:$0xff]  ;;  %v1991_v29 = vld [vmem:[%s2488_s6 + $0x1d8] sm:$0xff] }
 0x12a   : > { %v581_v49 = vadd.f32 %v574_v22, %v524_v47  ;;  %v582_v36 = vadd.f32 %v575_v23, %v525_v52  ;;  %v583_v37 = vadd.f32 %v576_v33, %v526_v53  ;;  %v595_v50 = vmul.f32 %v1978_v31, %v594_v42 }
 0x12b   : > { %v596_v40 = vmul.f32 %v1979_v32, %v594_v42  ;;  %v597_v51 = vmul.f32 %v1980_v24, %v594_v42  ;;  %v598_v41 = vmul.f32 %v1981_v34, %v594_v42  ;;  %v599_v48 = vmul.f32 %v1982_v35, %v594_v42 }
 0x12c   : > { %v600_v54 = vmul.f32 %v1983_v45, %v594_v42  ;;  %v601_v56 = vmul.f32 %v1984_v46, %v594_v42  ;;  %v602_v60 = vadd.f32 %v595_v50, %v545_v3  ;;  %v610_v55 = vstv %s2533_s15  ;;  %s2677_s15 = sld [smem:[#allocation3 + $0x25]] }
 0x12d   : > { %v603_v39 = vadd.f32 %v596_v40, %v546_v4  ;;  %v604_v43 = vadd.f32 %v597_v51, %v547_v58  ;;  %v605_v44 = vadd.f32 %v598_v41, %v548_v61  ;;  %v606_v38 = vadd.f32 %v599_v48, %v549_v62 }
 0x12e   : > { %v607_v59 = vadd.f32 %v600_v54, %v550_v63  ;;  %v608_v47 = vadd.f32 %v601_v56, %v551_v6  ;;  %v611_v52 = vmul.f32 %v1978_v31, %v610_v55  ;;  %v612_v53 = vmul.f32 %v1979_v32, %v610_v55 }
 0x12f   : > { %v613_v57 = vmul.f32 %v1980_v24, %v610_v55  ;;  %v614_v0 = vmul.f32 %v1981_v34, %v610_v55  ;;  %v615_v5 = vmul.f32 %v1982_v35, %v610_v55  ;;  %v616_v1 = vmul.f32 %v1983_v45, %v610_v55 }
 0x130   : > { %v617_v3 = vmul.f32 %v1984_v46, %v610_v55  ;;  %v618_v2 = vadd.f32 %v611_v52, %v561_v9  ;;  %v619_v7 = vadd.f32 %v612_v53, %v562_v10  ;;  %v626_v4 = vstv %s2542_s16  ;;  %s2684_s16 = sld [smem:[#allocation3 + $0x3e]] }
 0x131   : > { %v620_v58 = vadd.f32 %v613_v57, %v563_v11  ;;  %v621_v61 = vadd.f32 %v614_v0, %v564_v14  ;;  %v622_v62 = vadd.f32 %v615_v5, %v565_v15  ;;  %v623_v63 = vadd.f32 %v616_v1, %v566_v16  ;;  %v1992_v16 = vld [vmem:[%s2488_s6 + $0x1e0] sm:$0xff] }
 0x132   : > { %v624_v6 = vadd.f32 %v617_v3, %v567_v19  ;;  %v627_v8 = vmul.f32 %v1978_v31, %v626_v4  ;;  %v628_v12 = vmul.f32 %v1979_v32, %v626_v4  ;;  %v629_v17 = vmul.f32 %v1980_v24, %v626_v4  ;;  %v1993_v19 = vld [vmem:[%s2488_s6 + $0x1e8] sm:$0xff]  ;;  %v1994_v31 = vld [vmem:[%s2488_s6 + $0x1f0] sm:$0x3f] }
 0x133   : > { %v630_v13 = vmul.f32 %v1981_v34, %v626_v4  ;;  %v631_v9 = vmul.f32 %v1982_v35, %v626_v4  ;;  %v632_v20 = vmul.f32 %v1983_v45, %v626_v4  ;;  %v633_v10 = vmul.f32 %v1984_v46, %v626_v4  ;;  %v1998_v1 = vld [vmem:[%s2488_s6 + $0x1] sm:$0xff] }
 0x134   : > { %v634_v11 = vadd.f32 %v627_v8, %v577_v26  ;;  %v635_v14 = vadd.f32 %v628_v12, %v578_v27  ;;  %v636_v15 = vadd.f32 %v629_v17, %v579_v28  ;;  %v651_v32 = vstv %s2547_s17  ;;  %v1999_v12 = vld [vmem:[%s2488_s6 + $0x9] sm:$0xff]  ;;  %v2000_v17 = vld [vmem:[%s2488_s6 + $0x11] sm:$0xff]  ;;  %s2691_s17 = sld [smem:[#allocation3 + $0xd]] }
 0x135   : > { %v637_v22 = vadd.f32 %v630_v13, %v580_v30  ;;  %v638_v23 = vadd.f32 %v631_v9, %v581_v49  ;;  %v639_v33 = vadd.f32 %v632_v20, %v582_v36  ;;  %v640_v24 = vadd.f32 %v633_v10, %v583_v37  ;;  %v2001_v13 = vld [vmem:[%s2488_s6 + $0x19] sm:$0xff] }
 0x136   : > { %v652_v34 = vmul.f32 %v1988_v18, %v651_v32  ;;  %v653_v35 = vmul.f32 %v1989_v21, %v651_v32  ;;  %v654_v42 = vmul.f32 %v1990_v25, %v651_v32  ;;  %v655_v45 = vmul.f32 %v1991_v29, %v651_v32 }
 0x137   : > { %v656_v46 = vmul.f32 %v1992_v16, %v651_v32  ;;  %v657_v50 = vmul.f32 %v1993_v19, %v651_v32  ;;  %v658_v40 = vmul.f32 %v1994_v31, %v651_v32  ;;  %v667_v51 = vstv %s2549_s18  ;;  %s2694_s18 = sld [smem:[#allocation3 + $0x26]] }
 0x138   : > { %v659_v26 = vadd.f32 %v652_v34, %v602_v60  ;;  %v660_v27 = vadd.f32 %v653_v35, %v603_v39  ;;  %v661_v28 = vadd.f32 %v654_v42, %v604_v43  ;;  %v662_v41 = vadd.f32 %v655_v45, %v605_v44 }
 0x139   : > { %v663_v48 = vadd.f32 %v656_v46, %v606_v38  ;;  %v664_v30 = vadd.f32 %v657_v50, %v607_v59  ;;  %v665_v49 = vadd.f32 %v658_v40, %v608_v47  ;;  %v668_v36 = vmul.f32 %v1988_v18, %v667_v51 }
 0x13a   : > { %v669_v37 = vmul.f32 %v1989_v21, %v667_v51  ;;  %v670_v54 = vmul.f32 %v1990_v25, %v667_v51  ;;  %v671_v56 = vmul.f32 %v1991_v29, %v667_v51  ;;  %v672_v55 = vmul.f32 %v1992_v16, %v667_v51 }
 0x13b   : > { %v673_v52 = vmul.f32 %v1993_v19, %v667_v51  ;;  %v674_v53 = vmul.f32 %v1994_v31, %v667_v51  ;;  %v675_v57 = vadd.f32 %v668_v36, %v618_v2  ;;  %v683_v0 = vstv %s2556_s19  ;;  %s2700_s19 = sld [smem:[#allocation3 + $0x3f]] }
 0x13c   : > { %v676_v60 = vadd.f32 %v669_v37, %v619_v7  ;;  %v677_v39 = vadd.f32 %v670_v54, %v620_v58  ;;  %v678_v43 = vadd.f32 %v671_v56, %v621_v61  ;;  %v679_v44 = vadd.f32 %v672_v55, %v622_v62  ;;  %v2002_v62 = vld [vmem:[%s2488_s6 + $0x21] sm:$0xff] }
 0x13d   : > { %v680_v38 = vadd.f32 %v673_v52, %v623_v63  ;;  %v681_v59 = vadd.f32 %v674_v53, %v624_v6  ;;  %v684_v47 = vmul.f32 %v1988_v18, %v683_v0  ;;  %v685_v5 = vmul.f32 %v1989_v21, %v683_v0  ;;  %v2003_v63 = vld [vmem:[%s2488_s6 + $0x29] sm:$0xff]  ;;  %v2004_v6 = vld [vmem:[%s2488_s6 + $0x31] sm:$0x3f] }
 0x13e   : > { %v686_v3 = vmul.f32 %v1990_v25, %v683_v0  ;;  %v687_v2 = vmul.f32 %v1991_v29, %v683_v0  ;;  %v688_v4 = vmul.f32 %v1992_v16, %v683_v0  ;;  %v689_v8 = vmul.f32 %v1993_v19, %v683_v0 }
 0x13f   : > { %v690_v7 = vmul.f32 %v1994_v31, %v683_v0  ;;  %v691_v58 = vadd.f32 %v684_v47, %v634_v11  ;;  %v692_v61 = vadd.f32 %v685_v5, %v635_v14  ;;  %v708_v18 = vstv %s2563_s0  ;;  %v2008_v47 = vld [vmem:[%s2488_s6 + $0x71] sm:$0xff]  ;;  %v2009_v5 = vld [vmem:[%s2488_s6 + $0x79] sm:$0xff]  ;;  %s2706_s0 = sld [smem:[#allocation3 + $0xe]] }
 0x140   : > { %v693_v9 = vadd.f32 %v686_v3, %v636_v15  ;;  %v694_v20 = vadd.f32 %v687_v2, %v637_v22  ;;  %v695_v10 = vadd.f32 %v688_v4, %v638_v23  ;;  %v696_v21 = vadd.f32 %v689_v8, %v639_v33  ;;  %v2010_v3 = vld [vmem:[%s2488_s6 + $0x81] sm:$0xff]  ;;  %v2011_v2 = vld [vmem:[%s2488_s6 + $0x89] sm:$0xff]  ;;  %v2013_v4 = vld [vmem:[%s2488_s6 + $0x99] sm:$0xff] }
 0x141   : > { %v697_v25 = vadd.f32 %v690_v7, %v640_v24  ;;  %v709_v29 = vmul.f32 %v1998_v1, %v708_v18  ;;  %v710_v16 = vmul.f32 %v1999_v12, %v708_v18  ;;  %v711_v19 = vmul.f32 %v2000_v17, %v708_v18 }
 0x142   : > { %v712_v32 = vmul.f32 %v2001_v13, %v708_v18  ;;  %v713_v34 = vmul.f32 %v2002_v62, %v708_v18  ;;  %v714_v35 = vmul.f32 %v2003_v63, %v708_v18  ;;  %v715_v42 = vmul.f32 %v2004_v6, %v708_v18 }
 0x143   : > { %v716_v11 = vadd.f32 %v709_v29, %v659_v26  ;;  %v717_v14 = vadd.f32 %v710_v16, %v660_v27  ;;  %v718_v31 = vadd.f32 %v711_v19, %v661_v28  ;;  %v724_v45 = vstv %s2566_s20  ;;  %s2710_s20 = sld [smem:[#allocation3 + $0x27]] }
 0x144   : > { %v719_v15 = vadd.f32 %v712_v32, %v662_v41  ;;  %v720_v46 = vadd.f32 %v713_v34, %v663_v48  ;;  %v721_v22 = vadd.f32 %v714_v35, %v664_v30  ;;  %v722_v23 = vadd.f32 %v715_v42, %v665_v49 }
 0x145   : > { %v725_v33 = vmul.f32 %v1998_v1, %v724_v45  ;;  %v726_v24 = vmul.f32 %v1999_v12, %v724_v45  ;;  %v727_v50 = vmul.f32 %v2000_v17, %v724_v45  ;;  %v728_v40 = vmul.f32 %v2001_v13, %v724_v45 }
 0x146   : > { %v729_v51 = vmul.f32 %v2002_v62, %v724_v45  ;;  %v730_v36 = vmul.f32 %v2003_v63, %v724_v45  ;;  %v731_v37 = vmul.f32 %v2004_v6, %v724_v45  ;;  %v740_v54 = vstv %s2572_s21  ;;  %s2719_s21 = sld [smem:[#allocation3 + $0x40]] }
 0x147   : > { %v732_v26 = vadd.f32 %v725_v33, %v675_v57  ;;  %v733_v27 = vadd.f32 %v726_v24, %v676_v60  ;;  %v734_v28 = vadd.f32 %v727_v50, %v677_v39  ;;  %v735_v41 = vadd.f32 %v728_v40, %v678_v43  ;;  %v2012_v43 = vld [vmem:[%s2488_s6 + $0x91] sm:$0xff] }
 0x148   : > { %v736_v48 = vadd.f32 %v729_v51, %v679_v44  ;;  %v737_v30 = vadd.f32 %v730_v36, %v680_v38  ;;  %v738_v49 = vadd.f32 %v731_v37, %v681_v59  ;;  %v741_v56 = vmul.f32 %v1998_v1, %v740_v54 }
 0x149   : > { %v742_v55 = vmul.f32 %v1999_v12, %v740_v54  ;;  %v743_v52 = vmul.f32 %v2000_v17, %v740_v54  ;;  %v744_v53 = vmul.f32 %v2001_v13, %v740_v54  ;;  %v745_v0 = vmul.f32 %v2002_v62, %v740_v54  ;;  %v2014_v12 = vld [vmem:[%s2488_s6 + $0xa1] sm:$0x3f] }
 0x14a   : > { %v746_v57 = vmul.f32 %v2003_v63, %v740_v54  ;;  %v747_v60 = vmul.f32 %v2004_v6, %v740_v54  ;;  %v748_v39 = vadd.f32 %v741_v56, %v691_v58  ;;  %v765_v44 = vstv %s2578_s22  ;;  %v2018_v54 = vld [vmem:[%s2488_s6 + $0xe1] sm:$0xff]  ;;  %v2019_v56 = vld [vmem:[%s2488_s6 + $0xe9] sm:$0xff]  ;;  %s2722_s22 = sld [smem:[#allocation3 + $0xf]] }
 0x14b   : > { %v749_v38 = vadd.f32 %v742_v55, %v692_v61  ;;  %v750_v59 = vadd.f32 %v743_v52, %v693_v9  ;;  %v751_v1 = vadd.f32 %v744_v53, %v694_v20  ;;  %v752_v8 = vadd.f32 %v745_v0, %v695_v10  ;;  %v2021_v52 = vld [vmem:[%s2488_s6 + $0xf9] sm:$0xff]  ;;  %v2022_v53 = vld [vmem:[%s2488_s6 + $0x101] sm:$0xff] }
 0x14c   : > { %v753_v17 = vadd.f32 %v746_v57, %v696_v21  ;;  %v754_v13 = vadd.f32 %v747_v60, %v697_v25  ;;  %v766_v7 = vmul.f32 %v2008_v47, %v765_v44  ;;  %v767_v62 = vmul.f32 %v2009_v5, %v765_v44 }
 0x14d   : > { %v768_v18 = vmul.f32 %v2010_v3, %v765_v44  ;;  %v769_v63 = vmul.f32 %v2011_v2, %v765_v44  ;;  %v770_v6 = vmul.f32 %v2012_v43, %v765_v44  ;;  %v771_v58 = vmul.f32 %v2013_v4, %v765_v44 }
 0x14e   : > { %v772_v29 = vmul.f32 %v2014_v12, %v765_v44  ;;  %v773_v16 = vadd.f32 %v766_v7, %v716_v11  ;;  %v774_v19 = vadd.f32 %v767_v62, %v717_v14  ;;  %v781_v32 = vstv %s2582_s23  ;;  %s2725_s23 = sld [smem:[#allocation3 + $0x28]] }
 0x14f   : > { %v775_v61 = vadd.f32 %v768_v18, %v718_v31  ;;  %v776_v9 = vadd.f32 %v769_v63, %v719_v15  ;;  %v777_v20 = vadd.f32 %v770_v6, %v720_v46  ;;  %v778_v10 = vadd.f32 %v771_v58, %v721_v22 }
 0x150   : > { %v779_v34 = vadd.f32 %v772_v29, %v722_v23  ;;  %v782_v21 = vmul.f32 %v2008_v47, %v781_v32  ;;  %v783_v25 = vmul.f32 %v2009_v5, %v781_v32  ;;  %v784_v35 = vmul.f32 %v2010_v3, %v781_v32 }
 0x151   : > { %v785_v42 = vmul.f32 %v2011_v2, %v781_v32  ;;  %v786_v45 = vmul.f32 %v2012_v43, %v781_v32  ;;  %v787_v33 = vmul.f32 %v2013_v4, %v781_v32  ;;  %v788_v24 = vmul.f32 %v2014_v12, %v781_v32 }
 0x152   : > { %v789_v11 = vadd.f32 %v782_v21, %v732_v26  ;;  %v790_v14 = vadd.f32 %v783_v25, %v733_v27  ;;  %v791_v31 = vadd.f32 %v784_v35, %v734_v28  ;;  %v797_v15 = vstv %s2591_s24  ;;  %v2020_v28 = vld [vmem:[%s2488_s6 + $0xf1] sm:$0xff]  ;;  %s2734_s24 = sld [smem:[#allocation3 + $0x41]] }
 0x153   : > { %v792_v46 = vadd.f32 %v785_v42, %v735_v41  ;;  %v793_v22 = vadd.f32 %v786_v45, %v736_v48  ;;  %v794_v23 = vadd.f32 %v787_v33, %v737_v30  ;;  %v795_v50 = vadd.f32 %v788_v24, %v738_v49  ;;  %v2028_v24 = vld [vmem:[%s2488_s6 + $0x151] sm:$0xff] }
 0x154   : > { %v798_v40 = vmul.f32 %v2008_v47, %v797_v15  ;;  %v799_v51 = vmul.f32 %v2009_v5, %v797_v15  ;;  %v800_v36 = vmul.f32 %v2010_v3, %v797_v15  ;;  %v801_v37 = vmul.f32 %v2011_v2, %v797_v15  ;;  %v2023_v47 = vld [vmem:[%s2488_s6 + $0x109] sm:$0xff]  ;;  %v2024_v5 = vld [vmem:[%s2488_s6 + $0x111] sm:$0x3f] }
 0x155   : > { %v802_v26 = vmul.f32 %v2012_v43, %v797_v15  ;;  %v803_v27 = vmul.f32 %v2013_v4, %v797_v15  ;;  %v804_v55 = vmul.f32 %v2014_v12, %v797_v15  ;;  %v822_v0 = vstv %s2594_s25  ;;  %s2739_s25 = sld [smem:[#allocation3 + $0x10]] }
 0x156   : > { %v805_v41 = vadd.f32 %v798_v40, %v748_v39  ;;  %v806_v48 = vadd.f32 %v799_v51, %v749_v38  ;;  %v807_v30 = vadd.f32 %v800_v36, %v750_v59  ;;  %v808_v49 = vadd.f32 %v801_v37, %v751_v1  ;;  %v2029_v51 = vld [vmem:[%s2488_s6 + $0x159] sm:$0xff]  ;;  %v2030_v36 = vld [vmem:[%s2488_s6 + $0x161] sm:$0xff]  ;;  %v2031_v37 = vld [vmem:[%s2488_s6 + $0x169] sm:$0xff] }
 0x157   : > { %v809_v3 = vadd.f32 %v802_v26, %v752_v8  ;;  %v810_v57 = vadd.f32 %v803_v27, %v753_v17  ;;  %v811_v60 = vadd.f32 %v804_v55, %v754_v13  ;;  %v823_v2 = vmul.f32 %v2018_v54, %v822_v0 }
 0x158   : > { %v824_v43 = vmul.f32 %v2019_v56, %v822_v0  ;;  %v825_v4 = vmul.f32 %v2020_v28, %v822_v0  ;;  %v826_v44 = vmul.f32 %v2021_v52, %v822_v0  ;;  %v827_v12 = vmul.f32 %v2022_v53, %v822_v0 }
 0x159   : > { %v828_v7 = vmul.f32 %v2023_v47, %v822_v0  ;;  %v829_v62 = vmul.f32 %v2024_v5, %v822_v0  ;;  %v830_v18 = vadd.f32 %v823_v2, %v773_v16  ;;  %v838_v63 = vstv %s2597_s26  ;;  %s2741_s26 = sld [smem:[#allocation3 + $0x29]] }
 0x15a   : > { %v831_v39 = vadd.f32 %v824_v43, %v774_v19  ;;  %v832_v38 = vadd.f32 %v825_v4, %v775_v61  ;;  %v833_v59 = vadd.f32 %v826_v44, %v776_v9  ;;  %v834_v1 = vadd.f32 %v827_v12, %v777_v20 }
 0x15b   : > { %v835_v6 = vadd.f32 %v828_v7, %v778_v10  ;;  %v836_v8 = vadd.f32 %v829_v62, %v779_v34  ;;  %v839_v17 = vmul.f32 %v2018_v54, %v838_v63  ;;  %v840_v13 = vmul.f32 %v2019_v56, %v838_v63 }
 0x15c   : > { %v841_v58 = vmul.f32 %v2020_v28, %v838_v63  ;;  %v842_v29 = vmul.f32 %v2021_v52, %v838_v63  ;;  %v843_v32 = vmul.f32 %v2022_v53, %v838_v63  ;;  %v844_v21 = vmul.f32 %v2023_v47, %v838_v63 }
 0x15d   : > { %v845_v16 = vmul.f32 %v2024_v5, %v838_v63  ;;  %v846_v25 = vadd.f32 %v839_v17, %v789_v11  ;;  %v847_v35 = vadd.f32 %v840_v13, %v790_v14  ;;  %v854_v19 = vstv %s2606_s27  ;;  %s2748_s27 = sld [smem:[#allocation3 + $0x42]] }
 0x15e   : > { %v848_v61 = vadd.f32 %v841_v58, %v791_v31  ;;  %v849_v9 = vadd.f32 %v842_v29, %v792_v46  ;;  %v850_v20 = vadd.f32 %v843_v32, %v793_v22  ;;  %v851_v10 = vadd.f32 %v844_v21, %v794_v23  ;;  %v2032_v23 = vld [vmem:[%s2488_s6 + $0x171] sm:$0xff]  ;;  %v2038_v21 = vld [vmem:[%s2488_s6 + $0x1c1] sm:$0xff] }
 0x15f   : > { %v852_v34 = vadd.f32 %v845_v16, %v795_v50  ;;  %v855_v42 = vmul.f32 %v2018_v54, %v854_v19  ;;  %v856_v45 = vmul.f32 %v2019_v56, %v854_v19  ;;  %v857_v33 = vmul.f32 %v2020_v28, %v854_v19  ;;  %v2033_v50 = vld [vmem:[%s2488_s6 + $0x179] sm:$0xff]  ;;  %v2034_v54 = vld [vmem:[%s2488_s6 + $0x181] sm:$0x3f] }
 0x160   : > { %v858_v15 = vmul.f32 %v2021_v52, %v854_v19  ;;  %v859_v11 = vmul.f32 %v2022_v53, %v854_v19  ;;  %v860_v40 = vmul.f32 %v2023_v47, %v854_v19  ;;  %v861_v14 = vmul.f32 %v2024_v5, %v854_v19 }
 0x161   : > { %v862_v31 = vadd.f32 %v855_v42, %v805_v41  ;;  %v863_v46 = vadd.f32 %v856_v45, %v806_v48  ;;  %v864_v22 = vadd.f32 %v857_v33, %v807_v30  ;;  %v879_v56 = vstv %s2611_s1  ;;  %v2039_v45 = vld [vmem:[%s2488_s6 + $0x1c9] sm:$0xff]  ;;  %v2040_v33 = vld [vmem:[%s2488_s6 + $0x1d1] sm:$0xff]  ;;  %s2755_s1 = sld [smem:[#allocation3 + $0x11]] }
 0x162   : > { %v865_v26 = vadd.f32 %v858_v15, %v808_v49  ;;  %v866_v27 = vadd.f32 %v859_v11, %v809_v3  ;;  %v867_v55 = vadd.f32 %v860_v40, %v810_v57  ;;  %v868_v28 = vadd.f32 %v861_v14, %v811_v60  ;;  %v2041_v15 = vld [vmem:[%s2488_s6 + $0x1d9] sm:$0xff] }
 0x163   : > { %v880_v52 = vmul.f32 %v2028_v24, %v879_v56  ;;  %v881_v53 = vmul.f32 %v2029_v51, %v879_v56  ;;  %v882_v0 = vmul.f32 %v2030_v36, %v879_v56  ;;  %v883_v47 = vmul.f32 %v2031_v37, %v879_v56 }
 0x164   : > { %v884_v5 = vmul.f32 %v2032_v23, %v879_v56  ;;  %v885_v2 = vmul.f32 %v2033_v50, %v879_v56  ;;  %v886_v43 = vmul.f32 %v2034_v54, %v879_v56  ;;  %v895_v4 = vstv %s2613_s28  ;;  %s2758_s28 = sld [smem:[#allocation3 + $0x2a]] }
 0x165   : > { %v887_v41 = vadd.f32 %v880_v52, %v830_v18  ;;  %v888_v48 = vadd.f32 %v881_v53, %v831_v39  ;;  %v889_v30 = vadd.f32 %v882_v0, %v832_v38  ;;  %v890_v44 = vadd.f32 %v883_v47, %v833_v59 }
 0x166   : > { %v891_v12 = vadd.f32 %v884_v5, %v834_v1  ;;  %v892_v49 = vadd.f32 %v885_v2, %v835_v6  ;;  %v893_v3 = vadd.f32 %v886_v43, %v836_v8  ;;  %v896_v57 = vmul.f32 %v2028_v24, %v895_v4 }
 0x167   : > { %v897_v60 = vmul.f32 %v2029_v51, %v895_v4  ;;  %v898_v7 = vmul.f32 %v2030_v36, %v895_v4  ;;  %v899_v62 = vmul.f32 %v2031_v37, %v895_v4  ;;  %v900_v63 = vmul.f32 %v2032_v23, %v895_v4 }
 0x168   : > { %v901_v17 = vmul.f32 %v2033_v50, %v895_v4  ;;  %v902_v13 = vmul.f32 %v2034_v54, %v895_v4  ;;  %v903_v58 = vadd.f32 %v896_v57, %v846_v25  ;;  %v911_v29 = vstv %s2620_s29  ;;  %s2764_s29 = sld [smem:[#allocation3 + $0x43]] }
 0x169   : > { %v904_v18 = vadd.f32 %v897_v60, %v847_v35  ;;  %v905_v39 = vadd.f32 %v898_v7, %v848_v61  ;;  %v906_v38 = vadd.f32 %v899_v62, %v849_v9  ;;  %v907_v59 = vadd.f32 %v900_v63, %v850_v20  ;;  %v2042_v20 = vld [vmem:[%s2488_s6 + $0x1e1] sm:$0xff] }
 0x16a   : > { %v908_v1 = vadd.f32 %v901_v17, %v851_v10  ;;  %v909_v6 = vadd.f32 %v902_v13, %v852_v34  ;;  %v912_v8 = vmul.f32 %v2028_v24, %v911_v29  ;;  %v913_v32 = vmul.f32 %v2029_v51, %v911_v29  ;;  %v2043_v10 = vld [vmem:[%s2488_s6 + $0x1e9] sm:$0xff]  ;;  %v2044_v34 = vld [vmem:[%s2488_s6 + $0x1f1] sm:$0x3f] }
 0x16b   : > { %v914_v16 = vmul.f32 %v2030_v36, %v911_v29  ;;  %v915_v25 = vmul.f32 %v2031_v37, %v911_v29  ;;  %v916_v19 = vmul.f32 %v2032_v23, %v911_v29  ;;  %v917_v42 = vmul.f32 %v2033_v50, %v911_v29 }
 0x16c   : > { %v918_v35 = vmul.f32 %v2034_v54, %v911_v29  ;;  %v919_v61 = vadd.f32 %v912_v8, %v862_v31  ;;  %v920_v9 = vadd.f32 %v913_v32, %v863_v46  ;;  %v936_v24 = vstv %s2627_s3  ;;  %v2048_v8 = vld [vmem:[%s2488_s6 + $0x2] sm:$0xff]  ;;  %v2049_v32 = vld [vmem:[%s2488_s6 + $0xa] sm:$0xff]  ;;  %s2770_s3 = sld [smem:[#allocation3 + $0x12]] }
 0x16d   : > { %v921_v11 = vadd.f32 %v914_v16, %v864_v22  ;;  %v922_v40 = vadd.f32 %v915_v25, %v865_v26  ;;  %v923_v14 = vadd.f32 %v916_v19, %v866_v27  ;;  %v924_v51 = vadd.f32 %v917_v42, %v867_v55  ;;  %v2050_v16 = vld [vmem:[%s2488_s6 + $0x12] sm:$0xff]  ;;  %v2051_v25 = vld [vmem:[%s2488_s6 + $0x1a] sm:$0xff]  ;;  %v2053_v19 = vld [vmem:[%s2488_s6 + $0x2a] sm:$0xff] }
 0x16e   : > { %v925_v36 = vadd.f32 %v918_v35, %v868_v28  ;;  %v937_v37 = vmul.f32 %v2038_v21, %v936_v24  ;;  %v938_v23 = vmul.f32 %v2039_v45, %v936_v24  ;;  %v939_v50 = vmul.f32 %v2040_v33, %v936_v24 }
 0x16f   : > { %v940_v56 = vmul.f32 %v2041_v15, %v936_v24  ;;  %v941_v52 = vmul.f32 %v2042_v20, %v936_v24  ;;  %v942_v53 = vmul.f32 %v2043_v10, %v936_v24  ;;  %v943_v0 = vmul.f32 %v2044_v34, %v936_v24 }
 0x170   : > { %v944_v31 = vadd.f32 %v937_v37, %v887_v41  ;;  %v945_v46 = vadd.f32 %v938_v23, %v888_v48  ;;  %v946_v54 = vadd.f32 %v939_v50, %v889_v30  ;;  %v952_v47 = vstv %s2630_s4  ;;  %s2774_s4 = sld [smem:[#allocation3 + $0x2b]] }
 0x171   : > { %v947_v22 = vadd.f32 %v940_v56, %v890_v44  ;;  %v948_v5 = vadd.f32 %v941_v52, %v891_v12  ;;  %v949_v26 = vadd.f32 %v942_v53, %v892_v49  ;;  %v950_v27 = vadd.f32 %v943_v0, %v893_v3 }
 0x172   : > { %v953_v55 = vmul.f32 %v2038_v21, %v952_v47  ;;  %v954_v28 = vmul.f32 %v2039_v45, %v952_v47  ;;  %v955_v2 = vmul.f32 %v2040_v33, %v952_v47  ;;  %v956_v43 = vmul.f32 %v2041_v15, %v952_v47 }
 0x173   : > { %v957_v4 = vmul.f32 %v2042_v20, %v952_v47  ;;  %v958_v57 = vmul.f32 %v2043_v10, %v952_v47  ;;  %v959_v60 = vmul.f32 %v2044_v34, %v952_v47  ;;  %v968_v7 = vstv %s2636_s7  ;;  %s2783_s7 = sld [smem:[#allocation3 + $0x44]] }
 0x174   : > { %v960_v41 = vadd.f32 %v953_v55, %v903_v58  ;;  %v961_v48 = vadd.f32 %v954_v28, %v904_v18  ;;  %v962_v30 = vadd.f32 %v955_v2, %v905_v39  ;;  %v963_v44 = vadd.f32 %v956_v43, %v906_v38  ;;  %v2052_v38 = vld [vmem:[%s2488_s6 + $0x22] sm:$0xff] }
 0x175   : > { %v964_v12 = vadd.f32 %v957_v4, %v907_v59  ;;  %v965_v49 = vadd.f32 %v958_v57, %v908_v1  ;;  %v966_v3 = vadd.f32 %v959_v60, %v909_v6  ;;  %v969_v62 = vmul.f32 %v2038_v21, %v968_v7 }
 0x176   : > { %v970_v63 = vmul.f32 %v2039_v45, %v968_v7  ;;  %v971_v17 = vmul.f32 %v2040_v33, %v968_v7  ;;  %v972_v13 = vmul.f32 %v2041_v15, %v968_v7  ;;  %v973_v29 = vmul.f32 %v2042_v20, %v968_v7  ;;  %v2054_v45 = vld [vmem:[%s2488_s6 + $0x32] sm:$0x3f] }
 0x177   : > { %v974_v58 = vmul.f32 %v2043_v10, %v968_v7  ;;  %v975_v18 = vmul.f32 %v2044_v34, %v968_v7  ;;  %v976_v39 = vadd.f32 %v969_v62, %v919_v61  ;;  %v993_v59 = vstv %s2642_s8  ;;  %v2058_v7 = vld [vmem:[%s2488_s6 + $0x72] sm:$0xff]  ;;  %v2059_v62 = vld [vmem:[%s2488_s6 + $0x7a] sm:$0xff]  ;;  %s2786_s8 = sld [smem:[#allocation3 + $0x13]] }
 0x178   : > { %v977_v1 = vadd.f32 %v970_v63, %v920_v9  ;;  %v978_v6 = vadd.f32 %v971_v17, %v921_v11  ;;  %v979_v21 = vadd.f32 %v972_v13, %v922_v40  ;;  %v980_v42 = vadd.f32 %v973_v29, %v923_v14  ;;  %v2061_v17 = vld [vmem:[%s2488_s6 + $0x8a] sm:$0xff]  ;;  %v2062_v13 = vld [vmem:[%s2488_s6 + $0x92] sm:$0xff] }
 0x179   : > { %v981_v33 = vadd.f32 %v974_v58, %v924_v51  ;;  %v982_v15 = vadd.f32 %v975_v18, %v925_v36  ;;  %v994_v35 = vmul.f32 %v2048_v8, %v993_v59  ;;  %v995_v20 = vmul.f32 %v2049_v32, %v993_v59 }
 0x17a   : > { %v996_v24 = vmul.f32 %v2050_v16, %v993_v59  ;;  %v997_v10 = vmul.f32 %v2051_v25, %v993_v59  ;;  %v998_v34 = vmul.f32 %v2052_v38, %v993_v59  ;;  %v999_v61 = vmul.f32 %v2053_v19, %v993_v59 }
 0x17b   : > { %v1000_v37 = vmul.f32 %v2054_v45, %v993_v59  ;;  %v1001_v23 = vadd.f32 %v994_v35, %v944_v31  ;;  %v1002_v50 = vadd.f32 %v995_v20, %v945_v46  ;;  %v1009_v56 = vstv %s2646_s9  ;;  %s2789_s9 = sld [smem:[#allocation3 + $0x2c]] }
 0x17c   : > { %v1003_v9 = vadd.f32 %v996_v24, %v946_v54  ;;  %v1004_v11 = vadd.f32 %v997_v10, %v947_v22  ;;  %v1005_v40 = vadd.f32 %v998_v34, %v948_v5  ;;  %v1006_v14 = vadd.f32 %v999_v61, %v949_v26 }
 0x17d   : > { %v1007_v52 = vadd.f32 %v1000_v37, %v950_v27  ;;  %v1010_v51 = vmul.f32 %v2048_v8, %v1009_v56  ;;  %v1011_v36 = vmul.f32 %v2049_v32, %v1009_v56  ;;  %v1012_v53 = vmul.f32 %v2050_v16, %v1009_v56 }
 0x17e   : > { %v1013_v0 = vmul.f32 %v2051_v25, %v1009_v56  ;;  %v1014_v47 = vmul.f32 %v2052_v38, %v1009_v56  ;;  %v1015_v55 = vmul.f32 %v2053_v19, %v1009_v56  ;;  %v1016_v28 = vmul.f32 %v2054_v45, %v1009_v56 }
 0x17f   : > { %v1017_v31 = vadd.f32 %v1010_v51, %v960_v41  ;;  %v1018_v46 = vadd.f32 %v1011_v36, %v961_v48  ;;  %v1019_v54 = vadd.f32 %v1012_v53, %v962_v30  ;;  %v1025_v22 = vstv %s2655_s10  ;;  %v2060_v30 = vld [vmem:[%s2488_s6 + $0x82] sm:$0xff]  ;;  %s2798_s10 = sld [smem:[#allocation3 + $0x45]] }
 0x180   : > { %v1020_v5 = vadd.f32 %v1013_v0, %v963_v44  ;;  %v1021_v26 = vadd.f32 %v1014_v47, %v964_v12  ;;  %v1022_v27 = vadd.f32 %v1015_v55, %v965_v49  ;;  %v1023_v2 = vadd.f32 %v1016_v28, %v966_v3  ;;  %v2068_v28 = vld [vmem:[%s2488_s6 + $0xe2] sm:$0xff] }
 0x181   : > { %v1026_v43 = vmul.f32 %v2048_v8, %v1025_v22  ;;  %v1027_v4 = vmul.f32 %v2049_v32, %v1025_v22  ;;  %v1028_v57 = vmul.f32 %v2050_v16, %v1025_v22  ;;  %v1029_v60 = vmul.f32 %v2051_v25, %v1025_v22  ;;  %v2063_v8 = vld [vmem:[%s2488_s6 + $0x9a] sm:$0xff]  ;;  %v2064_v32 = vld [vmem:[%s2488_s6 + $0xa2] sm:$0x3f] }
 0x182   : > { %v1030_v41 = vmul.f32 %v2052_v38, %v1025_v22  ;;  %v1031_v48 = vmul.f32 %v2053_v19, %v1025_v22  ;;  %v1032_v63 = vmul.f32 %v2054_v45, %v1025_v22  ;;  %v1050_v29 = vstv %s2658_s11  ;;  %s2803_s11 = sld [smem:[#allocation3 + $0x14]] }
 0x183   : > { %v1033_v44 = vadd.f32 %v1026_v43, %v976_v39  ;;  %v1034_v12 = vadd.f32 %v1027_v4, %v977_v1  ;;  %v1035_v49 = vadd.f32 %v1028_v57, %v978_v6  ;;  %v1036_v3 = vadd.f32 %v1029_v60, %v979_v21  ;;  %v2069_v4 = vld [vmem:[%s2488_s6 + $0xea] sm:$0xff]  ;;  %v2070_v57 = vld [vmem:[%s2488_s6 + $0xf2] sm:$0xff]  ;;  %v2071_v60 = vld [vmem:[%s2488_s6 + $0xfa] sm:$0xff] }
 0x184   : > { %v1037_v16 = vadd.f32 %v1030_v41, %v980_v42  ;;  %v1038_v58 = vadd.f32 %v1031_v48, %v981_v33  ;;  %v1039_v18 = vadd.f32 %v1032_v63, %v982_v15  ;;  %v1051_v25 = vmul.f32 %v2058_v7, %v1050_v29 }
 0x185   : > { %v1052_v38 = vmul.f32 %v2059_v62, %v1050_v29  ;;  %v1053_v19 = vmul.f32 %v2060_v30, %v1050_v29  ;;  %v1054_v59 = vmul.f32 %v2061_v17, %v1050_v29  ;;  %v1055_v45 = vmul.f32 %v2062_v13, %v1050_v29 }
 0x186   : > { %v1056_v35 = vmul.f32 %v2063_v8, %v1050_v29  ;;  %v1057_v20 = vmul.f32 %v2064_v32, %v1050_v29  ;;  %v1058_v24 = vadd.f32 %v1051_v25, %v1001_v23  ;;  %v1066_v10 = vstv %s2661_s12  ;;  %s2805_s12 = sld [smem:[#allocation3 + $0x2d]] }
 0x187   : > { %v1059_v39 = vadd.f32 %v1052_v38, %v1002_v50  ;;  %v1060_v1 = vadd.f32 %v1053_v19, %v1003_v9  ;;  %v1061_v6 = vadd.f32 %v1054_v59, %v1004_v11  ;;  %v1062_v21 = vadd.f32 %v1055_v45, %v1005_v40 }
 0x188   : > { %v1063_v34 = vadd.f32 %v1056_v35, %v1006_v14  ;;  %v1064_v42 = vadd.f32 %v1057_v20, %v1007_v52  ;;  %v1067_v33 = vmul.f32 %v2058_v7, %v1066_v10  ;;  %v1068_v15 = vmul.f32 %v2059_v62, %v1066_v10 }
 0x189   : > { %v1069_v61 = vmul.f32 %v2060_v30, %v1066_v10  ;;  %v1070_v37 = vmul.f32 %v2061_v17, %v1066_v10  ;;  %v1071_v56 = vmul.f32 %v2062_v13, %v1066_v10  ;;  %v1072_v51 = vmul.f32 %v2063_v8, %v1066_v10 }
 0x18a   : > { %v1073_v23 = vmul.f32 %v2064_v32, %v1066_v10  ;;  %v1074_v36 = vadd.f32 %v1067_v33, %v1017_v31  ;;  %v1075_v53 = vadd.f32 %v1068_v15, %v1018_v46  ;;  %v1082_v50 = vstv %s2670_s13  ;;  %s2812_s13 = sld [smem:[#allocation3 + $0x46]] }
 0x18b   : > { %v1076_v9 = vadd.f32 %v1069_v61, %v1019_v54  ;;  %v1077_v11 = vadd.f32 %v1070_v37, %v1020_v5  ;;  %v1078_v40 = vadd.f32 %v1071_v56, %v1021_v26  ;;  %v1079_v14 = vadd.f32 %v1072_v51, %v1022_v27  ;;  %v2072_v27 = vld [vmem:[%s2488_s6 + $0x102] sm:$0xff]  ;;  %v2078_v51 = vld [vmem:[%s2488_s6 + $0x152] sm:$0xff] }
 0x18c   : > { %v1080_v52 = vadd.f32 %v1073_v23, %v1023_v2  ;;  %v1083_v0 = vmul.f32 %v2058_v7, %v1082_v50  ;;  %v1084_v47 = vmul.f32 %v2059_v62, %v1082_v50  ;;  %v1085_v55 = vmul.f32 %v2060_v30, %v1082_v50  ;;  %v2073_v2 = vld [vmem:[%s2488_s6 + $0x10a] sm:$0xff]  ;;  %v2074_v7 = vld [vmem:[%s2488_s6 + $0x112] sm:$0x3f] }
 0x18d   : > { %v1086_v22 = vmul.f32 %v2061_v17, %v1082_v50  ;;  %v1087_v31 = vmul.f32 %v2062_v13, %v1082_v50  ;;  %v1088_v43 = vmul.f32 %v2063_v8, %v1082_v50  ;;  %v1089_v46 = vmul.f32 %v2064_v32, %v1082_v50 }
 0x18e   : > { %v1090_v54 = vadd.f32 %v1083_v0, %v1033_v44  ;;  %v1091_v5 = vadd.f32 %v1084_v47, %v1034_v12  ;;  %v1092_v26 = vadd.f32 %v1085_v55, %v1035_v49  ;;  %v1107_v62 = vstv %s2675_s14  ;;  %v2079_v47 = vld [vmem:[%s2488_s6 + $0x15a] sm:$0xff]  ;;  %v2080_v55 = vld [vmem:[%s2488_s6 + $0x162] sm:$0xff]  ;;  %s2819_s14 = sld [smem:[#allocation3 + $0x15]] }
 0x18f   : > { %v1093_v41 = vadd.f32 %v1086_v22, %v1036_v3  ;;  %v1094_v48 = vadd.f32 %v1087_v31, %v1037_v16  ;;  %v1095_v63 = vadd.f32 %v1088_v43, %v1038_v58  ;;  %v1096_v30 = vadd.f32 %v1089_v46, %v1039_v18  ;;  %v2081_v22 = vld [vmem:[%s2488_s6 + $0x16a] sm:$0xff] }
 0x190   : > { %v1108_v17 = vmul.f32 %v2068_v28, %v1107_v62  ;;  %v1109_v13 = vmul.f32 %v2069_v4, %v1107_v62  ;;  %v1110_v29 = vmul.f32 %v2070_v57, %v1107_v62  ;;  %v1111_v8 = vmul.f32 %v2071_v60, %v1107_v62 }
 0x191   : > { %v1112_v32 = vmul.f32 %v2072_v27, %v1107_v62  ;;  %v1113_v25 = vmul.f32 %v2073_v2, %v1107_v62  ;;  %v1114_v38 = vmul.f32 %v2074_v7, %v1107_v62  ;;  %v1123_v19 = vstv %s2677_s15  ;;  %s2822_s15 = sld [smem:[#allocation3 + $0x2e]] }
 0x192   : > { %v1115_v44 = vadd.f32 %v1108_v17, %v1058_v24  ;;  %v1116_v12 = vadd.f32 %v1109_v13, %v1059_v39  ;;  %v1117_v49 = vadd.f32 %v1110_v29, %v1060_v1  ;;  %v1118_v59 = vadd.f32 %v1111_v8, %v1061_v6 }
 0x193   : > { %v1119_v45 = vadd.f32 %v1112_v32, %v1062_v21  ;;  %v1120_v3 = vadd.f32 %v1113_v25, %v1063_v34  ;;  %v1121_v16 = vadd.f32 %v1114_v38, %v1064_v42  ;;  %v1124_v58 = vmul.f32 %v2068_v28, %v1123_v19 }
 0x194   : > { %v1125_v18 = vmul.f32 %v2069_v4, %v1123_v19  ;;  %v1126_v35 = vmul.f32 %v2070_v57, %v1123_v19  ;;  %v1127_v20 = vmul.f32 %v2071_v60, %v1123_v19  ;;  %v1128_v10 = vmul.f32 %v2072_v27, %v1123_v19 }
 0x195   : > { %v1129_v33 = vmul.f32 %v2073_v2, %v1123_v19  ;;  %v1130_v15 = vmul.f32 %v2074_v7, %v1123_v19  ;;  %v1131_v61 = vadd.f32 %v1124_v58, %v1074_v36  ;;  %v1139_v37 = vstv %s2684_s16  ;;  %s2828_s16 = sld [smem:[#allocation3 + $0x47]] }
 0x196   : > { %v1132_v24 = vadd.f32 %v1125_v18, %v1075_v53  ;;  %v1133_v39 = vadd.f32 %v1126_v35, %v1076_v9  ;;  %v1134_v1 = vadd.f32 %v1127_v20, %v1077_v11  ;;  %v1135_v6 = vadd.f32 %v1128_v10, %v1078_v40  ;;  %v2082_v40 = vld [vmem:[%s2488_s6 + $0x172] sm:$0xff] }
 0x197   : > { %v1136_v21 = vadd.f32 %v1129_v33, %v1079_v14  ;;  %v1137_v34 = vadd.f32 %v1130_v15, %v1080_v52  ;;  %v1140_v42 = vmul.f32 %v2068_v28, %v1139_v37  ;;  %v1141_v56 = vmul.f32 %v2069_v4, %v1139_v37  ;;  %v2083_v14 = vld [vmem:[%s2488_s6 + $0x17a] sm:$0xff]  ;;  %v2084_v52 = vld [vmem:[%s2488_s6 + $0x182] sm:$0x3f] }
 0x198   : > { %v1142_v23 = vmul.f32 %v2070_v57, %v1139_v37  ;;  %v1143_v36 = vmul.f32 %v2071_v60, %v1139_v37  ;;  %v1144_v50 = vmul.f32 %v2072_v27, %v1139_v37  ;;  %v1145_v0 = vmul.f32 %v2073_v2, %v1139_v37 }
 0x199   : > { %v1146_v53 = vmul.f32 %v2074_v7, %v1139_v37  ;;  %v1147_v9 = vadd.f32 %v1140_v42, %v1090_v54  ;;  %v1148_v11 = vadd.f32 %v1141_v56, %v1091_v5  ;;  %v1164_v28 = vstv %s2691_s17  ;;  %v2088_v42 = vld [vmem:[%s2488_s6 + $0x1c2] sm:$0xff]  ;;  %v2089_v56 = vld [vmem:[%s2488_s6 + $0x1ca] sm:$0xff]  ;;  %s2834_s17 = sld [smem:[#allocation3 + $0x16]] }
 0x19a   : > { %v1149_v31 = vadd.f32 %v1142_v23, %v1092_v26  ;;  %v1150_v43 = vadd.f32 %v1143_v36, %v1093_v41  ;;  %v1151_v46 = vadd.f32 %v1144_v50, %v1094_v48  ;;  %v1152_v4 = vadd.f32 %v1145_v0, %v1095_v63  ;;  %v2090_v23 = vld [vmem:[%s2488_s6 + $0x1d2] sm:$0xff]  ;;  %v2091_v36 = vld [vmem:[%s2488_s6 + $0x1da] sm:$0xff]  ;;  %v2093_v50 = vld [vmem:[%s2488_s6 + $0x1ea] sm:$0xff] }
 0x19b   : > { %v1153_v57 = vadd.f32 %v1146_v53, %v1096_v30  ;;  %v1165_v60 = vmul.f32 %v2078_v51, %v1164_v28  ;;  %v1166_v27 = vmul.f32 %v2079_v47, %v1164_v28  ;;  %v1167_v2 = vmul.f32 %v2080_v55, %v1164_v28 }
 0x19c   : > { %v1168_v62 = vmul.f32 %v2081_v22, %v1164_v28  ;;  %v1169_v17 = vmul.f32 %v2082_v40, %v1164_v28  ;;  %v1170_v13 = vmul.f32 %v2083_v14, %v1164_v28  ;;  %v1171_v29 = vmul.f32 %v2084_v52, %v1164_v28 }
 0x19d   : > { %v1172_v54 = vadd.f32 %v1165_v60, %v1115_v44  ;;  %v1173_v5 = vadd.f32 %v1166_v27, %v1116_v12  ;;  %v1174_v7 = vadd.f32 %v1167_v2, %v1117_v49  ;;  %v1180_v8 = vstv %s2694_s18  ;;  %s2838_s18 = sld [smem:[#allocation3 + $0x2f]] }
 0x19e   : > { %v1175_v26 = vadd.f32 %v1168_v62, %v1118_v59  ;;  %v1176_v32 = vadd.f32 %v1169_v17, %v1119_v45  ;;  %v1177_v41 = vadd.f32 %v1170_v13, %v1120_v3  ;;  %v1178_v48 = vadd.f32 %v1171_v29, %v1121_v16 }
 0x19f   : > { %v1181_v63 = vmul.f32 %v2078_v51, %v1180_v8  ;;  %v1182_v30 = vmul.f32 %v2079_v47, %v1180_v8  ;;  %v1183_v25 = vmul.f32 %v2080_v55, %v1180_v8  ;;  %v1184_v38 = vmul.f32 %v2081_v22, %v1180_v8 }
 0x1a0   : > { %v1185_v19 = vmul.f32 %v2082_v40, %v1180_v8  ;;  %v1186_v58 = vmul.f32 %v2083_v14, %v1180_v8  ;;  %v1187_v18 = vmul.f32 %v2084_v52, %v1180_v8  ;;  %v1196_v35 = vstv %s2700_s19  ;;  %s2847_s19 = sld [smem:[#allocation3 + $0x48]] }
 0x1a1   : > { %v1188_v44 = vadd.f32 %v1181_v63, %v1131_v61  ;;  %v1189_v12 = vadd.f32 %v1182_v30, %v1132_v24  ;;  %v1190_v49 = vadd.f32 %v1183_v25, %v1133_v39  ;;  %v1191_v59 = vadd.f32 %v1184_v38, %v1134_v1  ;;  %v2092_v1 = vld [vmem:[%s2488_s6 + $0x1e2] sm:$0xff] }
 0x1a2   : > { %v1192_v45 = vadd.f32 %v1185_v19, %v1135_v6  ;;  %v1193_v3 = vadd.f32 %v1186_v58, %v1136_v21  ;;  %v1194_v16 = vadd.f32 %v1187_v18, %v1137_v34  ;;  %v1197_v20 = vmul.f32 %v2078_v51, %v1196_v35 }
 0x1a3   : > { %v1198_v10 = vmul.f32 %v2079_v47, %v1196_v35  ;;  %v1199_v33 = vmul.f32 %v2080_v55, %v1196_v35  ;;  %v1200_v15 = vmul.f32 %v2081_v22, %v1196_v35  ;;  %v1201_v37 = vmul.f32 %v2082_v40, %v1196_v35  ;;  %v2094_v47 = vld [vmem:[%s2488_s6 + $0x1f2] sm:$0x3f] }
 0x1a4   : > { %v1202_v61 = vmul.f32 %v2083_v14, %v1196_v35  ;;  %v1203_v24 = vmul.f32 %v2084_v52, %v1196_v35  ;;  %v1204_v39 = vadd.f32 %v1197_v20, %v1147_v9  ;;  %v1221_v6 = vstv %s2706_s0  ;;  %v2098_v35 = vld [vmem:[%s2488_s6 + $0x3] sm:$0xff]  ;;  %v2099_v20 = vld [vmem:[%s2488_s6 + $0xb] sm:$0xff]  ;;  %s2850_s0 = sld [smem:[#allocation3 + $0x17]] }
 0x1a5   : > { %v1205_v21 = vadd.f32 %v1198_v10, %v1148_v11  ;;  %v1206_v34 = vadd.f32 %v1199_v33, %v1149_v31  ;;  %v1207_v51 = vadd.f32 %v1200_v15, %v1150_v43  ;;  %v1208_v0 = vadd.f32 %v1201_v37, %v1151_v46  ;;  %v2101_v33 = vld [vmem:[%s2488_s6 + $0x1b] sm:$0xff]  ;;  %v2102_v15 = vld [vmem:[%s2488_s6 + $0x23] sm:$0xff] }
 0x1a6   : > { %v1209_v55 = vadd.f32 %v1202_v61, %v1152_v4  ;;  %v1210_v22 = vadd.f32 %v1203_v24, %v1153_v57  ;;  %v1222_v53 = vmul.f32 %v2088_v42, %v1221_v6  ;;  %v1223_v40 = vmul.f32 %v2089_v56, %v1221_v6 }
 0x1a7   : > { %v1224_v28 = vmul.f32 %v2090_v23, %v1221_v6  ;;  %v1225_v14 = vmul.f32 %v2091_v36, %v1221_v6  ;;  %v1226_v52 = vmul.f32 %v2092_v1, %v1221_v6  ;;  %v1227_v9 = vmul.f32 %v2093_v50, %v1221_v6 }
 0x1a8   : > { %v1228_v60 = vmul.f32 %v2094_v47, %v1221_v6  ;;  %v1229_v27 = vadd.f32 %v1222_v53, %v1172_v54  ;;  %v1230_v2 = vadd.f32 %v1223_v40, %v1173_v5  ;;  %v1237_v62 = vstv %s2710_s20  ;;  %s2853_s20 = sld [smem:[#allocation3 + $0x30]] }
 0x1a9   : > { %v1231_v11 = vadd.f32 %v1224_v28, %v1174_v7  ;;  %v1232_v31 = vadd.f32 %v1225_v14, %v1175_v26  ;;  %v1233_v43 = vadd.f32 %v1226_v52, %v1176_v32  ;;  %v1234_v46 = vadd.f32 %v1227_v9, %v1177_v41 }
 0x1aa   : > { %v1235_v17 = vadd.f32 %v1228_v60, %v1178_v48  ;;  %v1238_v4 = vmul.f32 %v2088_v42, %v1237_v62  ;;  %v1239_v57 = vmul.f32 %v2089_v56, %v1237_v62  ;;  %v1240_v13 = vmul.f32 %v2090_v23, %v1237_v62 }
 0x1ab   : > { %v1241_v29 = vmul.f32 %v2091_v36, %v1237_v62  ;;  %v1242_v8 = vmul.f32 %v2092_v1, %v1237_v62  ;;  %v1243_v63 = vmul.f32 %v2093_v50, %v1237_v62  ;;  %v1244_v30 = vmul.f32 %v2094_v47, %v1237_v62 }
 0x1ac   : > { %v1245_v54 = vadd.f32 %v1238_v4, %v1188_v44  ;;  %v1246_v5 = vadd.f32 %v1239_v57, %v1189_v12  ;;  %v1247_v7 = vadd.f32 %v1240_v13, %v1190_v49  ;;  %v1253_v26 = vstv %s2719_s21  ;;  %v2100_v49 = vld [vmem:[%s2488_s6 + $0x13] sm:$0xff]  ;;  %s2862_s21 = sld [smem:[#allocation3 + $0x49]] }
 0x1ad   : > { %v1248_v32 = vadd.f32 %v1241_v29, %v1191_v59  ;;  %v1249_v41 = vadd.f32 %v1242_v8, %v1192_v45  ;;  %v1250_v48 = vadd.f32 %v1243_v63, %v1193_v3  ;;  %v1251_v25 = vadd.f32 %v1244_v30, %v1194_v16  ;;  %v2108_v30 = vld [vmem:[%s2488_s6 + $0x73] sm:$0xff] }
 0x1ae   : > { %v1254_v38 = vmul.f32 %v2088_v42, %v1253_v26  ;;  %v1255_v19 = vmul.f32 %v2089_v56, %v1253_v26  ;;  %v1256_v58 = vmul.f32 %v2090_v23, %v1253_v26  ;;  %v1257_v18 = vmul.f32 %v2091_v36, %v1253_v26  ;;  %v2103_v42 = vld [vmem:[%s2488_s6 + $0x2b] sm:$0xff]  ;;  %v2104_v56 = vld [vmem:[%s2488_s6 + $0x33] sm:$0x3f] }
 0x1af   : > { %v1258_v44 = vmul.f32 %v2092_v1, %v1253_v26  ;;  %v1259_v12 = vmul.f32 %v2093_v50, %v1253_v26  ;;  %v1260_v10 = vmul.f32 %v2094_v47, %v1253_v26  ;;  %v1278_v37 = vstv %s2722_s22  ;;  %s2867_s22 = sld [smem:[#allocation3 + $0x18]] }
 0x1b0   : > { %v1261_v59 = vadd.f32 %v1254_v38, %v1204_v39  ;;  %v1262_v45 = vadd.f32 %v1255_v19, %v1205_v21  ;;  %v1263_v3 = vadd.f32 %v1256_v58, %v1206_v34  ;;  %v1264_v16 = vadd.f32 %v1257_v18, %v1207_v51  ;;  %v2109_v19 = vld [vmem:[%s2488_s6 + $0x7b] sm:$0xff]  ;;  %v2110_v58 = vld [vmem:[%s2488_s6 + $0x83] sm:$0xff]  ;;  %v2111_v18 = vld [vmem:[%s2488_s6 + $0x8b] sm:$0xff] }
 0x1b1   : > { %v1265_v23 = vadd.f32 %v1258_v44, %v1208_v0  ;;  %v1266_v61 = vadd.f32 %v1259_v12, %v1209_v55  ;;  %v1267_v24 = vadd.f32 %v1260_v10, %v1210_v22  ;;  %v1279_v36 = vmul.f32 %v2098_v35, %v1278_v37 }
 0x1b2   : > { %v1280_v1 = vmul.f32 %v2099_v20, %v1278_v37  ;;  %v1281_v50 = vmul.f32 %v2100_v49, %v1278_v37  ;;  %v1282_v6 = vmul.f32 %v2101_v33, %v1278_v37  ;;  %v1283_v47 = vmul.f32 %v2102_v15, %v1278_v37 }
 0x1b3   : > { %v1284_v53 = vmul.f32 %v2103_v42, %v1278_v37  ;;  %v1285_v40 = vmul.f32 %v2104_v56, %v1278_v37  ;;  %v1286_v28 = vadd.f32 %v1279_v36, %v1229_v27  ;;  %v1294_v14 = vstv %s2725_s23  ;;  %s2869_s23 = sld [smem:[#allocation3 + $0x31]] }
 0x1b4   : > { %v1287_v39 = vadd.f32 %v1280_v1, %v1230_v2  ;;  %v1288_v21 = vadd.f32 %v1281_v50, %v1231_v11  ;;  %v1289_v34 = vadd.f32 %v1282_v6, %v1232_v31  ;;  %v1290_v51 = vadd.f32 %v1283_v47, %v1233_v43 }
 0x1b5   : > { %v1291_v52 = vadd.f32 %v1284_v53, %v1234_v46  ;;  %v1292_v0 = vadd.f32 %v1285_v40, %v1235_v17  ;;  %v1295_v55 = vmul.f32 %v2098_v35, %v1294_v14  ;;  %v1296_v22 = vmul.f32 %v2099_v20, %v1294_v14 }
 0x1b6   : > { %v1297_v9 = vmul.f32 %v2100_v49, %v1294_v14  ;;  %v1298_v60 = vmul.f32 %v2101_v33, %v1294_v14  ;;  %v1299_v62 = vmul.f32 %v2102_v15, %v1294_v14  ;;  %v1300_v4 = vmul.f32 %v2103_v42, %v1294_v14 }
 0x1b7   : > { %v1301_v27 = vmul.f32 %v2104_v56, %v1294_v14  ;;  %v1302_v57 = vadd.f32 %v1295_v55, %v1245_v54  ;;  %v1303_v13 = vadd.f32 %v1296_v22, %v1246_v5  ;;  %v1310_v2 = vstv %s2734_s24  ;;  %s2876_s24 = sld [smem:[#allocation3 + $0x4a]] }
 0x1b8   : > { %v1304_v11 = vadd.f32 %v1297_v9, %v1247_v7  ;;  %v1305_v31 = vadd.f32 %v1298_v60, %v1248_v32  ;;  %v1306_v43 = vadd.f32 %v1299_v62, %v1249_v41  ;;  %v1307_v46 = vadd.f32 %v1300_v4, %v1250_v48  ;;  %v2112_v48 = vld [vmem:[%s2488_s6 + $0x93] sm:$0xff]  ;;  %v2118_v4 = vld [vmem:[%s2488_s6 + $0xe3] sm:$0xff] }
 0x1b9   : > { %v1308_v17 = vadd.f32 %v1301_v27, %v1251_v25  ;;  %v1311_v29 = vmul.f32 %v2098_v35, %v1310_v2  ;;  %v1312_v8 = vmul.f32 %v2099_v20, %v1310_v2  ;;  %v1313_v63 = vmul.f32 %v2100_v49, %v1310_v2  ;;  %v2113_v25 = vld [vmem:[%s2488_s6 + $0x9b] sm:$0xff]  ;;  %v2114_v35 = vld [vmem:[%s2488_s6 + $0xa3] sm:$0x3f] }
 0x1ba   : > { %v1314_v26 = vmul.f32 %v2101_v33, %v1310_v2  ;;  %v1315_v54 = vmul.f32 %v2102_v15, %v1310_v2  ;;  %v1316_v38 = vmul.f32 %v2103_v42, %v1310_v2  ;;  %v1317_v5 = vmul.f32 %v2104_v56, %v1310_v2 }
 0x1bb   : > { %v1318_v7 = vadd.f32 %v1311_v29, %v1261_v59  ;;  %v1319_v32 = vadd.f32 %v1312_v8, %v1262_v45  ;;  %v1320_v41 = vadd.f32 %v1313_v63, %v1263_v3  ;;  %v1335_v20 = vstv %s2739_s25  ;;  %v2119_v8 = vld [vmem:[%s2488_s6 + $0xeb] sm:$0xff]  ;;  %v2120_v63 = vld [vmem:[%s2488_s6 + $0xf3] sm:$0xff] }
 0x1bc   : > { %v1321_v44 = vadd.f32 %v1314_v26, %v1264_v16  ;;  %v1322_v12 = vadd.f32 %v1315_v54, %v1265_v23  ;;  %v1323_v10 = vadd.f32 %v1316_v38, %v1266_v61  ;;  %v1324_v49 = vadd.f32 %v1317_v5, %v1267_v24  ;;  %v2121_v26 = vld [vmem:[%s2488_s6 + $0xfb] sm:$0xff] }
 0x1bd   : > { %v1336_v33 = vmul.f32 %v2108_v30, %v1335_v20  ;;  %v1337_v15 = vmul.f32 %v2109_v19, %v1335_v20  ;;  %v1338_v37 = vmul.f32 %v2110_v58, %v1335_v20  ;;  %v1339_v42 = vmul.f32 %v2111_v18, %v1335_v20 }
 0x1be   : > { %v1340_v56 = vmul.f32 %v2112_v48, %v1335_v20  ;;  %v1341_v36 = vmul.f32 %v2113_v25, %v1335_v20  ;;  %v1342_v1 = vmul.f32 %v2114_v35, %v1335_v20  ;;  %v1351_v50 = vstv %s2741_s26 }
 0x1bf   : > { %v1343_v59 = vadd.f32 %v1336_v33, %v1286_v28  ;;  %v1344_v45 = vadd.f32 %v1337_v15, %v1287_v39  ;;  %v1345_v3 = vadd.f32 %v1338_v37, %v1288_v21  ;;  %v1346_v6 = vadd.f32 %v1339_v42, %v1289_v34 }
 0x1c0   : > { %v1347_v47 = vadd.f32 %v1340_v56, %v1290_v51  ;;  %v1348_v16 = vadd.f32 %v1341_v36, %v1291_v52  ;;  %v1349_v23 = vadd.f32 %v1342_v1, %v1292_v0  ;;  %v1352_v61 = vmul.f32 %v2108_v30, %v1351_v50 }
 0x1c1   : > { %v1353_v24 = vmul.f32 %v2109_v19, %v1351_v50  ;;  %v1354_v53 = vmul.f32 %v2110_v58, %v1351_v50  ;;  %v1355_v40 = vmul.f32 %v2111_v18, %v1351_v50  ;;  %v1356_v14 = vmul.f32 %v2112_v48, %v1351_v50 }
 0x1c2   : > { %v1357_v55 = vmul.f32 %v2113_v25, %v1351_v50  ;;  %v1358_v22 = vmul.f32 %v2114_v35, %v1351_v50  ;;  %v1359_v9 = vadd.f32 %v1352_v61, %v1302_v57  ;;  %v1367_v60 = vstv %s2748_s27  ;;  %s2888_s27 = scalar_lea.vmem %s2935_s2, %s413_s5 }
 0x1c3   : > { %v1360_v28 = vadd.f32 %v1353_v24, %v1303_v13  ;;  %v1361_v39 = vadd.f32 %v1354_v53, %v1304_v11  ;;  %v1362_v21 = vadd.f32 %v1355_v40, %v1305_v31  ;;  %v1363_v34 = vadd.f32 %v1356_v14, %v1306_v43  ;;  %v2122_v43 = vld [vmem:[%s2488_s6 + $0x103] sm:$0xff] }
 0x1c4   : > { %v1364_v51 = vadd.f32 %v1357_v55, %v1307_v46  ;;  %v1365_v52 = vadd.f32 %v1358_v22, %v1308_v17  ;;  %v1368_v0 = vmul.f32 %v2108_v30, %v1367_v60  ;;  %v1369_v62 = vmul.f32 %v2109_v19, %v1367_v60  ;;  %v2123_v46 = vld [vmem:[%s2488_s6 + $0x10b] sm:$0xff]  ;;  %v2124_v17 = vld [vmem:[%s2488_s6 + $0x113] sm:$0x3f] }
 0x1c5   : > { %v1370_v27 = vmul.f32 %v2110_v58, %v1367_v60  ;;  %v1371_v57 = vmul.f32 %v2111_v18, %v1367_v60  ;;  %v1372_v2 = vmul.f32 %v2112_v48, %v1367_v60  ;;  %v1373_v29 = vmul.f32 %v2113_v25, %v1367_v60 }
 0x1c6   : > { %v1374_v13 = vmul.f32 %v2114_v35, %v1367_v60  ;;  %v1375_v11 = vadd.f32 %v1368_v0, %v1318_v7  ;;  %v1376_v31 = vadd.f32 %v1369_v62, %v1319_v32  ;;  %v1392_v30 = vstv %s2755_s1  ;;  %v2128_v0 = vld [vmem:[%s2488_s6 + $0x153] sm:$0xff]  ;;  %v2129_v62 = vld [vmem:[%s2488_s6 + $0x15b] sm:$0xff] }
 0x1c7   : > { %v1377_v54 = vadd.f32 %v1370_v27, %v1320_v41  ;;  %v1378_v38 = vadd.f32 %v1371_v57, %v1321_v44  ;;  %v1379_v5 = vadd.f32 %v1372_v2, %v1322_v12  ;;  %v1380_v19 = vadd.f32 %v1373_v29, %v1323_v10  ;;  %v2130_v27 = vld [vmem:[%s2488_s6 + $0x163] sm:$0xff]  ;;  %v2131_v57 = vld [vmem:[%s2488_s6 + $0x16b] sm:$0xff]  ;;  %v2133_v2 = vld [vmem:[%s2488_s6 + $0x17b] sm:$0xff] }
 0x1c8   : > { %v1381_v58 = vadd.f32 %v1374_v13, %v1324_v49  ;;  %v1393_v18 = vmul.f32 %v2118_v4, %v1392_v30  ;;  %v1394_v48 = vmul.f32 %v2119_v8, %v1392_v30  ;;  %v1395_v25 = vmul.f32 %v2120_v63, %v1392_v30 }
 0x1c9   : > { %v1396_v20 = vmul.f32 %v2121_v26, %v1392_v30  ;;  %v1397_v33 = vmul.f32 %v2122_v43, %v1392_v30  ;;  %v1398_v15 = vmul.f32 %v2123_v46, %v1392_v30  ;;  %v1399_v37 = vmul.f32 %v2124_v17, %v1392_v30 }
 0x1ca   : > { %v1400_v7 = vadd.f32 %v1393_v18, %v1343_v59  ;;  %v1401_v32 = vadd.f32 %v1394_v48, %v1344_v45  ;;  %v1402_v35 = vadd.f32 %v1395_v25, %v1345_v3  ;;  %v1408_v42 = vstv %s2758_s28 }
 0x1cb   : > { %v1403_v41 = vadd.f32 %v1396_v20, %v1346_v6  ;;  %v1404_v56 = vadd.f32 %v1397_v33, %v1347_v47  ;;  %v1405_v44 = vadd.f32 %v1398_v15, %v1348_v16  ;;  %v1406_v12 = vadd.f32 %v1399_v37, %v1349_v23 }
 0x1cc   : > { %v1409_v10 = vmul.f32 %v2118_v4, %v1408_v42  ;;  %v1410_v49 = vmul.f32 %v2119_v8, %v1408_v42  ;;  %v1411_v36 = vmul.f32 %v2120_v63, %v1408_v42  ;;  %v1412_v1 = vmul.f32 %v2121_v26, %v1408_v42 }
 0x1cd   : > { %v1413_v50 = vmul.f32 %v2122_v43, %v1408_v42  ;;  %v1414_v61 = vmul.f32 %v2123_v46, %v1408_v42  ;;  %v1415_v24 = vmul.f32 %v2124_v17, %v1408_v42  ;;  %v1424_v53 = vstv %s2764_s29 }
 0x1ce   : > { %v1416_v59 = vadd.f32 %v1409_v10, %v1359_v9  ;;  %v1417_v45 = vadd.f32 %v1410_v49, %v1360_v28  ;;  %v1418_v3 = vadd.f32 %v1411_v36, %v1361_v39  ;;  %v1419_v6 = vadd.f32 %v1412_v1, %v1362_v21  ;;  %v2132_v21 = vld [vmem:[%s2488_s6 + $0x173] sm:$0xff] }
 0x1cf   : > { %v1420_v47 = vadd.f32 %v1413_v50, %v1363_v34  ;;  %v1421_v16 = vadd.f32 %v1414_v61, %v1364_v51  ;;  %v1422_v23 = vadd.f32 %v1415_v24, %v1365_v52  ;;  %v1425_v40 = vmul.f32 %v2118_v4, %v1424_v53 }
 0x1d0   : > { %v1426_v14 = vmul.f32 %v2119_v8, %v1424_v53  ;;  %v1427_v55 = vmul.f32 %v2120_v63, %v1424_v53  ;;  %v1428_v22 = vmul.f32 %v2121_v26, %v1424_v53  ;;  %v1429_v60 = vmul.f32 %v2122_v43, %v1424_v53  ;;  %v2134_v8 = vld [vmem:[%s2488_s6 + $0x183] sm:$0x3f] }
 0x1d1   : > { %v1430_v9 = vmul.f32 %v2123_v46, %v1424_v53  ;;  %v1431_v28 = vmul.f32 %v2124_v17, %v1424_v53  ;;  %v1432_v39 = vadd.f32 %v1425_v40, %v1375_v11  ;;  %v1449_v34 = vstv %s2770_s3  ;;  %v2138_v53 = vld [vmem:[%s2488_s6 + $0x1c3] sm:$0xff]  ;;  %v2139_v40 = vld [vmem:[%s2488_s6 + $0x1cb] sm:$0xff] }
 0x1d2   : > { %v1433_v51 = vadd.f32 %v1426_v14, %v1376_v31  ;;  %v1434_v52 = vadd.f32 %v1427_v55, %v1377_v54  ;;  %v1435_v4 = vadd.f32 %v1428_v22, %v1378_v38  ;;  %v1436_v29 = vadd.f32 %v1429_v60, %v1379_v5  ;;  %v2141_v55 = vld [vmem:[%s2488_s6 + $0x1db] sm:$0xff]  ;;  %v2142_v22 = vld [vmem:[%s2488_s6 + $0x1e3] sm:$0xff] }
 0x1d3   : > { %v1437_v63 = vadd.f32 %v1430_v9, %v1380_v19  ;;  %v1438_v26 = vadd.f32 %v1431_v28, %v1381_v58  ;;  %v1450_v13 = vmul.f32 %v2128_v0, %v1449_v34  ;;  %v1451_v43 = vmul.f32 %v2129_v62, %v1449_v34 }
 0x1d4   : > { %v1452_v30 = vmul.f32 %v2130_v27, %v1449_v34  ;;  %v1453_v46 = vmul.f32 %v2131_v57, %v1449_v34  ;;  %v1454_v17 = vmul.f32 %v2132_v21, %v1449_v34  ;;  %v1455_v11 = vmul.f32 %v2133_v2, %v1449_v34 }
 0x1d5   : > { %v1456_v18 = vmul.f32 %v2134_v8, %v1449_v34  ;;  %v1457_v48 = vadd.f32 %v1450_v13, %v1400_v7  ;;  %v1458_v25 = vadd.f32 %v1451_v43, %v1401_v32  ;;  %v1465_v20 = vstv %s2774_s4 }
 0x1d6   : > { %v1459_v31 = vadd.f32 %v1452_v30, %v1402_v35  ;;  %v1460_v54 = vadd.f32 %v1453_v46, %v1403_v41  ;;  %v1461_v38 = vadd.f32 %v1454_v17, %v1404_v56  ;;  %v1462_v5 = vadd.f32 %v1455_v11, %v1405_v44 }
 0x1d7   : > { %v1463_v33 = vadd.f32 %v1456_v18, %v1406_v12  ;;  %v1466_v19 = vmul.f32 %v2128_v0, %v1465_v20  ;;  %v1467_v58 = vmul.f32 %v2129_v62, %v1465_v20  ;;  %v1468_v15 = vmul.f32 %v2130_v27, %v1465_v20 }
 0x1d8   : > { %v1469_v37 = vmul.f32 %v2131_v57, %v1465_v20  ;;  %v1470_v42 = vmul.f32 %v2132_v21, %v1465_v20  ;;  %v1471_v10 = vmul.f32 %v2133_v2, %v1465_v20  ;;  %v1472_v49 = vmul.f32 %v2134_v8, %v1465_v20 }
 0x1d9   : > { %v1473_v7 = vadd.f32 %v1466_v19, %v1416_v59  ;;  %v1474_v32 = vadd.f32 %v1467_v58, %v1417_v45  ;;  %v1475_v35 = vadd.f32 %v1468_v15, %v1418_v3  ;;  %v1481_v41 = vstv %s2783_s7  ;;  %v2140_v3 = vld [vmem:[%s2488_s6 + $0x1d3] sm:$0xff] }
 0x1da   : > { %v1476_v56 = vadd.f32 %v1469_v37, %v1419_v6  ;;  %v1477_v44 = vadd.f32 %v1470_v42, %v1420_v47  ;;  %v1478_v12 = vadd.f32 %v1471_v10, %v1421_v16  ;;  %v1479_v36 = vadd.f32 %v1472_v49, %v1422_v23  ;;  %v2148_v49 = vld [vmem:[%s2488_s6 + $0x4] sm:$0xff] }
 0x1db   : > { %v1482_v1 = vmul.f32 %v2128_v0, %v1481_v41  ;;  %v1483_v50 = vmul.f32 %v2129_v62, %v1481_v41  ;;  %v1484_v61 = vmul.f32 %v2130_v27, %v1481_v41  ;;  %v1485_v24 = vmul.f32 %v2131_v57, %v1481_v41  ;;  %v2143_v0 = vld [vmem:[%s2488_s6 + $0x1eb] sm:$0xff]  ;;  %v2144_v62 = vld [vmem:[%s2488_s6 + $0x1f3] sm:$0x3f] }
 0x1dc   : > { %v1486_v59 = vmul.f32 %v2132_v21, %v1481_v41  ;;  %v1487_v45 = vmul.f32 %v2133_v2, %v1481_v41  ;;  %v1488_v14 = vmul.f32 %v2134_v8, %v1481_v41  ;;  %v1506_v60 = vstv %s2786_s8 }
 0x1dd   : > { %v1489_v6 = vadd.f32 %v1482_v1, %v1432_v39  ;;  %v1490_v47 = vadd.f32 %v1483_v50, %v1433_v51  ;;  %v1491_v16 = vadd.f32 %v1484_v61, %v1434_v52  ;;  %v1492_v23 = vadd.f32 %v1485_v24, %v1435_v4  ;;  %v2149_v50 = vld [vmem:[%s2488_s6 + $0xc] sm:$0xff]  ;;  %v2150_v61 = vld [vmem:[%s2488_s6 + $0x14] sm:$0xff]  ;;  %v2151_v24 = vld [vmem:[%s2488_s6 + $0x1c] sm:$0xff] }
 0x1de   : > { %v1493_v27 = vadd.f32 %v1486_v59, %v1436_v29  ;;  %v1494_v9 = vadd.f32 %v1487_v45, %v1437_v63  ;;  %v1495_v28 = vadd.f32 %v1488_v14, %v1438_v26  ;;  %v1507_v57 = vmul.f32 %v2138_v53, %v1506_v60 }
 0x1df   : > { %v1508_v21 = vmul.f32 %v2139_v40, %v1506_v60  ;;  %v1509_v2 = vmul.f32 %v2140_v3, %v1506_v60  ;;  %v1510_v34 = vmul.f32 %v2141_v55, %v1506_v60  ;;  %v1511_v8 = vmul.f32 %v2142_v22, %v1506_v60 }
 0x1e0   : > { %v1512_v13 = vmul.f32 %v2143_v0, %v1506_v60  ;;  %v1513_v43 = vmul.f32 %v2144_v62, %v1506_v60  ;;  %v1514_v30 = vadd.f32 %v1507_v57, %v1457_v48  ;;  %v1522_v46 = vstv %s2789_s9 }
 0x1e1   : > { %v1515_v39 = vadd.f32 %v1508_v21, %v1458_v25  ;;  %v1516_v51 = vadd.f32 %v1509_v2, %v1459_v31  ;;  %v1517_v52 = vadd.f32 %v1510_v34, %v1460_v54  ;;  %v1518_v4 = vadd.f32 %v1511_v8, %v1461_v38 }
 0x1e2   : > { %v1519_v17 = vadd.f32 %v1512_v13, %v1462_v5  ;;  %v1520_v29 = vadd.f32 %v1513_v43, %v1463_v33  ;;  %v1523_v63 = vmul.f32 %v2138_v53, %v1522_v46  ;;  %v1524_v26 = vmul.f32 %v2139_v40, %v1522_v46 }
 0x1e3   : > { %v1525_v11 = vmul.f32 %v2140_v3, %v1522_v46  ;;  %v1526_v18 = vmul.f32 %v2141_v55, %v1522_v46  ;;  %v1527_v20 = vmul.f32 %v2142_v22, %v1522_v46  ;;  %v1528_v19 = vmul.f32 %v2143_v0, %v1522_v46 }
 0x1e4   : > { %v1529_v48 = vmul.f32 %v2144_v62, %v1522_v46  ;;  %v1530_v58 = vadd.f32 %v1523_v63, %v1473_v7  ;;  %v1531_v15 = vadd.f32 %v1524_v26, %v1474_v32  ;;  %v1538_v25 = vstv %s2798_s10 }
 0x1e5   : > { %v1532_v31 = vadd.f32 %v1525_v11, %v1475_v35  ;;  %v1533_v54 = vadd.f32 %v1526_v18, %v1476_v56  ;;  %v1534_v38 = vadd.f32 %v1527_v20, %v1477_v44  ;;  %v1535_v5 = vadd.f32 %v1528_v19, %v1478_v12  ;;  %v2152_v12 = vld [vmem:[%s2488_s6 + $0x24] sm:$0xff]  ;;  %v2158_v19 = vld [vmem:[%s2488_s6 + $0x74] sm:$0xff] }
 0x1e6   : > { %v1536_v33 = vadd.f32 %v1529_v48, %v1479_v36  ;;  %v1539_v37 = vmul.f32 %v2138_v53, %v1538_v25  ;;  %v1540_v42 = vmul.f32 %v2139_v40, %v1538_v25  ;;  %v1541_v10 = vmul.f32 %v2140_v3, %v1538_v25  ;;  %v2153_v36 = vld [vmem:[%s2488_s6 + $0x2c] sm:$0xff]  ;;  %v2154_v53 = vld [vmem:[%s2488_s6 + $0x34] sm:$0x3f] }
 0x1e7   : > { %v1542_v41 = vmul.f32 %v2141_v55, %v1538_v25  ;;  %v1543_v7 = vmul.f32 %v2142_v22, %v1538_v25  ;;  %v1544_v1 = vmul.f32 %v2143_v0, %v1538_v25  ;;  %v1545_v32 = vmul.f32 %v2144_v62, %v1538_v25 }
 0x1e8   : > { %v1546_v35 = vadd.f32 %v1539_v37, %v1489_v6  ;;  %v1547_v56 = vadd.f32 %v1540_v42, %v1490_v47  ;;  %v1548_v44 = vadd.f32 %v1541_v10, %v1491_v16  ;;  %v1563_v40 = vstv %s2803_s11  ;;  %v2159_v42 = vld [vmem:[%s2488_s6 + $0x7c] sm:$0xff]  ;;  %v2160_v10 = vld [vmem:[%s2488_s6 + $0x84] sm:$0xff] }
 0x1e9   : > { %v1549_v59 = vadd.f32 %v1542_v41, %v1492_v23  ;;  %v1550_v45 = vadd.f32 %v1543_v7, %v1493_v27  ;;  %v1551_v14 = vadd.f32 %v1544_v1, %v1494_v9  ;;  %v1552_v3 = vadd.f32 %v1545_v32, %v1495_v28  ;;  %v2161_v41 = vld [vmem:[%s2488_s6 + $0x8c] sm:$0xff] }
 0x1ea   : > { %v1564_v55 = vmul.f32 %v2148_v49, %v1563_v40  ;;  %v1565_v22 = vmul.f32 %v2149_v50, %v1563_v40  ;;  %v1566_v60 = vmul.f32 %v2150_v61, %v1563_v40  ;;  %v1567_v0 = vmul.f32 %v2151_v24, %v1563_v40 }
 0x1eb   : > { %v1568_v62 = vmul.f32 %v2152_v12, %v1563_v40  ;;  %v1569_v57 = vmul.f32 %v2153_v36, %v1563_v40  ;;  %v1570_v21 = vmul.f32 %v2154_v53, %v1563_v40  ;;  %v1579_v2 = vstv %s2805_s12 }
 0x1ec   : > { %v1571_v6 = vadd.f32 %v1564_v55, %v1514_v30  ;;  %v1572_v47 = vadd.f32 %v1565_v22, %v1515_v39  ;;  %v1573_v16 = vadd.f32 %v1566_v60, %v1516_v51  ;;  %v1574_v34 = vadd.f32 %v1567_v0, %v1517_v52 }
 0x1ed   : > { %v1575_v8 = vadd.f32 %v1568_v62, %v1518_v4  ;;  %v1576_v23 = vadd.f32 %v1569_v57, %v1519_v17  ;;  %v1577_v27 = vadd.f32 %v1570_v21, %v1520_v29  ;;  %v1580_v9 = vmul.f32 %v2148_v49, %v1579_v2 }
 0x1ee   : > { %v1581_v28 = vmul.f32 %v2149_v50, %v1579_v2  ;;  %v1582_v13 = vmul.f32 %v2150_v61, %v1579_v2  ;;  %v1583_v43 = vmul.f32 %v2151_v24, %v1579_v2  ;;  %v1584_v46 = vmul.f32 %v2152_v12, %v1579_v2 }
 0x1ef   : > { %v1585_v63 = vmul.f32 %v2153_v36, %v1579_v2  ;;  %v1586_v26 = vmul.f32 %v2154_v53, %v1579_v2  ;;  %v1587_v11 = vadd.f32 %v1580_v9, %v1530_v58  ;;  %v1595_v18 = vstv %s2812_s13 }
 0x1f0   : > { %v1588_v30 = vadd.f32 %v1581_v28, %v1531_v15  ;;  %v1589_v39 = vadd.f32 %v1582_v13, %v1532_v31  ;;  %v1590_v51 = vadd.f32 %v1583_v43, %v1533_v54  ;;  %v1591_v52 = vadd.f32 %v1584_v46, %v1534_v38  ;;  %v2162_v38 = vld [vmem:[%s2488_s6 + $0x94] sm:$0xff] }
 0x1f1   : > { %v1592_v4 = vadd.f32 %v1585_v63, %v1535_v5  ;;  %v1593_v17 = vadd.f32 %v1586_v26, %v1536_v33  ;;  %v1596_v29 = vmul.f32 %v2148_v49, %v1595_v18  ;;  %v1597_v20 = vmul.f32 %v2149_v50, %v1595_v18  ;;  %v2163_v5 = vld [vmem:[%s2488_s6 + $0x9c] sm:$0xff]  ;;  %v2164_v33 = vld [vmem:[%s2488_s6 + $0xa4] sm:$0x3f] }
 0x1f2   : > { %v1598_v48 = vmul.f32 %v2150_v61, %v1595_v18  ;;  %v1599_v58 = vmul.f32 %v2151_v24, %v1595_v18  ;;  %v1600_v25 = vmul.f32 %v2152_v12, %v1595_v18  ;;  %v1601_v37 = vmul.f32 %v2153_v36, %v1595_v18 }
 0x1f3   : > { %v1602_v15 = vmul.f32 %v2154_v53, %v1595_v18  ;;  %v1603_v31 = vadd.f32 %v1596_v29, %v1546_v35  ;;  %v1604_v54 = vadd.f32 %v1597_v20, %v1547_v56  ;;  %v1620_v49 = vstv %s2819_s14  ;;  %v2168_v29 = vld [vmem:[%s2488_s6 + $0xe4] sm:$0xff]  ;;  %v2169_v20 = vld [vmem:[%s2488_s6 + $0xec] sm:$0xff] }
 0x1f4   : > { %v1605_v7 = vadd.f32 %v1598_v48, %v1548_v44  ;;  %v1606_v1 = vadd.f32 %v1599_v58, %v1549_v59  ;;  %v1607_v32 = vadd.f32 %v1600_v25, %v1550_v45  ;;  %v1608_v50 = vadd.f32 %v1601_v37, %v1551_v14  ;;  %v2170_v48 = vld [vmem:[%s2488_s6 + $0xf4] sm:$0xff]  ;;  %v2171_v58 = vld [vmem:[%s2488_s6 + $0xfc] sm:$0xff]  ;;  %v2173_v25 = vld [vmem:[%s2488_s6 + $0x10c] sm:$0xff] }
 0x1f5   : > { %v1609_v61 = vadd.f32 %v1602_v15, %v1552_v3  ;;  %v1621_v24 = vmul.f32 %v2158_v19, %v1620_v49  ;;  %v1622_v12 = vmul.f32 %v2159_v42, %v1620_v49  ;;  %v1623_v36 = vmul.f32 %v2160_v10, %v1620_v49 }
 0x1f6   : > { %v1624_v40 = vmul.f32 %v2161_v41, %v1620_v49  ;;  %v1625_v55 = vmul.f32 %v2162_v38, %v1620_v49  ;;  %v1626_v22 = vmul.f32 %v2163_v5, %v1620_v49  ;;  %v1627_v60 = vmul.f32 %v2164_v33, %v1620_v49 }
 0x1f7   : > { %v1628_v35 = vadd.f32 %v1621_v24, %v1571_v6  ;;  %v1629_v56 = vadd.f32 %v1622_v12, %v1572_v47  ;;  %v1630_v53 = vadd.f32 %v1623_v36, %v1573_v16  ;;  %v1636_v0 = vstv %s2822_s15 }
 0x1f8   : > { %v1631_v44 = vadd.f32 %v1624_v40, %v1574_v34  ;;  %v1632_v62 = vadd.f32 %v1625_v55, %v1575_v8  ;;  %v1633_v59 = vadd.f32 %v1626_v22, %v1576_v23  ;;  %v1634_v45 = vadd.f32 %v1627_v60, %v1577_v27 }
 0x1f9   : > { %v1637_v14 = vmul.f32 %v2158_v19, %v1636_v0  ;;  %v1638_v3 = vmul.f32 %v2159_v42, %v1636_v0  ;;  %v1639_v57 = vmul.f32 %v2160_v10, %v1636_v0  ;;  %v1640_v21 = vmul.f32 %v2161_v41, %v1636_v0 }
 0x1fa   : > { %v1641_v2 = vmul.f32 %v2162_v38, %v1636_v0  ;;  %v1642_v9 = vmul.f32 %v2163_v5, %v1636_v0  ;;  %v1643_v28 = vmul.f32 %v2164_v33, %v1636_v0  ;;  %v1652_v13 = vstv %s2828_s16 }
 0x1fb   : > { %v1644_v6 = vadd.f32 %v1637_v14, %v1587_v11  ;;  %v1645_v47 = vadd.f32 %v1638_v3, %v1588_v30  ;;  %v1646_v16 = vadd.f32 %v1639_v57, %v1589_v39  ;;  %v1647_v34 = vadd.f32 %v1640_v21, %v1590_v51  ;;  %v2172_v51 = vld [vmem:[%s2488_s6 + $0x104] sm:$0xff] }
 0x1fc   : > { %v1648_v8 = vadd.f32 %v1641_v2, %v1591_v52  ;;  %v1649_v23 = vadd.f32 %v1642_v9, %v1592_v4  ;;  %v1650_v27 = vadd.f32 %v1643_v28, %v1593_v17  ;;  %v1653_v43 = vmul.f32 %v2158_v19, %v1652_v13 }
 0x1fd   : > { %v1654_v46 = vmul.f32 %v2159_v42, %v1652_v13  ;;  %v1655_v63 = vmul.f32 %v2160_v10, %v1652_v13  ;;  %v1656_v26 = vmul.f32 %v2161_v41, %v1652_v13  ;;  %v1657_v18 = vmul.f32 %v2162_v38, %v1652_v13  ;;  %v2174_v42 = vld [vmem:[%s2488_s6 + $0x114] sm:$0x3f] }
 0x1fe   : > { %v1658_v11 = vmul.f32 %v2163_v5, %v1652_v13  ;;  %v1659_v30 = vmul.f32 %v2164_v33, %v1652_v13  ;;  %v1660_v39 = vadd.f32 %v1653_v43, %v1603_v31  ;;  %v1677_v52 = vstv %s2834_s17  ;;  %v2178_v13 = vld [vmem:[%s2488_s6 + $0x154] sm:$0xff]  ;;  %v2179_v43 = vld [vmem:[%s2488_s6 + $0x15c] sm:$0xff] }
 0x1ff   : > { %v1661_v4 = vadd.f32 %v1654_v46, %v1604_v54  ;;  %v1662_v17 = vadd.f32 %v1655_v63, %v1605_v7  ;;  %v1663_v19 = vadd.f32 %v1656_v26, %v1606_v1  ;;  %v1664_v37 = vadd.f32 %v1657_v18, %v1607_v32  ;;  %v2181_v63 = vld [vmem:[%s2488_s6 + $0x16c] sm:$0xff]  ;;  %v2182_v26 = vld [vmem:[%s2488_s6 + $0x174] sm:$0xff] }
 0x200   : > { %v1665_v10 = vadd.f32 %v1658_v11, %v1608_v50  ;;  %v1666_v41 = vadd.f32 %v1659_v30, %v1609_v61  ;;  %v1678_v15 = vmul.f32 %v2168_v29, %v1677_v52  ;;  %v1679_v38 = vmul.f32 %v2169_v20, %v1677_v52 }
 0x201   : > { %v1680_v49 = vmul.f32 %v2170_v48, %v1677_v52  ;;  %v1681_v5 = vmul.f32 %v2171_v58, %v1677_v52  ;;  %v1682_v33 = vmul.f32 %v2172_v51, %v1677_v52  ;;  %v1683_v31 = vmul.f32 %v2173_v25, %v1677_v52 }
 0x202   : > { %v1684_v24 = vmul.f32 %v2174_v42, %v1677_v52  ;;  %v1685_v12 = vadd.f32 %v1678_v15, %v1628_v35  ;;  %v1686_v36 = vadd.f32 %v1679_v38, %v1629_v56  ;;  %v1693_v40 = vstv %s2838_s18 }
 0x203   : > { %v1687_v54 = vadd.f32 %v1680_v49, %v1630_v53  ;;  %v1688_v7 = vadd.f32 %v1681_v5, %v1631_v44  ;;  %v1689_v1 = vadd.f32 %v1682_v33, %v1632_v62  ;;  %v1690_v32 = vadd.f32 %v1683_v31, %v1633_v59 }
 0x204   : > { %v1691_v55 = vadd.f32 %v1684_v24, %v1634_v45  ;;  %v1694_v50 = vmul.f32 %v2168_v29, %v1693_v40  ;;  %v1695_v61 = vmul.f32 %v2169_v20, %v1693_v40  ;;  %v1696_v22 = vmul.f32 %v2170_v48, %v1693_v40 }
 0x205   : > { %v1697_v60 = vmul.f32 %v2171_v58, %v1693_v40  ;;  %v1698_v0 = vmul.f32 %v2172_v51, %v1693_v40  ;;  %v1699_v14 = vmul.f32 %v2173_v25, %v1693_v40  ;;  %v1700_v3 = vmul.f32 %v2174_v42, %v1693_v40 }
 0x206   : > { %v1701_v35 = vadd.f32 %v1694_v50, %v1644_v6  ;;  %v1702_v56 = vadd.f32 %v1695_v61, %v1645_v47  ;;  %v1703_v53 = vadd.f32 %v1696_v22, %v1646_v16  ;;  %v1709_v44 = vstv %s2847_s19  ;;  %v2180_v16 = vld [vmem:[%s2488_s6 + $0x164] sm:$0xff] }
 0x207   : > { %v1704_v62 = vadd.f32 %v1697_v60, %v1647_v34  ;;  %v1705_v59 = vadd.f32 %v1698_v0, %v1648_v8  ;;  %v1706_v45 = vadd.f32 %v1699_v14, %v1649_v23  ;;  %v1707_v57 = vadd.f32 %v1700_v3, %v1650_v27  ;;  %v2188_v3 = vld [vmem:[%s2488_s6 + $0x1c4] sm:$0xff] }
 0x208   : > { %v1710_v21 = vmul.f32 %v2168_v29, %v1709_v44  ;;  %v1711_v2 = vmul.f32 %v2169_v20, %v1709_v44  ;;  %v1712_v9 = vmul.f32 %v2170_v48, %v1709_v44  ;;  %v1713_v28 = vmul.f32 %v2171_v58, %v1709_v44  ;;  %v2183_v29 = vld [vmem:[%s2488_s6 + $0x17c] sm:$0xff]  ;;  %v2184_v20 = vld [vmem:[%s2488_s6 + $0x184] sm:$0x3f] }
 0x209   : > { %v1714_v6 = vmul.f32 %v2172_v51, %v1709_v44  ;;  %v1715_v47 = vmul.f32 %v2173_v25, %v1709_v44  ;;  %v1716_v46 = vmul.f32 %v2174_v42, %v1709_v44  ;;  %v1734_v18 = vstv %s2850_s0 }
 0x20a   : > { %v1717_v34 = vadd.f32 %v1710_v21, %v1660_v39  ;;  %v1718_v8 = vadd.f32 %v1711_v2, %v1661_v4  ;;  %v1719_v23 = vadd.f32 %v1712_v9, %v1662_v17  ;;  %v1720_v27 = vadd.f32 %v1713_v28, %v1663_v19  ;;  %v2189_v2 = vld [vmem:[%s2488_s6 + $0x1cc] sm:$0xff]  ;;  %v2190_v9 = vld [vmem:[%s2488_s6 + $0x1d4] sm:$0xff]  ;;  %v2191_v28 = vld [vmem:[%s2488_s6 + $0x1dc] sm:$0xff] }
 0x20b   : > { %v1721_v48 = vadd.f32 %v1714_v6, %v1664_v37  ;;  %v1722_v11 = vadd.f32 %v1715_v47, %v1665_v10  ;;  %v1723_v30 = vadd.f32 %v1716_v46, %v1666_v41  ;;  %v1735_v58 = vmul.f32 %v2178_v13, %v1734_v18 }
 0x20c   : > { %v1736_v51 = vmul.f32 %v2179_v43, %v1734_v18  ;;  %v1737_v25 = vmul.f32 %v2180_v16, %v1734_v18  ;;  %v1738_v52 = vmul.f32 %v2181_v63, %v1734_v18  ;;  %v1739_v42 = vmul.f32 %v2182_v26, %v1734_v18 }
 0x20d   : > { %v1740_v15 = vmul.f32 %v2183_v29, %v1734_v18  ;;  %v1741_v38 = vmul.f32 %v2184_v20, %v1734_v18  ;;  %v1742_v49 = vadd.f32 %v1735_v58, %v1685_v12  ;;  %v1750_v5 = vstv %s2853_s20 }
 0x20e   : > { %v1743_v39 = vadd.f32 %v1736_v51, %v1686_v36  ;;  %v1744_v4 = vadd.f32 %v1737_v25, %v1687_v54  ;;  %v1745_v17 = vadd.f32 %v1738_v52, %v1688_v7  ;;  %v1746_v19 = vadd.f32 %v1739_v42, %v1689_v1 }
 0x20f   : > { %v1747_v33 = vadd.f32 %v1740_v15, %v1690_v32  ;;  %v1748_v37 = vadd.f32 %v1741_v38, %v1691_v55  ;;  %v1751_v10 = vmul.f32 %v2178_v13, %v1750_v5  ;;  %v1752_v41 = vmul.f32 %v2179_v43, %v1750_v5 }
 0x210   : > { %v1753_v31 = vmul.f32 %v2180_v16, %v1750_v5  ;;  %v1754_v24 = vmul.f32 %v2181_v63, %v1750_v5  ;;  %v1755_v40 = vmul.f32 %v2182_v26, %v1750_v5  ;;  %v1756_v50 = vmul.f32 %v2183_v29, %v1750_v5 }
 0x211   : > { %v1757_v12 = vmul.f32 %v2184_v20, %v1750_v5  ;;  %v1758_v61 = vadd.f32 %v1751_v10, %v1701_v35  ;;  %v1759_v22 = vadd.f32 %v1752_v41, %v1702_v56  ;;  %v1766_v36 = vstv %s2862_s21 }
 0x212   : > { %v1760_v54 = vadd.f32 %v1753_v31, %v1703_v53  ;;  %v1761_v7 = vadd.f32 %v1754_v24, %v1704_v62  ;;  %v1762_v1 = vadd.f32 %v1755_v40, %v1705_v59  ;;  %v1763_v32 = vadd.f32 %v1756_v50, %v1706_v45  ;;  %v2192_v45 = vld [vmem:[%s2488_s6 + $0x1e4] sm:$0xff] }
 0x213   : > { %v1764_v55 = vadd.f32 %v1757_v12, %v1707_v57  ;;  %v1767_v60 = vmul.f32 %v2178_v13, %v1766_v36  ;;  %v1768_v0 = vmul.f32 %v2179_v43, %v1766_v36  ;;  %v1769_v14 = vmul.f32 %v2180_v16, %v1766_v36  ;;  %v2193_v57 = vld [vmem:[%s2488_s6 + $0x1ec] sm:$0xff]  ;;  %v2194_v13 = vld [vmem:[%s2488_s6 + $0x1f4] sm:$0x3f] }
 0x214   : > { %v1770_v44 = vmul.f32 %v2181_v63, %v1766_v36  ;;  %v1771_v35 = vmul.f32 %v2182_v26, %v1766_v36  ;;  %v1772_v21 = vmul.f32 %v2183_v29, %v1766_v36  ;;  %v1773_v56 = vmul.f32 %v2184_v20, %v1766_v36 }
 0x215   : > { %v1774_v53 = vadd.f32 %v1767_v60, %v1717_v34  ;;  %v1775_v62 = vadd.f32 %v1768_v0, %v1718_v8  ;;  %v1776_v59 = vadd.f32 %v1769_v14, %v1719_v23  ;;  %v1791_v43 = vstv %s2867_s22 }
 0x216   : > { %v1777_v6 = vadd.f32 %v1770_v44, %v1720_v27  ;;  %v1778_v47 = vadd.f32 %v1771_v35, %v1721_v48  ;;  %v1779_v46 = vadd.f32 %v1772_v21, %v1722_v11  ;;  %v1780_v16 = vadd.f32 %v1773_v56, %v1723_v30 }
 0x217   : > { %v1792_v63 = vmul.f32 %v2188_v3, %v1791_v43  ;;  %v1793_v26 = vmul.f32 %v2189_v2, %v1791_v43  ;;  %v1794_v18 = vmul.f32 %v2190_v9, %v1791_v43  ;;  %v1795_v29 = vmul.f32 %v2191_v28, %v1791_v43 }
 0x218   : > { %v1796_v20 = vmul.f32 %v2192_v45, %v1791_v43  ;;  %v1797_v58 = vmul.f32 %v2193_v57, %v1791_v43  ;;  %v1798_v51 = vmul.f32 %v2194_v13, %v1791_v43  ;;  %v1807_v34 = vstv %s2869_s23 }
 0x219   : > { %v1799_v8 = vadd.f32 %v1792_v63, %v1742_v49  ;;  %v1800_v23 = vadd.f32 %v1793_v26, %v1743_v39  ;;  %v1801_v27 = vadd.f32 %v1794_v18, %v1744_v4  ;;  %v1802_v48 = vadd.f32 %v1795_v29, %v1745_v17 }
 0x21a   : > { %v1803_v11 = vadd.f32 %v1796_v20, %v1746_v19  ;;  %v1804_v30 = vadd.f32 %v1797_v58, %v1747_v33  ;;  %v1805_v25 = vadd.f32 %v1798_v51, %v1748_v37  ;;  %v1808_v52 = vmul.f32 %v2188_v3, %v1807_v34 }
 0x21b   : > { %v1809_v42 = vmul.f32 %v2189_v2, %v1807_v34  ;;  %v1810_v15 = vmul.f32 %v2190_v9, %v1807_v34  ;;  %v1811_v38 = vmul.f32 %v2191_v28, %v1807_v34  ;;  %v1812_v5 = vmul.f32 %v2192_v45, %v1807_v34  ;;  %1839 = vst.msk [vmem:[%s2888_s27] sm:$0xff] %vm52_vm0, %v1799_v8 }
 0x21c   : > { %1840 = vst.msk [vmem:[%s2888_s27 + $0x8] sm:$0xff] %vm52_vm0, %v1800_v23  ;;  %1841 = vst.msk [vmem:[%s2888_s27 + $0x10] sm:$0xff] %vm52_vm0, %v1801_v27  ;;  %v1813_v49 = vmul.f32 %v2193_v57, %v1807_v34  ;;  %v1814_v39 = vmul.f32 %v2194_v13, %v1807_v34  ;;  %v1815_v4 = vadd.f32 %v1808_v52, %v1758_v61  ;;  %v1823_v17 = vstv %s2876_s24 }
 0x21d   : > { %1842 = vst.msk [vmem:[%s2888_s27 + $0x18] sm:$0xff] %vm52_vm0, %v1802_v48  ;;  %1843 = vst.msk [vmem:[%s2888_s27 + $0x20] sm:$0xff] %vm52_vm0, %v1803_v11  ;;  %v1816_v19 = vadd.f32 %v1809_v42, %v1759_v22  ;;  %v1817_v33 = vadd.f32 %v1810_v15, %v1760_v54  ;;  %v1818_v37 = vadd.f32 %v1811_v38, %v1761_v7 }
 0x21e   : > { %1844 = vst.msk [vmem:[%s2888_s27 + $0x28] sm:$0xff] %vm52_vm0, %v1804_v30  ;;  %v1819_v10 = vadd.f32 %v1812_v5, %v1762_v1  ;;  %v1820_v41 = vadd.f32 %v1813_v49, %v1763_v32  ;;  %v1821_v31 = vadd.f32 %v1814_v39, %v1764_v55  ;;  %v1824_v24 = vmul.f32 %v2188_v3, %v1823_v17 }
 0x21f   : > { %v1825_v40 = vmul.f32 %v2189_v2, %v1823_v17  ;;  %2198 = vst.msk [vmem:[%s2888_s27 + $0x70] sm:$0xff] %vm52_vm0, %v1815_v4  ;;  %v1826_v50 = vmul.f32 %v2190_v9, %v1823_v17  ;;  %v1827_v12 = vmul.f32 %v2191_v28, %v1823_v17  ;;  %v1828_v61 = vmul.f32 %v2192_v45, %v1823_v17 }
 0x220   : > { %v1829_v36 = vmul.f32 %v2193_v57, %v1823_v17  ;;  %2199 = vst.msk [vmem:[%s2888_s27 + $0x78] sm:$0xff] %vm52_vm0, %v1816_v19  ;;  %2200 = vst.msk [vmem:[%s2888_s27 + $0x80] sm:$0xff] %vm52_vm0, %v1817_v33  ;;  %v1830_v22 = vmul.f32 %v2194_v13, %v1823_v17  ;;  %v1831_v54 = vadd.f32 %v1824_v24, %v1774_v53 }
 0x221   : > { %2201 = vst.msk [vmem:[%s2888_s27 + $0x88] sm:$0xff] %vm52_vm0, %v1818_v37  ;;  %2202 = vst.msk [vmem:[%s2888_s27 + $0x90] sm:$0xff] %vm52_vm0, %v1819_v10  ;;  %v1832_v7 = vadd.f32 %v1825_v40, %v1775_v62  ;;  %v1833_v1 = vadd.f32 %v1826_v50, %v1776_v59  ;;  %v1834_v32 = vadd.f32 %v1827_v12, %v1777_v6  ;;  %411 = sbr.rel (!%p409_p13) target bundleno = 258 (0x102), region = 75 }
 0x222   : > { %2203 = vst.msk [vmem:[%s2888_s27 + $0x98] sm:$0xff] %vm52_vm0, %v1820_v41  ;;  %v1835_v55 = vadd.f32 %v1828_v61, %v1778_v47  ;;  %v1836_v60 = vadd.f32 %v1829_v36, %v1779_v46  ;;  %v1837_v0 = vadd.f32 %v1830_v22, %v1780_v16  ;;  %2205 = vst.msk [vmem:[%s2888_s27 + $0xe0] sm:$0xff] %vm52_vm0, %v1831_v54 }
 0x223   : > { %1846 = vst.msk [vmem:[%s2888_s27 + $0x30] sm:$0x3f] %vm1845_vm1, %v1805_v25  ;;  %2204 = vst.msk [vmem:[%s2888_s27 + $0xa0] sm:$0x3f] %vm1845_vm1, %v1821_v31 }
 0x224   : > { %2206 = vst.msk [vmem:[%s2888_s27 + $0xe8] sm:$0xff] %vm52_vm0, %v1832_v7  ;;  %2207 = vst.msk [vmem:[%s2888_s27 + $0xf0] sm:$0xff] %vm52_vm0, %v1833_v1 }
 0x225   : > { %2208 = vst.msk [vmem:[%s2888_s27 + $0xf8] sm:$0xff] %vm52_vm0, %v1834_v32  ;;  %2209 = vst.msk [vmem:[%s2888_s27 + $0x100] sm:$0xff] %vm52_vm0, %v1835_v55 }
 0x226   : > { %2210 = vst.msk [vmem:[%s2888_s27 + $0x108] sm:$0xff] %vm52_vm0, %v1836_v60 }
 0x227   : > { %2211 = vst.msk [vmem:[%s2888_s27 + $0x110] sm:$0x3f] %vm1845_vm1, %v1837_v0 }
 0x228   :  { %1867 = vsyncpa [#allocation4], 1 }
 0x229   :  { %1868 = vsyncpa [#allocation5], 1 }

</bundles_post_ra>
